<compile_context>
chip_gen: v6e
topology: v6e:2x2x1
jax: 0.10.0
libtpu: 0.0.40
codegen_flags: <defaults>
</compile_context>

<pallas_src>
import functools

import numpy as np
import jax
import jax.numpy as jnp
from jax import lax
from jax.experimental import pallas as pl
from jax.experimental.pallas import tpu as pltpu

_EPS = 1e-5
_VMEM_LIMIT = 32 * 1024 * 1024
_MXU_DTYPE = jnp.float32

_KX = np.array([[-1., 0., 1.], [-2., 0., 2.], [-1., 0., 1.]], np.float32)
_KY = np.array([[-1., -2., -1.], [0., 0., 0.], [1., 2., 1.]], np.float32)


# -----------------------------------------------------------------------------
# Small in-kernel helpers
# -----------------------------------------------------------------------------
def _mm(a, b):
    """a @ b on the MXU with f32 accumulation."""
    return jnp.dot(a.astype(_MXU_DTYPE), b.astype(_MXU_DTYPE),
                   preferred_element_type=jnp.float32)


def _mm_rt(a, b):
    """a @ b.T (contract the last dim of both operands) with f32 accumulation."""
    return lax.dot_general(a.astype(_MXU_DTYPE), b.astype(_MXU_DTYPE),
                           (((1,), (1,)), ((), ())),
                           preferred_element_type=jnp.float32)


def _bn(y, inv_n, gamma, beta, eps, relu):
    """Training-mode BatchNorm (biased batch variance) + optional ReLU.

    Stats are reductions over the lane axis (= batch*spatial folded)."""
    mean = jnp.sum(y, axis=1, keepdims=True) * inv_n
    var = jnp.maximum(jnp.sum(y * y, axis=1, keepdims=True) * inv_n - mean * mean, 0.0)
    y = (y - mean) * lax.rsqrt(var + eps) * gamma + beta
    return jnp.maximum(y, 0.0) if relu else y


def _shift_lanes(x, off):
    """result[:, k] = x[:, k + off] (cyclic; callers mask the wrapped lanes)."""
    n = x.shape[-1]
    if off % n == 0:
        return x
    return pltpu.roll(x, (-off) % n, axis=1)


def _conv3x3(x, taps_ref, mask_ref, img_w):
    """3x3 stride-1 pad-1 conv of x (Cin, B*H*W): 9 roll taps + (Cout,Cin) mixes."""
    acc = None
    for a in range(3):
        for b_ in range(3):
            t = a * 3 + b_
            off = (a - 1) * img_w + (b_ - 1)
            xt = _shift_lanes(x, off) * mask_ref[t]       # zero-pad via mask
            term = _mm(taps_ref[t], xt)
            acc = term if acc is None else acc + term
    return acc


# -----------------------------------------------------------------------------
# The fused kernel (single invocation, whole batch in VMEM)
# -----------------------------------------------------------------------------
def _acfe_gcn_kernel(x_ref, wci_ref, pc_ref, wgin_ref, cmask_ref, dsel_ref,
                     smix_ref, nmask_ref, wfc_ref, up_ref,
                     woa_ref, wob_ref, woc_ref, ocb_ref, o_ref,
                     *, batch, h, w, nn, eps):
    hw = h * w
    bhw = batch * hw
    bnn = batch * nn
    pc = pc_ref[...]                                       # (c2, 10) packed params

    # Batch folded onto lanes: (C, B*H*W) -> lane-dense VPU work everywhere.
    xf = jnp.concatenate([x_ref[bi] for bi in range(batch)], axis=1)

    # ---- channel_in: 1x1 conv (+bias) + BN(batch stats) + ReLU -------------
    xin = _bn(_mm(wci_ref[...], xf) + pc[:, 0:1], 1.0 / bhw,
              pc[:, 1:2], pc[:, 2:3], eps, relu=True)      # (c2, B*hw)

    # ---- GCNChannel.input: 3x3 stride-2 pad-1 conv -------------------------
    # stride-2 output == stride-1 output sub-sampled at even rows/cols, so:
    # roll-tap stride-1 conv, then ONE block-diagonal selection matmul.
    y = _mm(_conv3x3(xin, wgin_ref, cmask_ref, w), dsel_ref[...]) + pc[:, 3:4]
    mt = _bn(y, 1.0 / bnn, pc[:, 4:5], pc[:, 5:6], eps, relu=True)   # (c2, B*nn)

    # ---- Sobel(1,1) on the (nodes, channels) image, transposed layout ------
    # node-axis taps = lane rolls + boundary mask; channel-axis taps folded
    # with the Sobel coefficients into per-tap (c2,c2) mix matrices.
    sx = None
    sy = None
    for a in range(3):
        t = _shift_lanes(mt, a - 1) * nmask_ref[a]
        tx = _mm(smix_ref[a], t)                           # -> |Sobel_x|^T terms
        ty = _mm(smix_ref[3 + a], t)                       # -> |Sobel_y|^T terms
        sx = tx if sx is None else sx + tx
        sy = ty if sy is None else sy + ty
    sx = jnp.abs(sx)                                       # (c2, B*nn)
    sy = jnp.abs(sy)

    row = lax.broadcasted_iota(jnp.int32, (nn, nn), 0)
    col = lax.broadcasted_iota(jnp.int32, (nn, nn), 1)
    eye = (row == col).astype(jnp.float32)                 # built once, reused

    parts = []
    for bi in range(batch):
        lo, hi = bi * nn, (bi + 1) * nn
        # A[p,q] = sum_c |Sx|[c,p] |Sy|[c,q]  (dim-0 contraction fed to the MXU)
        a_mat = lax.dot_general(sx[:, lo:hi], sy[:, lo:hi],
                                (((0,), (0,)), ((), ())),
                                preferred_element_type=jnp.float32)   # (nn, nn)
        # softmax(dim=-1)
        a_mat = a_mat - jnp.max(a_mat, axis=-1, keepdims=True)
        e = jnp.exp(a_mat)
        a_mat = e * pl.reciprocal(jnp.sum(e, axis=-1, keepdims=True), approx=True)
        # normalize(): D^-1/2 (A + I) D^-1/2   (column scaling via diag matmul)
        a1 = a_mat + eye
        dinv = lax.rsqrt(jnp.sum(a1, axis=1, keepdims=True))          # (nn, 1)
        an = _mm(a1 * dinv, eye * dinv)

        # ---- 3 GCN layers:  H' = act(W @ (H @ A^T)) ----
        mtb = mt[:, lo:hi]
        g = jnp.maximum(_mm(wfc_ref[0], _mm_rt(mtb, an)), 0.0)
        g = jnp.maximum(_mm(wfc_ref[1], _mm_rt(g, an)), 0.0)
        g = _mm(wfc_ref[2], _mm_rt(g, an))                 # (c2, nn)

        # bilinear upsample (align_corners=True) as one matmul
        parts.append(_mm(g, up_ref[...]))                  # (c2, hw)

    xch = xin + jnp.concatenate(parts, axis=1)             # residual add

    # ---- output head: 1x1(noB)+BN, 3x3(noB)+BN+ReLU, 1x1(+bias) ------------
    t1 = _bn(_mm(woa_ref[...], xch), 1.0 / bhw,
             pc[:, 6:7], pc[:, 7:8], eps, relu=False)
    t2 = _bn(_conv3x3(t1, wob_ref, cmask_ref, w), 1.0 / bhw,
             pc[:, 8:9], pc[:, 9:10], eps, relu=True)
    out = _mm(woc_ref[...], t2) + ocb_ref[...]             # (cout, B*hw)

    for bi in range(batch):
        o_ref[bi] = out[:, bi * hw:(bi + 1) * hw]


# -----------------------------------------------------------------------------
# Host-side constant matrices / masks (tiny, numpy, built once per shape)
# -----------------------------------------------------------------------------
def _downsample_matrix(h, w, batch):
    """Block-diag (B*hw, B*nn) 0/1 matrix: picks the (2i, 2j) stride-1 outputs."""
    h1 = (h - 1) // 2 + 1
    w1 = (w - 1) // 2 + 1
    hw, nn = h * w, h1 * w1
    d = np.zeros((hw, nn), np.float32)
    for i in range(h1):
        for j in range(w1):
            d[(2 * i) * w + 2 * j, i * w1 + j] = 1.0
    bd = np.zeros((batch * hw, batch * nn), np.float32)
    for bi in range(batch):
        bd[bi * hw:(bi + 1) * hw, bi * nn:(bi + 1) * nn] = d
    return jnp.asarray(bd), h1, w1


def _conv_tap_masks(h, w, batch):
    """(9, 1, B*hw) 0/1 masks: tap (a,b) valid iff (i+a-1, j+b-1) is in-image."""
    vi = np.array([[1.0 if 0 <= i + a - 1 < h else 0.0 for i in range(h)]
                   for a in range(3)], np.float32)
    vj = np.array([[1.0 if 0 <= j + a - 1 < w else 0.0 for j in range(w)]
                   for a in range(3)], np.float32)
    m = np.zeros((9, 1, batch * h * w), np.float32)
    for a in range(3):
        for b_ in range(3):
            img = np.outer(vi[a], vj[b_]).reshape(-1)
            m[a * 3 + b_, 0] = np.tile(img, batch)
    return jnp.asarray(m)


def _node_tap_masks(nn, batch):
    """(3, 1, B*nn) 0/1 masks for the Sobel node-axis taps (zero padding)."""
    m = np.zeros((3, 1, batch * nn), np.float32)
    for a in range(3):
        v = np.array([1.0 if 0 <= p + a - 1 < nn else 0.0 for p in range(nn)],
                     np.float32)
        m[a, 0] = np.tile(v, batch)
    return jnp.asarray(m)


def _sobel_mix(c2):
    """(6, c2, c2): rows 0-2 fold Kx, rows 3-5 fold Ky over the channel axis."""
    mix = np.zeros((6, c2, c2), np.float32)
    for a in range(3):
        for b_ in range(3):
            for c in range(c2):
                cp = c + b_ - 1
                if 0 <= cp < c2:
                    mix[a, c, cp] = _KX[a, b_]
                    mix[3 + a, c, cp] = _KY[a, b_]
    return jnp.asarray(mix)


def _bilinear_matrix(out_size, in_size):
    """Row-stochastic 1-D bilinear interpolation matrix, align_corners=True."""
    m = np.zeros((out_size, in_size), np.float32)
    if out_size == 1 or in_size == 1:
        m[:, 0] = 1.0
        return m
    scale = (in_size - 1) / (out_size - 1)
    for o in range(out_size):
        src = o * scale
        i0 = min(int(np.floor(src)), in_size - 1)
        i1 = min(i0 + 1, in_size - 1)
        f = src - i0
        m[o, i0] += 1.0 - f
        m[o, i1] += f
    return m


def _upsample_matrix(h, w, h1, w1):
    u = np.kron(_bilinear_matrix(h, h1), _bilinear_matrix(w, w1))  # (hw, nn)
    return jnp.asarray(u.T)                                        # (nn, hw)


# -----------------------------------------------------------------------------
# Full forward pass
# -----------------------------------------------------------------------------
def acfe_gcn_forward(x, params):
    b, cin, h, w = x.shape
    c2 = cin // 2
    hw = h * w
    cout = params['oc_w'].shape[0]

    dsel, h1, w1 = _downsample_matrix(h, w, b)
    nn = h1 * w1
    cmask = _conv_tap_masks(h, w, b)
    nmask = _node_tap_masks(nn, b)
    smix = _sobel_mix(c2)
    up = _upsample_matrix(h, w, h1, w1)

    # parameters in kernel layout (channels on sublanes)
    wci = params['ci_w'].reshape(c2, cin)
    wgin = params['gin_w'].transpose(2, 3, 0, 1).reshape(9, c2, c2)
    wfc = jnp.stack([params['fc1_w'][:, :, 0], params['fc2_w'][:, :, 0],
                     params['fc3_w'][:, :, 0]])
    woa = params['oa_w'].reshape(c2, c2)
    wob = params['ob_w'].transpose(2, 3, 0, 1).reshape(9, c2, c2)
    woc = params['oc_w'].reshape(cout, c2)
    ocb = params['oc_b'].reshape(cout, 1)
    # pack the ten per-channel vectors into one (c2, 10) operand
    pc = jnp.stack([params['ci_b'], params['ci_gamma'], params['ci_beta'],
                    params['gin_b'], params['gin_gamma'], params['gin_beta'],
                    params['oa_gamma'], params['oa_beta'],
                    params['ob_gamma'], params['ob_beta']], axis=1)

    xf = x.reshape(b, cin, hw)     # NCHW -> (B, C, H*W): free reshape

    kernel = functools.partial(_acfe_gcn_kernel,
                               batch=b, h=h, w=w, nn=nn, eps=_EPS)
    out = pl.pallas_call(
        kernel,
        out_shape=jax.ShapeDtypeStruct((b, cout, hw), jnp.float32),
        compiler_params=pltpu.CompilerParams(vmem_limit_bytes=_VMEM_LIMIT),
    )(xf, wci, pc, wgin, cmask, dsel, smix, nmask, wfc, up,
      woa, wob, woc, ocb)

    return out.reshape(b, cout, h, w)


# -----------------------------------------------------------------------------
# Deterministic parameter init (shapes per ACFE_GCN.__init__)
# -----------------------------------------------------------------------------
def init_params(key, in_channels, out_channels):
    c2 = in_channels // 2
    ks = jax.random.split(key, 20)

    def rnd(k, shape, scale=0.2):
        return scale * jax.random.normal(k, shape, jnp.float32)

    return dict(
        # channel_in: Conv2d(in, in//2, 1, bias=True) + BN
        ci_w=rnd(ks[0], (c2, in_channels, 1, 1)),
        ci_b=rnd(ks[1], (c2,), 0.1),
        ci_gamma=1.0 + rnd(ks[2], (c2,), 0.1),
        ci_beta=rnd(ks[3], (c2,), 0.1),
        # GCNChannel.input: Conv2d(c2, c2, 3, stride=2, pad=1, bias=True) + BN
        gin_w=rnd(ks[4], (c2, c2, 3, 3)),
        gin_b=rnd(ks[5], (c2,), 0.1),
        gin_gamma=1.0 + rnd(ks[6], (c2,), 0.1),
        gin_beta=rnd(ks[7], (c2,), 0.1),
        # GCNChannel.fc1/fc2/fc3: Conv1d(c2, c2, 1, bias=False)
        fc1_w=rnd(ks[8], (c2, c2, 1)),
        fc2_w=rnd(ks[9], (c2, c2, 1)),
        fc3_w=rnd(ks[10], (c2, c2, 1)),
        # output head (oa/ob conv bias=False per the PyTorch module)
        oa_w=rnd(ks[11], (c2, c2, 1, 1)),
        oa_gamma=1.0 + rnd(ks[12], (c2,), 0.1),
        oa_beta=rnd(ks[13], (c2,), 0.1),
        ob_w=rnd(ks[14], (c2, c2, 3, 3)),
        ob_gamma=1.0 + rnd(ks[15], (c2,), 0.1),
        ob_beta=rnd(ks[16], (c2,), 0.1),
        oc_w=rnd(ks[17], (out_channels, c2, 1, 1)),
        oc_b=rnd(ks[18], (out_channels,), 0.1),
    )


if __name__ == "__main__":
    key = jax.random.PRNGKey(0)
    kx, kp = jax.random.split(key)
    in_channels, out_channels = 8, 8
    b, h, w = 2, 16, 16
    x = jax.random.normal(kx, (b, in_channels, h, w), jnp.float32)
    params = init_params(kp, in_channels, out_channels)

    out = acfe_gcn_forward(x, params)
    out = jax.block_until_ready(out)
    assert out.shape == (b, out_channels, h, w), out.shape
    assert bool(jnp.all(jnp.isfinite(out)))
    print("KERNEL_OK")
</pallas_src>

<mosaic_0001>
module attributes {stable_mosaic.version = 11 : i64} {
  func.func @_acfe_gcn_kernel(%arg0: memref<2x8x256xf32, #tpu.memory_space<vmem>>, %arg1: memref<4x8xf32, #tpu.memory_space<vmem>>, %arg2: memref<4x10xf32, #tpu.memory_space<vmem>>, %arg3: memref<9x4x4xf32, #tpu.memory_space<vmem>>, %arg4: memref<9x1x512xf32, #tpu.memory_space<vmem>>, %arg5: memref<512x128xf32, #tpu.memory_space<vmem>>, %arg6: memref<6x4x4xf32, #tpu.memory_space<vmem>>, %arg7: memref<3x1x128xf32, #tpu.memory_space<vmem>>, %arg8: memref<3x4x4xf32, #tpu.memory_space<vmem>>, %arg9: memref<64x256xf32, #tpu.memory_space<vmem>>, %arg10: memref<4x4xf32, #tpu.memory_space<vmem>>, %arg11: memref<9x4x4xf32, #tpu.memory_space<vmem>>, %arg12: memref<8x4xf32, #tpu.memory_space<vmem>>, %arg13: memref<8x1xf32, #tpu.memory_space<vmem>>, %arg14: memref<2x8x256xf32, #tpu.memory_space<vmem>>) attributes {dimension_semantics = [], scalar_prefetch = 0 : i64, scratch_operands = 0 : i64, tpu.core_type = #tpu.core_type<tc>} {
    %c0 = arith.constant 0 : index
    %c0_0 = arith.constant 0 : index
    %0 = vector.load %arg2[%c0, %c0_0] : memref<4x10xf32, #tpu.memory_space<vmem>>, vector<4x10xf32>
    %c0_1 = arith.constant 0 : index
    %c0_2 = arith.constant 0 : index
    %c0_3 = arith.constant 0 : index
    %1 = vector.load %arg0[%c0_1, %c0_2, %c0_3] : memref<2x8x256xf32, #tpu.memory_space<vmem>>, vector<1x8x256xf32>
    %2 = vector.shape_cast %1 : vector<1x8x256xf32> to vector<8x256xf32>
    %c1 = arith.constant 1 : index
    %c0_4 = arith.constant 0 : index
    %c0_5 = arith.constant 0 : index
    %3 = vector.load %arg0[%c1, %c0_4, %c0_5] : memref<2x8x256xf32, #tpu.memory_space<vmem>>, vector<1x8x256xf32>
    %4 = vector.shape_cast %3 : vector<1x8x256xf32> to vector<8x256xf32>
    %5 = tpu.concatenate %2, %4 in 1 : vector<8x256xf32>, vector<8x256xf32> -> vector<8x512xf32>
    %c0_6 = arith.constant 0 : index
    %c0_7 = arith.constant 0 : index
    %6 = vector.load %arg1[%c0_6, %c0_7] : memref<4x8xf32, #tpu.memory_space<vmem>>, vector<4x8xf32>
    %cst = arith.constant dense<0.000000e+00> : vector<4x512xf32>
    %7 = tpu.matmul %6, %5, %cst {dimension_numbers = #tpu.dot_dimension_numbers<[1], [0], [0], [1], [0, 0, 1, 1], [], []>} : vector<4x8xf32>, vector<8x512xf32>, vector<4x512xf32> -> vector<4x512xf32>
    %8 = vector.extract_strided_slice %0 {offsets = [0, 0], sizes = [4, 1], strides = [1, 1]} : vector<4x10xf32> to vector<4x1xf32>
    %9 = vector.broadcast %8 : vector<4x1xf32> to vector<4x512xf32>
    %10 = arith.addf %7, %9 : vector<4x512xf32>
    %11 = vector.extract_strided_slice %0 {offsets = [0, 1], sizes = [4, 1], strides = [1, 1]} : vector<4x10xf32> to vector<4x1xf32>
    %12 = vector.extract_strided_slice %0 {offsets = [0, 2], sizes = [4, 1], strides = [1, 1]} : vector<4x10xf32> to vector<4x1xf32>
    %cst_8 = arith.constant dense<0.000000e+00> : vector<4xf32>
    %13 = vector.multi_reduction <add>, %10, %cst_8 [1] : vector<4x512xf32> to vector<4xf32>
    %14 = vector.shape_cast %13 : vector<4xf32> to vector<4x1xf32>
    %cst_9 = arith.constant 0.001953125 : f32
    %15 = vector.broadcast %cst_9 : f32 to vector<4x1xf32>
    %16 = arith.mulf %14, %15 : vector<4x1xf32>
    %17 = arith.mulf %10, %10 : vector<4x512xf32>
    %cst_10 = arith.constant dense<0.000000e+00> : vector<4xf32>
    %18 = vector.multi_reduction <add>, %17, %cst_10 [1] : vector<4x512xf32> to vector<4xf32>
    %19 = vector.shape_cast %18 : vector<4xf32> to vector<4x1xf32>
    %cst_11 = arith.constant 0.001953125 : f32
    %20 = vector.broadcast %cst_11 : f32 to vector<4x1xf32>
    %21 = arith.mulf %19, %20 : vector<4x1xf32>
    %22 = arith.mulf %16, %16 : vector<4x1xf32>
    %23 = arith.subf %21, %22 : vector<4x1xf32>
    %cst_12 = arith.constant 0.000000e+00 : f32
    %24 = vector.broadcast %cst_12 : f32 to vector<4x1xf32>
    %25 = arith.maximumf %23, %24 : vector<4x1xf32>
    %26 = vector.broadcast %16 : vector<4x1xf32> to vector<4x512xf32>
    %27 = arith.subf %10, %26 : vector<4x512xf32>
    %cst_13 = arith.constant 9.99999974E-6 : f32
    %28 = vector.broadcast %cst_13 : f32 to vector<4x1xf32>
    %29 = arith.addf %25, %28 : vector<4x1xf32>
    %30 = math.rsqrt %29 : vector<4x1xf32>
    %31 = vector.broadcast %30 : vector<4x1xf32> to vector<4x512xf32>
    %32 = arith.mulf %27, %31 : vector<4x512xf32>
    %33 = vector.broadcast %11 : vector<4x1xf32> to vector<4x512xf32>
    %34 = arith.mulf %32, %33 : vector<4x512xf32>
    %35 = vector.broadcast %12 : vector<4x1xf32> to vector<4x512xf32>
    %36 = arith.addf %34, %35 : vector<4x512xf32>
    %cst_14 = arith.constant 0.000000e+00 : f32
    %37 = vector.broadcast %cst_14 : f32 to vector<4x512xf32>
    %38 = arith.maximumf %36, %37 : vector<4x512xf32>
    %c17_i32 = arith.constant 17 : i32
    %39 = tpu.dynamic_rotate %38 by %c17_i32 dim 1 : vector<4x512xf32>, i32 -> vector<4x512xf32>
    %c0_15 = arith.constant 0 : index
    %c0_16 = arith.constant 0 : index
    %c0_17 = arith.constant 0 : index
    %40 = vector.load %arg4[%c0_15, %c0_16, %c0_17] : memref<9x1x512xf32, #tpu.memory_space<vmem>>, vector<1x1x512xf32>
    %41 = vector.shape_cast %40 : vector<1x1x512xf32> to vector<1x512xf32>
    %42 = vector.broadcast %41 : vector<1x512xf32> to vector<4x512xf32>
    %43 = arith.mulf %39, %42 : vector<4x512xf32>
    %c0_18 = arith.constant 0 : index
    %c0_19 = arith.constant 0 : index
    %c0_20 = arith.constant 0 : index
    %44 = vector.load %arg3[%c0_18, %c0_19, %c0_20] : memref<9x4x4xf32, #tpu.memory_space<vmem>>, vector<1x4x4xf32>
    %45 = vector.shape_cast %44 : vector<1x4x4xf32> to vector<4x4xf32>
    %cst_21 = arith.constant dense<0.000000e+00> : vector<4x512xf32>
    %46 = tpu.matmul %45, %43, %cst_21 {dimension_numbers = #tpu.dot_dimension_numbers<[1], [0], [0], [1], [0, 0, 1, 1], [], []>} : vector<4x4xf32>, vector<4x512xf32>, vector<4x512xf32> -> vector<4x512xf32>
    %c16_i32 = arith.constant 16 : i32
    %47 = tpu.dynamic_rotate %38 by %c16_i32 dim 1 : vector<4x512xf32>, i32 -> vector<4x512xf32>
    %c1_22 = arith.constant 1 : index
    %c0_23 = arith.constant 0 : index
    %c0_24 = arith.constant 0 : index
    %48 = vector.load %arg4[%c1_22, %c0_23, %c0_24] : memref<9x1x512xf32, #tpu.memory_space<vmem>>, vector<1x1x512xf32>
    %49 = vector.shape_cast %48 : vector<1x1x512xf32> to vector<1x512xf32>
    %50 = vector.broadcast %49 : vector<1x512xf32> to vector<4x512xf32>
    %51 = arith.mulf %47, %50 : vector<4x512xf32>
    %c1_25 = arith.constant 1 : index
    %c0_26 = arith.constant 0 : index
    %c0_27 = arith.constant 0 : index
    %52 = vector.load %arg3[%c1_25, %c0_26, %c0_27] : memref<9x4x4xf32, #tpu.memory_space<vmem>>, vector<1x4x4xf32>
    %53 = vector.shape_cast %52 : vector<1x4x4xf32> to vector<4x4xf32>
    %cst_28 = arith.constant dense<0.000000e+00> : vector<4x512xf32>
    %54 = tpu.matmul %53, %51, %cst_28 {dimension_numbers = #tpu.dot_dimension_numbers<[1], [0], [0], [1], [0, 0, 1, 1], [], []>} : vector<4x4xf32>, vector<4x512xf32>, vector<4x512xf32> -> vector<4x512xf32>
    %55 = arith.addf %46, %54 : vector<4x512xf32>
    %c15_i32 = arith.constant 15 : i32
    %56 = tpu.dynamic_rotate %38 by %c15_i32 dim 1 : vector<4x512xf32>, i32 -> vector<4x512xf32>
    %c2 = arith.constant 2 : index
    %c0_29 = arith.constant 0 : index
    %c0_30 = arith.constant 0 : index
    %57 = vector.load %arg4[%c2, %c0_29, %c0_30] : memref<9x1x512xf32, #tpu.memory_space<vmem>>, vector<1x1x512xf32>
    %58 = vector.shape_cast %57 : vector<1x1x512xf32> to vector<1x512xf32>
    %59 = vector.broadcast %58 : vector<1x512xf32> to vector<4x512xf32>
    %60 = arith.mulf %56, %59 : vector<4x512xf32>
    %c2_31 = arith.constant 2 : index
    %c0_32 = arith.constant 0 : index
    %c0_33 = arith.constant 0 : index
    %61 = vector.load %arg3[%c2_31, %c0_32, %c0_33] : memref<9x4x4xf32, #tpu.memory_space<vmem>>, vector<1x4x4xf32>
    %62 = vector.shape_cast %61 : vector<1x4x4xf32> to vector<4x4xf32>
    %cst_34 = arith.constant dense<0.000000e+00> : vector<4x512xf32>
    %63 = tpu.matmul %62, %60, %cst_34 {dimension_numbers = #tpu.dot_dimension_numbers<[1], [0], [0], [1], [0, 0, 1, 1], [], []>} : vector<4x4xf32>, vector<4x512xf32>, vector<4x512xf32> -> vector<4x512xf32>
    %64 = arith.addf %55, %63 : vector<4x512xf32>
    %c1_i32 = arith.constant 1 : i32
    %65 = tpu.dynamic_rotate %38 by %c1_i32 dim 1 : vector<4x512xf32>, i32 -> vector<4x512xf32>
    %c3 = arith.constant 3 : index
    %c0_35 = arith.constant 0 : index
    %c0_36 = arith.constant 0 : index
    %66 = vector.load %arg4[%c3, %c0_35, %c0_36] : memref<9x1x512xf32, #tpu.memory_space<vmem>>, vector<1x1x512xf32>
    %67 = vector.shape_cast %66 : vector<1x1x512xf32> to vector<1x512xf32>
    %68 = vector.broadcast %67 : vector<1x512xf32> to vector<4x512xf32>
    %69 = arith.mulf %65, %68 : vector<4x512xf32>
    %c3_37 = arith.constant 3 : index
    %c0_38 = arith.constant 0 : index
    %c0_39 = arith.constant 0 : index
    %70 = vector.load %arg3[%c3_37, %c0_38, %c0_39] : memref<9x4x4xf32, #tpu.memory_space<vmem>>, vector<1x4x4xf32>
    %71 = vector.shape_cast %70 : vector<1x4x4xf32> to vector<4x4xf32>
    %cst_40 = arith.constant dense<0.000000e+00> : vector<4x512xf32>
    %72 = tpu.matmul %71, %69, %cst_40 {dimension_numbers = #tpu.dot_dimension_numbers<[1], [0], [0], [1], [0, 0, 1, 1], [], []>} : vector<4x4xf32>, vector<4x512xf32>, vector<4x512xf32> -> vector<4x512xf32>
    %73 = arith.addf %64, %72 : vector<4x512xf32>
    %c4 = arith.constant 4 : index
    %c0_41 = arith.constant 0 : index
    %c0_42 = arith.constant 0 : index
    %74 = vector.load %arg4[%c4, %c0_41, %c0_42] : memref<9x1x512xf32, #tpu.memory_space<vmem>>, vector<1x1x512xf32>
    %75 = vector.shape_cast %74 : vector<1x1x512xf32> to vector<1x512xf32>
    %76 = vector.broadcast %75 : vector<1x512xf32> to vector<4x512xf32>
    %77 = arith.mulf %38, %76 : vector<4x512xf32>
    %c4_43 = arith.constant 4 : index
    %c0_44 = arith.constant 0 : index
    %c0_45 = arith.constant 0 : index
    %78 = vector.load %arg3[%c4_43, %c0_44, %c0_45] : memref<9x4x4xf32, #tpu.memory_space<vmem>>, vector<1x4x4xf32>
    %79 = vector.shape_cast %78 : vector<1x4x4xf32> to vector<4x4xf32>
    %cst_46 = arith.constant dense<0.000000e+00> : vector<4x512xf32>
    %80 = tpu.matmul %79, %77, %cst_46 {dimension_numbers = #tpu.dot_dimension_numbers<[1], [0], [0], [1], [0, 0, 1, 1], [], []>} : vector<4x4xf32>, vector<4x512xf32>, vector<4x512xf32> -> vector<4x512xf32>
    %81 = arith.addf %73, %80 : vector<4x512xf32>
    %c511_i32 = arith.constant 511 : i32
    %82 = tpu.dynamic_rotate %38 by %c511_i32 dim 1 : vector<4x512xf32>, i32 -> vector<4x512xf32>
    %c5 = arith.constant 5 : index
    %c0_47 = arith.constant 0 : index
    %c0_48 = arith.constant 0 : index
    %83 = vector.load %arg4[%c5, %c0_47, %c0_48] : memref<9x1x512xf32, #tpu.memory_space<vmem>>, vector<1x1x512xf32>
    %84 = vector.shape_cast %83 : vector<1x1x512xf32> to vector<1x512xf32>
    %85 = vector.broadcast %84 : vector<1x512xf32> to vector<4x512xf32>
    %86 = arith.mulf %82, %85 : vector<4x512xf32>
    %c5_49 = arith.constant 5 : index
    %c0_50 = arith.constant 0 : index
    %c0_51 = arith.constant 0 : index
    %87 = vector.load %arg3[%c5_49, %c0_50, %c0_51] : memref<9x4x4xf32, #tpu.memory_space<vmem>>, vector<1x4x4xf32>
    %88 = vector.shape_cast %87 : vector<1x4x4xf32> to vector<4x4xf32>
    %cst_52 = arith.constant dense<0.000000e+00> : vector<4x512xf32>
    %89 = tpu.matmul %88, %86, %cst_52 {dimension_numbers = #tpu.dot_dimension_numbers<[1], [0], [0], [1], [0, 0, 1, 1], [], []>} : vector<4x4xf32>, vector<4x512xf32>, vector<4x512xf32> -> vector<4x512xf32>
    %90 = arith.addf %81, %89 : vector<4x512xf32>
    %c497_i32 = arith.constant 497 : i32
    %91 = tpu.dynamic_rotate %38 by %c497_i32 dim 1 : vector<4x512xf32>, i32 -> vector<4x512xf32>
    %c6 = arith.constant 6 : index
    %c0_53 = arith.constant 0 : index
    %c0_54 = arith.constant 0 : index
    %92 = vector.load %arg4[%c6, %c0_53, %c0_54] : memref<9x1x512xf32, #tpu.memory_space<vmem>>, vector<1x1x512xf32>
    %93 = vector.shape_cast %92 : vector<1x1x512xf32> to vector<1x512xf32>
    %94 = vector.broadcast %93 : vector<1x512xf32> to vector<4x512xf32>
    %95 = arith.mulf %91, %94 : vector<4x512xf32>
    %c6_55 = arith.constant 6 : index
    %c0_56 = arith.constant 0 : index
    %c0_57 = arith.constant 0 : index
    %96 = vector.load %arg3[%c6_55, %c0_56, %c0_57] : memref<9x4x4xf32, #tpu.memory_space<vmem>>, vector<1x4x4xf32>
    %97 = vector.shape_cast %96 : vector<1x4x4xf32> to vector<4x4xf32>
    %cst_58 = arith.constant dense<0.000000e+00> : vector<4x512xf32>
    %98 = tpu.matmul %97, %95, %cst_58 {dimension_numbers = #tpu.dot_dimension_numbers<[1], [0], [0], [1], [0, 0, 1, 1], [], []>} : vector<4x4xf32>, vector<4x512xf32>, vector<4x512xf32> -> vector<4x512xf32>
    %99 = arith.addf %90, %98 : vector<4x512xf32>
    %c496_i32 = arith.constant 496 : i32
    %100 = tpu.dynamic_rotate %38 by %c496_i32 dim 1 : vector<4x512xf32>, i32 -> vector<4x512xf32>
    %c7 = arith.constant 7 : index
    %c0_59 = arith.constant 0 : index
    %c0_60 = arith.constant 0 : index
    %101 = vector.load %arg4[%c7, %c0_59, %c0_60] : memref<9x1x512xf32, #tpu.memory_space<vmem>>, vector<1x1x512xf32>
    %102 = vector.shape_cast %101 : vector<1x1x512xf32> to vector<1x512xf32>
    %103 = vector.broadcast %102 : vector<1x512xf32> to vector<4x512xf32>
    %104 = arith.mulf %100, %103 : vector<4x512xf32>
    %c7_61 = arith.constant 7 : index
    %c0_62 = arith.constant 0 : index
    %c0_63 = arith.constant 0 : index
    %105 = vector.load %arg3[%c7_61, %c0_62, %c0_63] : memref<9x4x4xf32, #tpu.memory_space<vmem>>, vector<1x4x4xf32>
    %106 = vector.shape_cast %105 : vector<1x4x4xf32> to vector<4x4xf32>
    %cst_64 = arith.constant dense<0.000000e+00> : vector<4x512xf32>
    %107 = tpu.matmul %106, %104, %cst_64 {dimension_numbers = #tpu.dot_dimension_numbers<[1], [0], [0], [1], [0, 0, 1, 1], [], []>} : vector<4x4xf32>, vector<4x512xf32>, vector<4x512xf32> -> vector<4x512xf32>
    %108 = arith.addf %99, %107 : vector<4x512xf32>
    %c495_i32 = arith.constant 495 : i32
    %109 = tpu.dynamic_rotate %38 by %c495_i32 dim 1 : vector<4x512xf32>, i32 -> vector<4x512xf32>
    %c8 = arith.constant 8 : index
    %c0_65 = arith.constant 0 : index
    %c0_66 = arith.constant 0 : index
    %110 = vector.load %arg4[%c8, %c0_65, %c0_66] : memref<9x1x512xf32, #tpu.memory_space<vmem>>, vector<1x1x512xf32>
    %111 = vector.shape_cast %110 : vector<1x1x512xf32> to vector<1x512xf32>
    %112 = vector.broadcast %111 : vector<1x512xf32> to vector<4x512xf32>
    %113 = arith.mulf %109, %112 : vector<4x512xf32>
    %c8_67 = arith.constant 8 : index
    %c0_68 = arith.constant 0 : index
    %c0_69 = arith.constant 0 : index
    %114 = vector.load %arg3[%c8_67, %c0_68, %c0_69] : memref<9x4x4xf32, #tpu.memory_space<vmem>>, vector<1x4x4xf32>
    %115 = vector.shape_cast %114 : vector<1x4x4xf32> to vector<4x4xf32>
    %cst_70 = arith.constant dense<0.000000e+00> : vector<4x512xf32>
    %116 = tpu.matmul %115, %113, %cst_70 {dimension_numbers = #tpu.dot_dimension_numbers<[1], [0], [0], [1], [0, 0, 1, 1], [], []>} : vector<4x4xf32>, vector<4x512xf32>, vector<4x512xf32> -> vector<4x512xf32>
    %117 = arith.addf %108, %116 : vector<4x512xf32>
    %c0_71 = arith.constant 0 : index
    %c0_72 = arith.constant 0 : index
    %118 = vector.load %arg5[%c0_71, %c0_72] : memref<512x128xf32, #tpu.memory_space<vmem>>, vector<512x128xf32>
    %cst_73 = arith.constant dense<0.000000e+00> : vector<4x128xf32>
    %119 = tpu.matmul %117, %118, %cst_73 {dimension_numbers = #tpu.dot_dimension_numbers<[1], [0], [0], [1], [0, 0, 1, 1], [], []>} : vector<4x512xf32>, vector<512x128xf32>, vector<4x128xf32> -> vector<4x128xf32>
    %120 = vector.extract_strided_slice %0 {offsets = [0, 3], sizes = [4, 1], strides = [1, 1]} : vector<4x10xf32> to vector<4x1xf32>
    %121 = vector.broadcast %120 : vector<4x1xf32> to vector<4x128xf32>
    %122 = arith.addf %119, %121 : vector<4x128xf32>
    %123 = vector.extract_strided_slice %0 {offsets = [0, 4], sizes = [4, 1], strides = [1, 1]} : vector<4x10xf32> to vector<4x1xf32>
    %124 = vector.extract_strided_slice %0 {offsets = [0, 5], sizes = [4, 1], strides = [1, 1]} : vector<4x10xf32> to vector<4x1xf32>
    %cst_74 = arith.constant dense<0.000000e+00> : vector<4xf32>
    %125 = vector.multi_reduction <add>, %122, %cst_74 [1] : vector<4x128xf32> to vector<4xf32>
    %126 = vector.shape_cast %125 : vector<4xf32> to vector<4x1xf32>
    %cst_75 = arith.constant 7.812500e-03 : f32
    %127 = vector.broadcast %cst_75 : f32 to vector<4x1xf32>
    %128 = arith.mulf %126, %127 : vector<4x1xf32>
    %129 = arith.mulf %122, %122 : vector<4x128xf32>
    %cst_76 = arith.constant dense<0.000000e+00> : vector<4xf32>
    %130 = vector.multi_reduction <add>, %129, %cst_76 [1] : vector<4x128xf32> to vector<4xf32>
    %131 = vector.shape_cast %130 : vector<4xf32> to vector<4x1xf32>
    %cst_77 = arith.constant 7.812500e-03 : f32
    %132 = vector.broadcast %cst_77 : f32 to vector<4x1xf32>
    %133 = arith.mulf %131, %132 : vector<4x1xf32>
    %134 = arith.mulf %128, %128 : vector<4x1xf32>
    %135 = arith.subf %133, %134 : vector<4x1xf32>
    %cst_78 = arith.constant 0.000000e+00 : f32
    %136 = vector.broadcast %cst_78 : f32 to vector<4x1xf32>
    %137 = arith.maximumf %135, %136 : vector<4x1xf32>
    %138 = vector.broadcast %128 : vector<4x1xf32> to vector<4x128xf32>
    %139 = arith.subf %122, %138 : vector<4x128xf32>
    %cst_79 = arith.constant 9.99999974E-6 : f32
    %140 = vector.broadcast %cst_79 : f32 to vector<4x1xf32>
    %141 = arith.addf %137, %140 : vector<4x1xf32>
    %142 = math.rsqrt %141 : vector<4x1xf32>
    %143 = vector.broadcast %142 : vector<4x1xf32> to vector<4x128xf32>
    %144 = arith.mulf %139, %143 : vector<4x128xf32>
    %145 = vector.broadcast %123 : vector<4x1xf32> to vector<4x128xf32>
    %146 = arith.mulf %144, %145 : vector<4x128xf32>
    %147 = vector.broadcast %124 : vector<4x1xf32> to vector<4x128xf32>
    %148 = arith.addf %146, %147 : vector<4x128xf32>
    %cst_80 = arith.constant 0.000000e+00 : f32
    %149 = vector.broadcast %cst_80 : f32 to vector<4x128xf32>
    %150 = arith.maximumf %148, %149 : vector<4x128xf32>
    %c1_i32_81 = arith.constant 1 : i32
    %151 = tpu.dynamic_rotate %150 by %c1_i32_81 dim 1 : vector<4x128xf32>, i32 -> vector<4x128xf32>
    %c0_82 = arith.constant 0 : index
    %c0_83 = arith.constant 0 : index
    %c0_84 = arith.constant 0 : index
    %152 = vector.load %arg7[%c0_82, %c0_83, %c0_84] : memref<3x1x128xf32, #tpu.memory_space<vmem>>, vector<1x1x128xf32>
    %153 = vector.shape_cast %152 : vector<1x1x128xf32> to vector<1x128xf32>
    %154 = vector.broadcast %153 : vector<1x128xf32> to vector<4x128xf32>
    %155 = arith.mulf %151, %154 : vector<4x128xf32>
    %c0_85 = arith.constant 0 : index
    %c0_86 = arith.constant 0 : index
    %c0_87 = arith.constant 0 : index
    %156 = vector.load %arg6[%c0_85, %c0_86, %c0_87] : memref<6x4x4xf32, #tpu.memory_space<vmem>>, vector<1x4x4xf32>
    %157 = vector.shape_cast %156 : vector<1x4x4xf32> to vector<4x4xf32>
    %cst_88 = arith.constant dense<0.000000e+00> : vector<4x128xf32>
    %158 = tpu.matmul %157, %155, %cst_88 {dimension_numbers = #tpu.dot_dimension_numbers<[1], [0], [0], [1], [0, 0, 1, 1], [], []>} : vector<4x4xf32>, vector<4x128xf32>, vector<4x128xf32> -> vector<4x128xf32>
    %c3_89 = arith.constant 3 : index
    %c0_90 = arith.constant 0 : index
    %c0_91 = arith.constant 0 : index
    %159 = vector.load %arg6[%c3_89, %c0_90, %c0_91] : memref<6x4x4xf32, #tpu.memory_space<vmem>>, vector<1x4x4xf32>
    %160 = vector.shape_cast %159 : vector<1x4x4xf32> to vector<4x4xf32>
    %cst_92 = arith.constant dense<0.000000e+00> : vector<4x128xf32>
    %161 = tpu.matmul %160, %155, %cst_92 {dimension_numbers = #tpu.dot_dimension_numbers<[1], [0], [0], [1], [0, 0, 1, 1], [], []>} : vector<4x4xf32>, vector<4x128xf32>, vector<4x128xf32> -> vector<4x128xf32>
    %c1_93 = arith.constant 1 : index
    %c0_94 = arith.constant 0 : index
    %c0_95 = arith.constant 0 : index
    %162 = vector.load %arg7[%c1_93, %c0_94, %c0_95] : memref<3x1x128xf32, #tpu.memory_space<vmem>>, vector<1x1x128xf32>
    %163 = vector.shape_cast %162 : vector<1x1x128xf32> to vector<1x128xf32>
    %164 = vector.broadcast %163 : vector<1x128xf32> to vector<4x128xf32>
    %165 = arith.mulf %150, %164 : vector<4x128xf32>
    %c1_96 = arith.constant 1 : index
    %c0_97 = arith.constant 0 : index
    %c0_98 = arith.constant 0 : index
    %166 = vector.load %arg6[%c1_96, %c0_97, %c0_98] : memref<6x4x4xf32, #tpu.memory_space<vmem>>, vector<1x4x4xf32>
    %167 = vector.shape_cast %166 : vector<1x4x4xf32> to vector<4x4xf32>
    %cst_99 = arith.constant dense<0.000000e+00> : vector<4x128xf32>
    %168 = tpu.matmul %167, %165, %cst_99 {dimension_numbers = #tpu.dot_dimension_numbers<[1], [0], [0], [1], [0, 0, 1, 1], [], []>} : vector<4x4xf32>, vector<4x128xf32>, vector<4x128xf32> -> vector<4x128xf32>
    %c4_100 = arith.constant 4 : index
    %c0_101 = arith.constant 0 : index
    %c0_102 = arith.constant 0 : index
    %169 = vector.load %arg6[%c4_100, %c0_101, %c0_102] : memref<6x4x4xf32, #tpu.memory_space<vmem>>, vector<1x4x4xf32>
    %170 = vector.shape_cast %169 : vector<1x4x4xf32> to vector<4x4xf32>
    %cst_103 = arith.constant dense<0.000000e+00> : vector<4x128xf32>
    %171 = tpu.matmul %170, %165, %cst_103 {dimension_numbers = #tpu.dot_dimension_numbers<[1], [0], [0], [1], [0, 0, 1, 1], [], []>} : vector<4x4xf32>, vector<4x128xf32>, vector<4x128xf32> -> vector<4x128xf32>
    %172 = arith.addf %158, %168 : vector<4x128xf32>
    %173 = arith.addf %161, %171 : vector<4x128xf32>
    %c127_i32 = arith.constant 127 : i32
    %174 = tpu.dynamic_rotate %150 by %c127_i32 dim 1 : vector<4x128xf32>, i32 -> vector<4x128xf32>
    %c2_104 = arith.constant 2 : index
    %c0_105 = arith.constant 0 : index
    %c0_106 = arith.constant 0 : index
    %175 = vector.load %arg7[%c2_104, %c0_105, %c0_106] : memref<3x1x128xf32, #tpu.memory_space<vmem>>, vector<1x1x128xf32>
    %176 = vector.shape_cast %175 : vector<1x1x128xf32> to vector<1x128xf32>
    %177 = vector.broadcast %176 : vector<1x128xf32> to vector<4x128xf32>
    %178 = arith.mulf %174, %177 : vector<4x128xf32>
    %c2_107 = arith.constant 2 : index
    %c0_108 = arith.constant 0 : index
    %c0_109 = arith.constant 0 : index
    %179 = vector.load %arg6[%c2_107, %c0_108, %c0_109] : memref<6x4x4xf32, #tpu.memory_space<vmem>>, vector<1x4x4xf32>
    %180 = vector.shape_cast %179 : vector<1x4x4xf32> to vector<4x4xf32>
    %cst_110 = arith.constant dense<0.000000e+00> : vector<4x128xf32>
    %181 = tpu.matmul %180, %178, %cst_110 {dimension_numbers = #tpu.dot_dimension_numbers<[1], [0], [0], [1], [0, 0, 1, 1], [], []>} : vector<4x4xf32>, vector<4x128xf32>, vector<4x128xf32> -> vector<4x128xf32>
    %c5_111 = arith.constant 5 : index
    %c0_112 = arith.constant 0 : index
    %c0_113 = arith.constant 0 : index
    %182 = vector.load %arg6[%c5_111, %c0_112, %c0_113] : memref<6x4x4xf32, #tpu.memory_space<vmem>>, vector<1x4x4xf32>
    %183 = vector.shape_cast %182 : vector<1x4x4xf32> to vector<4x4xf32>
    %cst_114 = arith.constant dense<0.000000e+00> : vector<4x128xf32>
    %184 = tpu.matmul %183, %178, %cst_114 {dimension_numbers = #tpu.dot_dimension_numbers<[1], [0], [0], [1], [0, 0, 1, 1], [], []>} : vector<4x4xf32>, vector<4x128xf32>, vector<4x128xf32> -> vector<4x128xf32>
    %185 = arith.addf %172, %181 : vector<4x128xf32>
    %186 = arith.addf %173, %184 : vector<4x128xf32>
    %187 = math.absf %185 : vector<4x128xf32>
    %188 = math.absf %186 : vector<4x128xf32>
    %189 = tpu.iota {dimensions = array<i32: 0>} : vector<64x64xi32>
    %190 = tpu.iota {dimensions = array<i32: 1>} : vector<64x64xi32>
    %191 = arith.cmpi eq, %189, %190 : vector<64x64xi32>
    %192 = arith.extui %191 : vector<64x64xi1> to vector<64x64xi32>
    %193 = arith.sitofp %192 : vector<64x64xi32> to vector<64x64xf32>
    %194 = vector.extract_strided_slice %187 {offsets = [0, 0], sizes = [4, 64], strides = [1, 1]} : vector<4x128xf32> to vector<4x64xf32>
    %195 = vector.extract_strided_slice %188 {offsets = [0, 0], sizes = [4, 64], strides = [1, 1]} : vector<4x128xf32> to vector<4x64xf32>
    %cst_115 = arith.constant dense<0.000000e+00> : vector<64x64xf32>
    %196 = tpu.matmul %194, %195, %cst_115 {dimension_numbers = #tpu.dot_dimension_numbers<[0], [0], [1], [1], [0, 1, 1, 1], [], []>} : vector<4x64xf32>, vector<4x64xf32>, vector<64x64xf32> -> vector<64x64xf32>
    %cst_116 = arith.constant dense<0xFF800000> : vector<64xf32>
    %197 = vector.multi_reduction <maximumf>, %196, %cst_116 [1] : vector<64x64xf32> to vector<64xf32>
    %198 = vector.shape_cast %197 : vector<64xf32> to vector<64x1xf32>
    %199 = vector.broadcast %198 : vector<64x1xf32> to vector<64x64xf32>
    %200 = arith.subf %196, %199 : vector<64x64xf32>
    %201 = math.exp %200 : vector<64x64xf32>
    %cst_117 = arith.constant dense<0.000000e+00> : vector<64xf32>
    %202 = vector.multi_reduction <add>, %201, %cst_117 [1] : vector<64x64xf32> to vector<64xf32>
    %203 = vector.shape_cast %202 : vector<64xf32> to vector<64x1xf32>
    %204 = tpu.reciprocal %203 {approx = true} : vector<64x1xf32> -> vector<64x1xf32>
    %205 = vector.broadcast %204 : vector<64x1xf32> to vector<64x64xf32>
    %206 = arith.mulf %201, %205 : vector<64x64xf32>
    %207 = arith.addf %206, %193 : vector<64x64xf32>
    %cst_118 = arith.constant dense<0.000000e+00> : vector<64xf32>
    %208 = vector.multi_reduction <add>, %207, %cst_118 [1] : vector<64x64xf32> to vector<64xf32>
    %209 = vector.shape_cast %208 : vector<64xf32> to vector<64x1xf32>
    %210 = math.rsqrt %209 : vector<64x1xf32>
    %211 = vector.broadcast %210 : vector<64x1xf32> to vector<64x64xf32>
    %212 = arith.mulf %207, %211 : vector<64x64xf32>
    %213 = vector.broadcast %210 : vector<64x1xf32> to vector<64x64xf32>
    %214 = arith.mulf %193, %213 : vector<64x64xf32>
    %cst_119 = arith.constant dense<0.000000e+00> : vector<64x64xf32>
    %215 = tpu.matmul %212, %214, %cst_119 {dimension_numbers = #tpu.dot_dimension_numbers<[1], [0], [0], [1], [0, 0, 1, 1], [], []>} : vector<64x64xf32>, vector<64x64xf32>, vector<64x64xf32> -> vector<64x64xf32>
    %216 = vector.extract_strided_slice %150 {offsets = [0, 0], sizes = [4, 64], strides = [1, 1]} : vector<4x128xf32> to vector<4x64xf32>
    %c0_120 = arith.constant 0 : index
    %c0_121 = arith.constant 0 : index
    %c0_122 = arith.constant 0 : index
    %217 = vector.load %arg8[%c0_120, %c0_121, %c0_122] : memref<3x4x4xf32, #tpu.memory_space<vmem>>, vector<1x4x4xf32>
    %218 = vector.shape_cast %217 : vector<1x4x4xf32> to vector<4x4xf32>
    %cst_123 = arith.constant dense<0.000000e+00> : vector<4x64xf32>
    %219 = tpu.matmul %216, %215, %cst_123 {dimension_numbers = #tpu.dot_dimension_numbers<[1], [1], [0], [0], [0, 0, 1, 0], [], []>} : vector<4x64xf32>, vector<64x64xf32>, vector<4x64xf32> -> vector<4x64xf32>
    %cst_124 = arith.constant dense<0.000000e+00> : vector<4x64xf32>
    %220 = tpu.matmul %218, %219, %cst_124 {dimension_numbers = #tpu.dot_dimension_numbers<[1], [0], [0], [1], [0, 0, 1, 1], [], []>} : vector<4x4xf32>, vector<4x64xf32>, vector<4x64xf32> -> vector<4x64xf32>
    %cst_125 = arith.constant 0.000000e+00 : f32
    %221 = vector.broadcast %cst_125 : f32 to vector<4x64xf32>
    %222 = arith.maximumf %220, %221 : vector<4x64xf32>
    %c1_126 = arith.constant 1 : index
    %c0_127 = arith.constant 0 : index
    %c0_128 = arith.constant 0 : index
    %223 = vector.load %arg8[%c1_126, %c0_127, %c0_128] : memref<3x4x4xf32, #tpu.memory_space<vmem>>, vector<1x4x4xf32>
    %224 = vector.shape_cast %223 : vector<1x4x4xf32> to vector<4x4xf32>
    %cst_129 = arith.constant dense<0.000000e+00> : vector<4x64xf32>
    %225 = tpu.matmul %222, %215, %cst_129 {dimension_numbers = #tpu.dot_dimension_numbers<[1], [1], [0], [0], [0, 0, 1, 0], [], []>} : vector<4x64xf32>, vector<64x64xf32>, vector<4x64xf32> -> vector<4x64xf32>
    %cst_130 = arith.constant dense<0.000000e+00> : vector<4x64xf32>
    %226 = tpu.matmul %224, %225, %cst_130 {dimension_numbers = #tpu.dot_dimension_numbers<[1], [0], [0], [1], [0, 0, 1, 1], [], []>} : vector<4x4xf32>, vector<4x64xf32>, vector<4x64xf32> -> vector<4x64xf32>
    %cst_131 = arith.constant 0.000000e+00 : f32
    %227 = vector.broadcast %cst_131 : f32 to vector<4x64xf32>
    %228 = arith.maximumf %226, %227 : vector<4x64xf32>
    %c2_132 = arith.constant 2 : index
    %c0_133 = arith.constant 0 : index
    %c0_134 = arith.constant 0 : index
    %229 = vector.load %arg8[%c2_132, %c0_133, %c0_134] : memref<3x4x4xf32, #tpu.memory_space<vmem>>, vector<1x4x4xf32>
    %230 = vector.shape_cast %229 : vector<1x4x4xf32> to vector<4x4xf32>
    %cst_135 = arith.constant dense<0.000000e+00> : vector<4x64xf32>
    %231 = tpu.matmul %228, %215, %cst_135 {dimension_numbers = #tpu.dot_dimension_numbers<[1], [1], [0], [0], [0, 0, 1, 0], [], []>} : vector<4x64xf32>, vector<64x64xf32>, vector<4x64xf32> -> vector<4x64xf32>
    %cst_136 = arith.constant dense<0.000000e+00> : vector<4x64xf32>
    %232 = tpu.matmul %230, %231, %cst_136 {dimension_numbers = #tpu.dot_dimension_numbers<[1], [0], [0], [1], [0, 0, 1, 1], [], []>} : vector<4x4xf32>, vector<4x64xf32>, vector<4x64xf32> -> vector<4x64xf32>
    %c0_137 = arith.constant 0 : index
    %c0_138 = arith.constant 0 : index
    %233 = vector.load %arg9[%c0_137, %c0_138] : memref<64x256xf32, #tpu.memory_space<vmem>>, vector<64x256xf32>
    %cst_139 = arith.constant dense<0.000000e+00> : vector<4x256xf32>
    %234 = tpu.matmul %232, %233, %cst_139 {dimension_numbers = #tpu.dot_dimension_numbers<[1], [0], [0], [1], [0, 0, 1, 1], [], []>} : vector<4x64xf32>, vector<64x256xf32>, vector<4x256xf32> -> vector<4x256xf32>
    %235 = vector.extract_strided_slice %187 {offsets = [0, 64], sizes = [4, 64], strides = [1, 1]} : vector<4x128xf32> to vector<4x64xf32>
    %236 = vector.extract_strided_slice %188 {offsets = [0, 64], sizes = [4, 64], strides = [1, 1]} : vector<4x128xf32> to vector<4x64xf32>
    %cst_140 = arith.constant dense<0.000000e+00> : vector<64x64xf32>
    %237 = tpu.matmul %235, %236, %cst_140 {dimension_numbers = #tpu.dot_dimension_numbers<[0], [0], [1], [1], [0, 1, 1, 1], [], []>} : vector<4x64xf32>, vector<4x64xf32>, vector<64x64xf32> -> vector<64x64xf32>
    %cst_141 = arith.constant dense<0xFF800000> : vector<64xf32>
    %238 = vector.multi_reduction <maximumf>, %237, %cst_141 [1] : vector<64x64xf32> to vector<64xf32>
    %239 = vector.shape_cast %238 : vector<64xf32> to vector<64x1xf32>
    %240 = vector.broadcast %239 : vector<64x1xf32> to vector<64x64xf32>
    %241 = arith.subf %237, %240 : vector<64x64xf32>
    %242 = math.exp %241 : vector<64x64xf32>
    %cst_142 = arith.constant dense<0.000000e+00> : vector<64xf32>
    %243 = vector.multi_reduction <add>, %242, %cst_142 [1] : vector<64x64xf32> to vector<64xf32>
    %244 = vector.shape_cast %243 : vector<64xf32> to vector<64x1xf32>
    %245 = tpu.reciprocal %244 {approx = true} : vector<64x1xf32> -> vector<64x1xf32>
    %246 = vector.broadcast %245 : vector<64x1xf32> to vector<64x64xf32>
    %247 = arith.mulf %242, %246 : vector<64x64xf32>
    %248 = arith.addf %247, %193 : vector<64x64xf32>
    %cst_143 = arith.constant dense<0.000000e+00> : vector<64xf32>
    %249 = vector.multi_reduction <add>, %248, %cst_143 [1] : vector<64x64xf32> to vector<64xf32>
    %250 = vector.shape_cast %249 : vector<64xf32> to vector<64x1xf32>
    %251 = math.rsqrt %250 : vector<64x1xf32>
    %252 = vector.broadcast %251 : vector<64x1xf32> to vector<64x64xf32>
    %253 = arith.mulf %248, %252 : vector<64x64xf32>
    %254 = vector.broadcast %251 : vector<64x1xf32> to vector<64x64xf32>
    %255 = arith.mulf %193, %254 : vector<64x64xf32>
    %cst_144 = arith.constant dense<0.000000e+00> : vector<64x64xf32>
    %256 = tpu.matmul %253, %255, %cst_144 {dimension_numbers = #tpu.dot_dimension_numbers<[1], [0], [0], [1], [0, 0, 1, 1], [], []>} : vector<64x64xf32>, vector<64x64xf32>, vector<64x64xf32> -> vector<64x64xf32>
    %257 = vector.extract_strided_slice %150 {offsets = [0, 64], sizes = [4, 64], strides = [1, 1]} : vector<4x128xf32> to vector<4x64xf32>
    %c0_145 = arith.constant 0 : index
    %c0_146 = arith.constant 0 : index
    %c0_147 = arith.constant 0 : index
    %258 = vector.load %arg8[%c0_145, %c0_146, %c0_147] : memref<3x4x4xf32, #tpu.memory_space<vmem>>, vector<1x4x4xf32>
    %259 = vector.shape_cast %258 : vector<1x4x4xf32> to vector<4x4xf32>
    %cst_148 = arith.constant dense<0.000000e+00> : vector<4x64xf32>
    %260 = tpu.matmul %257, %256, %cst_148 {dimension_numbers = #tpu.dot_dimension_numbers<[1], [1], [0], [0], [0, 0, 1, 0], [], []>} : vector<4x64xf32>, vector<64x64xf32>, vector<4x64xf32> -> vector<4x64xf32>
    %cst_149 = arith.constant dense<0.000000e+00> : vector<4x64xf32>
    %261 = tpu.matmul %259, %260, %cst_149 {dimension_numbers = #tpu.dot_dimension_numbers<[1], [0], [0], [1], [0, 0, 1, 1], [], []>} : vector<4x4xf32>, vector<4x64xf32>, vector<4x64xf32> -> vector<4x64xf32>
    %cst_150 = arith.constant 0.000000e+00 : f32
    %262 = vector.broadcast %cst_150 : f32 to vector<4x64xf32>
    %263 = arith.maximumf %261, %262 : vector<4x64xf32>
    %c1_151 = arith.constant 1 : index
    %c0_152 = arith.constant 0 : index
    %c0_153 = arith.constant 0 : index
    %264 = vector.load %arg8[%c1_151, %c0_152, %c0_153] : memref<3x4x4xf32, #tpu.memory_space<vmem>>, vector<1x4x4xf32>
    %265 = vector.shape_cast %264 : vector<1x4x4xf32> to vector<4x4xf32>
    %cst_154 = arith.constant dense<0.000000e+00> : vector<4x64xf32>
    %266 = tpu.matmul %263, %256, %cst_154 {dimension_numbers = #tpu.dot_dimension_numbers<[1], [1], [0], [0], [0, 0, 1, 0], [], []>} : vector<4x64xf32>, vector<64x64xf32>, vector<4x64xf32> -> vector<4x64xf32>
    %cst_155 = arith.constant dense<0.000000e+00> : vector<4x64xf32>
    %267 = tpu.matmul %265, %266, %cst_155 {dimension_numbers = #tpu.dot_dimension_numbers<[1], [0], [0], [1], [0, 0, 1, 1], [], []>} : vector<4x4xf32>, vector<4x64xf32>, vector<4x64xf32> -> vector<4x64xf32>
    %cst_156 = arith.constant 0.000000e+00 : f32
    %268 = vector.broadcast %cst_156 : f32 to vector<4x64xf32>
    %269 = arith.maximumf %267, %268 : vector<4x64xf32>
    %c2_157 = arith.constant 2 : index
    %c0_158 = arith.constant 0 : index
    %c0_159 = arith.constant 0 : index
    %270 = vector.load %arg8[%c2_157, %c0_158, %c0_159] : memref<3x4x4xf32, #tpu.memory_space<vmem>>, vector<1x4x4xf32>
    %271 = vector.shape_cast %270 : vector<1x4x4xf32> to vector<4x4xf32>
    %cst_160 = arith.constant dense<0.000000e+00> : vector<4x64xf32>
    %272 = tpu.matmul %269, %256, %cst_160 {dimension_numbers = #tpu.dot_dimension_numbers<[1], [1], [0], [0], [0, 0, 1, 0], [], []>} : vector<4x64xf32>, vector<64x64xf32>, vector<4x64xf32> -> vector<4x64xf32>
    %cst_161 = arith.constant dense<0.000000e+00> : vector<4x64xf32>
    %273 = tpu.matmul %271, %272, %cst_161 {dimension_numbers = #tpu.dot_dimension_numbers<[1], [0], [0], [1], [0, 0, 1, 1], [], []>} : vector<4x4xf32>, vector<4x64xf32>, vector<4x64xf32> -> vector<4x64xf32>
    %c0_162 = arith.constant 0 : index
    %c0_163 = arith.constant 0 : index
    %274 = vector.load %arg9[%c0_162, %c0_163] : memref<64x256xf32, #tpu.memory_space<vmem>>, vector<64x256xf32>
    %cst_164 = arith.constant dense<0.000000e+00> : vector<4x256xf32>
    %275 = tpu.matmul %273, %274, %cst_164 {dimension_numbers = #tpu.dot_dimension_numbers<[1], [0], [0], [1], [0, 0, 1, 1], [], []>} : vector<4x64xf32>, vector<64x256xf32>, vector<4x256xf32> -> vector<4x256xf32>
    %276 = tpu.concatenate %234, %275 in 1 : vector<4x256xf32>, vector<4x256xf32> -> vector<4x512xf32>
    %277 = arith.addf %38, %276 : vector<4x512xf32>
    %c0_165 = arith.constant 0 : index
    %c0_166 = arith.constant 0 : index
    %278 = vector.load %arg10[%c0_165, %c0_166] : memref<4x4xf32, #tpu.memory_space<vmem>>, vector<4x4xf32>
    %cst_167 = arith.constant dense<0.000000e+00> : vector<4x512xf32>
    %279 = tpu.matmul %278, %277, %cst_167 {dimension_numbers = #tpu.dot_dimension_numbers<[1], [0], [0], [1], [0, 0, 1, 1], [], []>} : vector<4x4xf32>, vector<4x512xf32>, vector<4x512xf32> -> vector<4x512xf32>
    %280 = vector.extract_strided_slice %0 {offsets = [0, 6], sizes = [4, 1], strides = [1, 1]} : vector<4x10xf32> to vector<4x1xf32>
    %281 = vector.extract_strided_slice %0 {offsets = [0, 7], sizes = [4, 1], strides = [1, 1]} : vector<4x10xf32> to vector<4x1xf32>
    %cst_168 = arith.constant dense<0.000000e+00> : vector<4xf32>
    %282 = vector.multi_reduction <add>, %279, %cst_168 [1] : vector<4x512xf32> to vector<4xf32>
    %283 = vector.shape_cast %282 : vector<4xf32> to vector<4x1xf32>
    %cst_169 = arith.constant 0.001953125 : f32
    %284 = vector.broadcast %cst_169 : f32 to vector<4x1xf32>
    %285 = arith.mulf %283, %284 : vector<4x1xf32>
    %286 = arith.mulf %279, %279 : vector<4x512xf32>
    %cst_170 = arith.constant dense<0.000000e+00> : vector<4xf32>
    %287 = vector.multi_reduction <add>, %286, %cst_170 [1] : vector<4x512xf32> to vector<4xf32>
    %288 = vector.shape_cast %287 : vector<4xf32> to vector<4x1xf32>
    %cst_171 = arith.constant 0.001953125 : f32
    %289 = vector.broadcast %cst_171 : f32 to vector<4x1xf32>
    %290 = arith.mulf %288, %289 : vector<4x1xf32>
    %291 = arith.mulf %285, %285 : vector<4x1xf32>
    %292 = arith.subf %290, %291 : vector<4x1xf32>
    %cst_172 = arith.constant 0.000000e+00 : f32
    %293 = vector.broadcast %cst_172 : f32 to vector<4x1xf32>
    %294 = arith.maximumf %292, %293 : vector<4x1xf32>
    %295 = vector.broadcast %285 : vector<4x1xf32> to vector<4x512xf32>
    %296 = arith.subf %279, %295 : vector<4x512xf32>
    %cst_173 = arith.constant 9.99999974E-6 : f32
    %297 = vector.broadcast %cst_173 : f32 to vector<4x1xf32>
    %298 = arith.addf %294, %297 : vector<4x1xf32>
    %299 = math.rsqrt %298 : vector<4x1xf32>
    %300 = vector.broadcast %299 : vector<4x1xf32> to vector<4x512xf32>
    %301 = arith.mulf %296, %300 : vector<4x512xf32>
    %302 = vector.broadcast %280 : vector<4x1xf32> to vector<4x512xf32>
    %303 = arith.mulf %301, %302 : vector<4x512xf32>
    %304 = vector.broadcast %281 : vector<4x1xf32> to vector<4x512xf32>
    %305 = arith.addf %303, %304 : vector<4x512xf32>
    %c17_i32_174 = arith.constant 17 : i32
    %306 = tpu.dynamic_rotate %305 by %c17_i32_174 dim 1 : vector<4x512xf32>, i32 -> vector<4x512xf32>
    %c0_175 = arith.constant 0 : index
    %c0_176 = arith.constant 0 : index
    %c0_177 = arith.constant 0 : index
    %307 = vector.load %arg4[%c0_175, %c0_176, %c0_177] : memref<9x1x512xf32, #tpu.memory_space<vmem>>, vector<1x1x512xf32>
    %308 = vector.shape_cast %307 : vector<1x1x512xf32> to vector<1x512xf32>
    %309 = vector.broadcast %308 : vector<1x512xf32> to vector<4x512xf32>
    %310 = arith.mulf %306, %309 : vector<4x512xf32>
    %c0_178 = arith.constant 0 : index
    %c0_179 = arith.constant 0 : index
    %c0_180 = arith.constant 0 : index
    %311 = vector.load %arg11[%c0_178, %c0_179, %c0_180] : memref<9x4x4xf32, #tpu.memory_space<vmem>>, vector<1x4x4xf32>
    %312 = vector.shape_cast %311 : vector<1x4x4xf32> to vector<4x4xf32>
    %cst_181 = arith.constant dense<0.000000e+00> : vector<4x512xf32>
    %313 = tpu.matmul %312, %310, %cst_181 {dimension_numbers = #tpu.dot_dimension_numbers<[1], [0], [0], [1], [0, 0, 1, 1], [], []>} : vector<4x4xf32>, vector<4x512xf32>, vector<4x512xf32> -> vector<4x512xf32>
    %c16_i32_182 = arith.constant 16 : i32
    %314 = tpu.dynamic_rotate %305 by %c16_i32_182 dim 1 : vector<4x512xf32>, i32 -> vector<4x512xf32>
    %c1_183 = arith.constant 1 : index
    %c0_184 = arith.constant 0 : index
    %c0_185 = arith.constant 0 : index
    %315 = vector.load %arg4[%c1_183, %c0_184, %c0_185] : memref<9x1x512xf32, #tpu.memory_space<vmem>>, vector<1x1x512xf32>
    %316 = vector.shape_cast %315 : vector<1x1x512xf32> to vector<1x512xf32>
    %317 = vector.broadcast %316 : vector<1x512xf32> to vector<4x512xf32>
    %318 = arith.mulf %314, %317 : vector<4x512xf32>
    %c1_186 = arith.constant 1 : index
    %c0_187 = arith.constant 0 : index
    %c0_188 = arith.constant 0 : index
    %319 = vector.load %arg11[%c1_186, %c0_187, %c0_188] : memref<9x4x4xf32, #tpu.memory_space<vmem>>, vector<1x4x4xf32>
    %320 = vector.shape_cast %319 : vector<1x4x4xf32> to vector<4x4xf32>
    %cst_189 = arith.constant dense<0.000000e+00> : vector<4x512xf32>
    %321 = tpu.matmul %320, %318, %cst_189 {dimension_numbers = #tpu.dot_dimension_numbers<[1], [0], [0], [1], [0, 0, 1, 1], [], []>} : vector<4x4xf32>, vector<4x512xf32>, vector<4x512xf32> -> vector<4x512xf32>
    %322 = arith.addf %313, %321 : vector<4x512xf32>
    %c15_i32_190 = arith.constant 15 : i32
    %323 = tpu.dynamic_rotate %305 by %c15_i32_190 dim 1 : vector<4x512xf32>, i32 -> vector<4x512xf32>
    %c2_191 = arith.constant 2 : index
    %c0_192 = arith.constant 0 : index
    %c0_193 = arith.constant 0 : index
    %324 = vector.load %arg4[%c2_191, %c0_192, %c0_193] : memref<9x1x512xf32, #tpu.memory_space<vmem>>, vector<1x1x512xf32>
    %325 = vector.shape_cast %324 : vector<1x1x512xf32> to vector<1x512xf32>
    %326 = vector.broadcast %325 : vector<1x512xf32> to vector<4x512xf32>
    %327 = arith.mulf %323, %326 : vector<4x512xf32>
    %c2_194 = arith.constant 2 : index
    %c0_195 = arith.constant 0 : index
    %c0_196 = arith.constant 0 : index
    %328 = vector.load %arg11[%c2_194, %c0_195, %c0_196] : memref<9x4x4xf32, #tpu.memory_space<vmem>>, vector<1x4x4xf32>
    %329 = vector.shape_cast %328 : vector<1x4x4xf32> to vector<4x4xf32>
    %cst_197 = arith.constant dense<0.000000e+00> : vector<4x512xf32>
    %330 = tpu.matmul %329, %327, %cst_197 {dimension_numbers = #tpu.dot_dimension_numbers<[1], [0], [0], [1], [0, 0, 1, 1], [], []>} : vector<4x4xf32>, vector<4x512xf32>, vector<4x512xf32> -> vector<4x512xf32>
    %331 = arith.addf %322, %330 : vector<4x512xf32>
    %c1_i32_198 = arith.constant 1 : i32
    %332 = tpu.dynamic_rotate %305 by %c1_i32_198 dim 1 : vector<4x512xf32>, i32 -> vector<4x512xf32>
    %c3_199 = arith.constant 3 : index
    %c0_200 = arith.constant 0 : index
    %c0_201 = arith.constant 0 : index
    %333 = vector.load %arg4[%c3_199, %c0_200, %c0_201] : memref<9x1x512xf32, #tpu.memory_space<vmem>>, vector<1x1x512xf32>
    %334 = vector.shape_cast %333 : vector<1x1x512xf32> to vector<1x512xf32>
    %335 = vector.broadcast %334 : vector<1x512xf32> to vector<4x512xf32>
    %336 = arith.mulf %332, %335 : vector<4x512xf32>
    %c3_202 = arith.constant 3 : index
    %c0_203 = arith.constant 0 : index
    %c0_204 = arith.constant 0 : index
    %337 = vector.load %arg11[%c3_202, %c0_203, %c0_204] : memref<9x4x4xf32, #tpu.memory_space<vmem>>, vector<1x4x4xf32>
    %338 = vector.shape_cast %337 : vector<1x4x4xf32> to vector<4x4xf32>
    %cst_205 = arith.constant dense<0.000000e+00> : vector<4x512xf32>
    %339 = tpu.matmul %338, %336, %cst_205 {dimension_numbers = #tpu.dot_dimension_numbers<[1], [0], [0], [1], [0, 0, 1, 1], [], []>} : vector<4x4xf32>, vector<4x512xf32>, vector<4x512xf32> -> vector<4x512xf32>
    %340 = arith.addf %331, %339 : vector<4x512xf32>
    %c4_206 = arith.constant 4 : index
    %c0_207 = arith.constant 0 : index
    %c0_208 = arith.constant 0 : index
    %341 = vector.load %arg4[%c4_206, %c0_207, %c0_208] : memref<9x1x512xf32, #tpu.memory_space<vmem>>, vector<1x1x512xf32>
    %342 = vector.shape_cast %341 : vector<1x1x512xf32> to vector<1x512xf32>
    %343 = vector.broadcast %342 : vector<1x512xf32> to vector<4x512xf32>
    %344 = arith.mulf %305, %343 : vector<4x512xf32>
    %c4_209 = arith.constant 4 : index
    %c0_210 = arith.constant 0 : index
    %c0_211 = arith.constant 0 : index
    %345 = vector.load %arg11[%c4_209, %c0_210, %c0_211] : memref<9x4x4xf32, #tpu.memory_space<vmem>>, vector<1x4x4xf32>
    %346 = vector.shape_cast %345 : vector<1x4x4xf32> to vector<4x4xf32>
    %cst_212 = arith.constant dense<0.000000e+00> : vector<4x512xf32>
    %347 = tpu.matmul %346, %344, %cst_212 {dimension_numbers = #tpu.dot_dimension_numbers<[1], [0], [0], [1], [0, 0, 1, 1], [], []>} : vector<4x4xf32>, vector<4x512xf32>, vector<4x512xf32> -> vector<4x512xf32>
    %348 = arith.addf %340, %347 : vector<4x512xf32>
    %c511_i32_213 = arith.constant 511 : i32
    %349 = tpu.dynamic_rotate %305 by %c511_i32_213 dim 1 : vector<4x512xf32>, i32 -> vector<4x512xf32>
    %c5_214 = arith.constant 5 : index
    %c0_215 = arith.constant 0 : index
    %c0_216 = arith.constant 0 : index
    %350 = vector.load %arg4[%c5_214, %c0_215, %c0_216] : memref<9x1x512xf32, #tpu.memory_space<vmem>>, vector<1x1x512xf32>
    %351 = vector.shape_cast %350 : vector<1x1x512xf32> to vector<1x512xf32>
    %352 = vector.broadcast %351 : vector<1x512xf32> to vector<4x512xf32>
    %353 = arith.mulf %349, %352 : vector<4x512xf32>
    %c5_217 = arith.constant 5 : index
    %c0_218 = arith.constant 0 : index
    %c0_219 = arith.constant 0 : index
    %354 = vector.load %arg11[%c5_217, %c0_218, %c0_219] : memref<9x4x4xf32, #tpu.memory_space<vmem>>, vector<1x4x4xf32>
    %355 = vector.shape_cast %354 : vector<1x4x4xf32> to vector<4x4xf32>
    %cst_220 = arith.constant dense<0.000000e+00> : vector<4x512xf32>
    %356 = tpu.matmul %355, %353, %cst_220 {dimension_numbers = #tpu.dot_dimension_numbers<[1], [0], [0], [1], [0, 0, 1, 1], [], []>} : vector<4x4xf32>, vector<4x512xf32>, vector<4x512xf32> -> vector<4x512xf32>
    %357 = arith.addf %348, %356 : vector<4x512xf32>
    %c497_i32_221 = arith.constant 497 : i32
    %358 = tpu.dynamic_rotate %305 by %c497_i32_221 dim 1 : vector<4x512xf32>, i32 -> vector<4x512xf32>
    %c6_222 = arith.constant 6 : index
    %c0_223 = arith.constant 0 : index
    %c0_224 = arith.constant 0 : index
    %359 = vector.load %arg4[%c6_222, %c0_223, %c0_224] : memref<9x1x512xf32, #tpu.memory_space<vmem>>, vector<1x1x512xf32>
    %360 = vector.shape_cast %359 : vector<1x1x512xf32> to vector<1x512xf32>
    %361 = vector.broadcast %360 : vector<1x512xf32> to vector<4x512xf32>
    %362 = arith.mulf %358, %361 : vector<4x512xf32>
    %c6_225 = arith.constant 6 : index
    %c0_226 = arith.constant 0 : index
    %c0_227 = arith.constant 0 : index
    %363 = vector.load %arg11[%c6_225, %c0_226, %c0_227] : memref<9x4x4xf32, #tpu.memory_space<vmem>>, vector<1x4x4xf32>
    %364 = vector.shape_cast %363 : vector<1x4x4xf32> to vector<4x4xf32>
    %cst_228 = arith.constant dense<0.000000e+00> : vector<4x512xf32>
    %365 = tpu.matmul %364, %362, %cst_228 {dimension_numbers = #tpu.dot_dimension_numbers<[1], [0], [0], [1], [0, 0, 1, 1], [], []>} : vector<4x4xf32>, vector<4x512xf32>, vector<4x512xf32> -> vector<4x512xf32>
    %366 = arith.addf %357, %365 : vector<4x512xf32>
    %c496_i32_229 = arith.constant 496 : i32
    %367 = tpu.dynamic_rotate %305 by %c496_i32_229 dim 1 : vector<4x512xf32>, i32 -> vector<4x512xf32>
    %c7_230 = arith.constant 7 : index
    %c0_231 = arith.constant 0 : index
    %c0_232 = arith.constant 0 : index
    %368 = vector.load %arg4[%c7_230, %c0_231, %c0_232] : memref<9x1x512xf32, #tpu.memory_space<vmem>>, vector<1x1x512xf32>
    %369 = vector.shape_cast %368 : vector<1x1x512xf32> to vector<1x512xf32>
    %370 = vector.broadcast %369 : vector<1x512xf32> to vector<4x512xf32>
    %371 = arith.mulf %367, %370 : vector<4x512xf32>
    %c7_233 = arith.constant 7 : index
    %c0_234 = arith.constant 0 : index
    %c0_235 = arith.constant 0 : index
    %372 = vector.load %arg11[%c7_233, %c0_234, %c0_235] : memref<9x4x4xf32, #tpu.memory_space<vmem>>, vector<1x4x4xf32>
    %373 = vector.shape_cast %372 : vector<1x4x4xf32> to vector<4x4xf32>
    %cst_236 = arith.constant dense<0.000000e+00> : vector<4x512xf32>
    %374 = tpu.matmul %373, %371, %cst_236 {dimension_numbers = #tpu.dot_dimension_numbers<[1], [0], [0], [1], [0, 0, 1, 1], [], []>} : vector<4x4xf32>, vector<4x512xf32>, vector<4x512xf32> -> vector<4x512xf32>
    %375 = arith.addf %366, %374 : vector<4x512xf32>
    %c495_i32_237 = arith.constant 495 : i32
    %376 = tpu.dynamic_rotate %305 by %c495_i32_237 dim 1 : vector<4x512xf32>, i32 -> vector<4x512xf32>
    %c8_238 = arith.constant 8 : index
    %c0_239 = arith.constant 0 : index
    %c0_240 = arith.constant 0 : index
    %377 = vector.load %arg4[%c8_238, %c0_239, %c0_240] : memref<9x1x512xf32, #tpu.memory_space<vmem>>, vector<1x1x512xf32>
    %378 = vector.shape_cast %377 : vector<1x1x512xf32> to vector<1x512xf32>
    %379 = vector.broadcast %378 : vector<1x512xf32> to vector<4x512xf32>
    %380 = arith.mulf %376, %379 : vector<4x512xf32>
    %c8_241 = arith.constant 8 : index
    %c0_242 = arith.constant 0 : index
    %c0_243 = arith.constant 0 : index
    %381 = vector.load %arg11[%c8_241, %c0_242, %c0_243] : memref<9x4x4xf32, #tpu.memory_space<vmem>>, vector<1x4x4xf32>
    %382 = vector.shape_cast %381 : vector<1x4x4xf32> to vector<4x4xf32>
    %cst_244 = arith.constant dense<0.000000e+00> : vector<4x512xf32>
    %383 = tpu.matmul %382, %380, %cst_244 {dimension_numbers = #tpu.dot_dimension_numbers<[1], [0], [0], [1], [0, 0, 1, 1], [], []>} : vector<4x4xf32>, vector<4x512xf32>, vector<4x512xf32> -> vector<4x512xf32>
    %384 = arith.addf %375, %383 : vector<4x512xf32>
    %385 = vector.extract_strided_slice %0 {offsets = [0, 8], sizes = [4, 1], strides = [1, 1]} : vector<4x10xf32> to vector<4x1xf32>
    %386 = vector.extract_strided_slice %0 {offsets = [0, 9], sizes = [4, 1], strides = [1, 1]} : vector<4x10xf32> to vector<4x1xf32>
    %cst_245 = arith.constant dense<0.000000e+00> : vector<4xf32>
    %387 = vector.multi_reduction <add>, %384, %cst_245 [1] : vector<4x512xf32> to vector<4xf32>
    %388 = vector.shape_cast %387 : vector<4xf32> to vector<4x1xf32>
    %cst_246 = arith.constant 0.001953125 : f32
    %389 = vector.broadcast %cst_246 : f32 to vector<4x1xf32>
    %390 = arith.mulf %388, %389 : vector<4x1xf32>
    %391 = arith.mulf %384, %384 : vector<4x512xf32>
    %cst_247 = arith.constant dense<0.000000e+00> : vector<4xf32>
    %392 = vector.multi_reduction <add>, %391, %cst_247 [1] : vector<4x512xf32> to vector<4xf32>
    %393 = vector.shape_cast %392 : vector<4xf32> to vector<4x1xf32>
    %cst_248 = arith.constant 0.001953125 : f32
    %394 = vector.broadcast %cst_248 : f32 to vector<4x1xf32>
    %395 = arith.mulf %393, %394 : vector<4x1xf32>
    %396 = arith.mulf %390, %390 : vector<4x1xf32>
    %397 = arith.subf %395, %396 : vector<4x1xf32>
    %cst_249 = arith.constant 0.000000e+00 : f32
    %398 = vector.broadcast %cst_249 : f32 to vector<4x1xf32>
    %399 = arith.maximumf %397, %398 : vector<4x1xf32>
    %400 = vector.broadcast %390 : vector<4x1xf32> to vector<4x512xf32>
    %401 = arith.subf %384, %400 : vector<4x512xf32>
    %cst_250 = arith.constant 9.99999974E-6 : f32
    %402 = vector.broadcast %cst_250 : f32 to vector<4x1xf32>
    %403 = arith.addf %399, %402 : vector<4x1xf32>
    %404 = math.rsqrt %403 : vector<4x1xf32>
    %405 = vector.broadcast %404 : vector<4x1xf32> to vector<4x512xf32>
    %406 = arith.mulf %401, %405 : vector<4x512xf32>
    %407 = vector.broadcast %385 : vector<4x1xf32> to vector<4x512xf32>
    %408 = arith.mulf %406, %407 : vector<4x512xf32>
    %409 = vector.broadcast %386 : vector<4x1xf32> to vector<4x512xf32>
    %410 = arith.addf %408, %409 : vector<4x512xf32>
    %cst_251 = arith.constant 0.000000e+00 : f32
    %411 = vector.broadcast %cst_251 : f32 to vector<4x512xf32>
    %412 = arith.maximumf %410, %411 : vector<4x512xf32>
    %c0_252 = arith.constant 0 : index
    %c0_253 = arith.constant 0 : index
    %413 = vector.load %arg12[%c0_252, %c0_253] : memref<8x4xf32, #tpu.memory_space<vmem>>, vector<8x4xf32>
    %cst_254 = arith.constant dense<0.000000e+00> : vector<8x512xf32>
    %414 = tpu.matmul %413, %412, %cst_254 {dimension_numbers = #tpu.dot_dimension_numbers<[1], [0], [0], [1], [0, 0, 1, 1], [], []>} : vector<8x4xf32>, vector<4x512xf32>, vector<8x512xf32> -> vector<8x512xf32>
    %c0_255 = arith.constant 0 : index
    %c0_256 = arith.constant 0 : index
    %415 = vector.load %arg13[%c0_255, %c0_256] : memref<8x1xf32, #tpu.memory_space<vmem>>, vector<8x1xf32>
    %416 = vector.broadcast %415 : vector<8x1xf32> to vector<8x512xf32>
    %417 = arith.addf %414, %416 : vector<8x512xf32>
    %418 = vector.extract_strided_slice %417 {offsets = [0, 0], sizes = [8, 256], strides = [1, 1]} : vector<8x512xf32> to vector<8x256xf32>
    %c0_257 = arith.constant 0 : index
    %c0_258 = arith.constant 0 : index
    %c0_259 = arith.constant 0 : index
    %419 = vector.load %arg14[%c0_257, %c0_258, %c0_259] : memref<2x8x256xf32, #tpu.memory_space<vmem>>, vector<1x8x256xf32>
    %420 = vector.shape_cast %419 : vector<1x8x256xf32> to vector<8x256xf32>
    %421 = vector.shape_cast %418 : vector<8x256xf32> to vector<1x8x256xf32>
    tpu.vector_store %arg14[%c0_257, %c0_258, %c0_259], %421 {strides = array<i32>} : memref<2x8x256xf32, #tpu.memory_space<vmem>>, vector<1x8x256xf32>,
    %422 = vector.extract_strided_slice %417 {offsets = [0, 256], sizes = [8, 256], strides = [1, 1]} : vector<8x512xf32> to vector<8x256xf32>
    %c1_260 = arith.constant 1 : index
    %c0_261 = arith.constant 0 : index
    %c0_262 = arith.constant 0 : index
    %423 = vector.load %arg14[%c1_260, %c0_261, %c0_262] : memref<2x8x256xf32, #tpu.memory_space<vmem>>, vector<1x8x256xf32>
    %424 = vector.shape_cast %423 : vector<1x8x256xf32> to vector<8x256xf32>
    %425 = vector.shape_cast %422 : vector<8x256xf32> to vector<1x8x256xf32>
    tpu.vector_store %arg14[%c1_260, %c0_261, %c0_262], %425 {strides = array<i32>} : memref<2x8x256xf32, #tpu.memory_space<vmem>>, vector<1x8x256xf32>,
    return
  }
}

</mosaic_0001>

<bundles_post_ra>
// kernel: tpu_custom_call.1
= control target key start
LH: loop header
LB: loop body
LE: loop exit
PB: predicated region body
PF: predicated region fallthrough
CT: control target
= control target key end

     0   :  { %19 = vsyncpa [#allocation3], 0  ;;  %s9585_s0 = inlined_call_operand.hbm [shape: f32[2,8,256], index: 0, kind: input, shape index: {}]   ;;  %s9586_s1 = inlined_call_operand.hbm [shape: f32[4,8], index: 1, kind: input, shape index: {}]   ;;  %s9587_s2 = inlined_call_operand.hbm [shape: f32[4,10], index: 2, kind: input, shape index: {}]   ;;  %s9588_s3 = inlined_call_operand.vmem [shape: f32[9,4,4], index: 3, kind: input, shape index: {}]   ;;  %s9589_s4 = inlined_call_operand.vmem [shape: f32[9,1,512], index: 4, kind: input, shape index: {}]   ;;  %s9590_s5 = inlined_call_operand.hbm [shape: f32[512,128], index: 5, kind: input, shape index: {}]   ;;  %s9591_s6 = inlined_call_operand.vmem [shape: f32[6,4,4], index: 6, kind: input, shape index: {}]   ;;  %s9592_s7 = inlined_call_operand.hbm [shape: f32[3,1,128], index: 7, kind: input, shape index: {}]   ;;  %s9593_s8 = inlined_call_operand.hbm [shape: f32[3,4,4], index: 8, kind: input, shape index: {}]   ;;  %s9594_s9 = inlined_call_operand.vmem [shape: f32[64,256], index: 9, kind: input, shape index: {}]   ;;  %s9595_s10 = inlined_call_operand.hbm [shape: f32[4,4], index: 10, kind: input, shape index: {}]   ;;  %s9596_s11 = inlined_call_operand.vmem [shape: f32[9,4,4], index: 11, kind: input, shape index: {}]   ;;  %s9597_s12 = inlined_call_operand.vmem [shape: f32[8,4], index: 12, kind: input, shape index: {}]   ;;  %s9598_s13 = inlined_call_operand.vmem [shape: f32[8,1], index: 13, kind: input, shape index: {}]   ;;  %s9599_s14 = inlined_call_operand.hbm [shape: f32[2,8,256], index: 14, kind: output, shape index: {}]  }
   0x1   :  { %20 = vsyncpa [#allocation6], 0 }
   0x2   :  { %21 = vsyncpa [#allocation9], 0 }
   0x3   :  { %22 = vsyncpa [#allocation12], 0 }
   0x4   :  { %23 = vsyncpa [#allocation4], 0  ;;  %s8011_s29 = smov [#allocation5]   ;;  %s8012_s15 = smov [#allocation8]  }
   0x5   :  { %s42_s30 = sshll.u32 %s8011_s29, 4  ;;  %s65_s16 = sshll.u32 %s8012_s15, 4  ;;  %s43_s30 = int_to_ptr.vmem [resolvable:$true] %s42_s30  ;;  %s66_s16 = int_to_ptr.vmem [resolvable:$true] %s65_s16 }
   0x6   :  { %s7849_s17 = scalar_lea.vmem %s43_s30, 64  ;;  %p7854_p1 = scmp.lt.s32.totalorder %s43_s30, %s43_s30 }
   0x7   :  { %p7850_p0 = scmp.ne.s32.totalorder %s43_s30, %s7849_s17  ;;  %p7855_p2 = scmp.lt.s32.totalorder %s7849_s17, %s7849_s17 }
   0x9   :  { %p7856_p3 = por %p7855_p2, %p7854_p1 }
   0xb   :  { %p7857_p4 = pnand %p7856_p3, %p7850_p0 }
   0xd   :  { %7860 = shalt.err (!%p7857_p4)
}
   0xe   :  { %45 = dma.hbm_to_vmem [thread:$0]  %s9586_s1, 64, %s43_s30, [#allocation6]  }
   0xf   :  { %s7869_s20 = scalar_lea.vmem %s66_s16, 8192  ;;  %p7874_p6 = scmp.lt.s32.totalorder %s66_s16, %s66_s16 }
  0x10   :  { %p7870_p5 = scmp.ne.s32.totalorder %s66_s16, %s7869_s20  ;;  %p7875_p7 = scmp.lt.s32.totalorder %s7869_s20, %s7869_s20 }
  0x12   :  { %p7876_p8 = por %p7875_p7, %p7874_p6 }
  0x14   :  { %p7877_p9 = pnand %p7876_p8, %p7870_p5 }
  0x16   :  { %7880 = shalt.err (!%p7877_p9)
}
  0x17   :  { %s8013_s21 = smov 128   ;;  %s8014_s22 = smov 8  }
  0x18   :  { %71 = dma.hbm_to_vmem [thread:$0]  %s9590_s5, 8192, %s66_s16, [#allocation9], %s8013_s21, %s8013_s21, %s8014_s22  }
  0x19   :  { %s8015_s25 = smov [#allocation11]  }
  0x1a   :  { %s91_s26 = sshll.u32 %s8015_s25, 4  ;;  %s92_s26 = int_to_ptr.vmem [resolvable:$true] %s91_s26 }
  0x1b   :  { %s7889_s27 = scalar_lea.vmem %s92_s26, 192  ;;  %p7894_p11 = scmp.lt.s32.totalorder %s92_s26, %s92_s26 }
  0x1c   :  { %p7890_p10 = scmp.ne.s32.totalorder %s92_s26, %s7889_s27  ;;  %p7895_p12 = scmp.lt.s32.totalorder %s7889_s27, %s7889_s27 }
  0x1e   :  { %p7896_p13 = por %p7895_p12, %p7894_p11 }
  0x20   :  { %p7897_p0 = pnand %p7896_p13, %p7890_p10 }
  0x22   :  { %7900 = shalt.err (!%p7897_p0)
}
  0x23   :  { %s8016_s1 = smov 64   ;;  %s8017_s28 = smov 4  }
  0x24   :  { %97 = dma.hbm_to_vmem [thread:$0]  %s9593_s8, 192, %s92_s26, [#allocation12], %s8016_s1, %s8016_s1, %s8017_s28  }
  0x25   :  { %s8018_s15 = smov [#allocation2]  }
  0x26   :  { %s29_s5 = sshll.u32 %s8018_s15, 4  ;;  %s30_s5 = int_to_ptr.vmem [resolvable:$true] %s29_s5 }
  0x27   :  { %s7909_s16 = scalar_lea.vmem %s30_s5, 512  ;;  %p7914_p2 = scmp.lt.s32.totalorder %s30_s5, %s30_s5 }
  0x28   :  { %p7910_p1 = scmp.ne.s32.totalorder %s30_s5, %s7909_s16  ;;  %p7915_p3 = scmp.lt.s32.totalorder %s7909_s16, %s7909_s16 }
  0x2a   :  { %p7916_p4 = por %p7915_p3, %p7914_p2 }
  0x2c   :  { %p7917_p5 = pnand %p7916_p4, %p7910_p1 }
  0x2e   :  { %7920 = shalt.err (!%p7917_p5)
}
  0x2f   :  { %s8019_s17 = smov 256   ;;  %s8020_s18 = smov 16  }
  0x30   :  { %35 = dma.hbm_to_vmem [thread:$0]  %s9585_s0, 512, %s30_s5, [#allocation3], %s8019_s17, %s8019_s17, %s8020_s18  }
  0x31   :  { %s8021_s8 = smov [#allocation7]   ;;  %s8022_s22 = smov [#allocation10]  }
  0x32   :  { %s52_s21 = sshll.u32 %s8021_s8, 4  ;;  %s79_s23 = sshll.u32 %s8022_s22, 4  ;;  %s53_s21 = int_to_ptr.vmem [resolvable:$true] %s52_s21  ;;  %s80_s23 = int_to_ptr.vmem [resolvable:$true] %s79_s23 }
  0x33   :  { %s7929_s24 = scalar_lea.vmem %s53_s21, 64  ;;  %p7934_p7 = scmp.lt.s32.totalorder %s53_s21, %s53_s21 }
  0x34   :  { %p7930_p6 = scmp.ne.s32.totalorder %s53_s21, %s7929_s24  ;;  %p7935_p8 = scmp.lt.s32.totalorder %s7929_s24, %s7929_s24 }
  0x36   :  { %p7936_p9 = por %p7935_p8, %p7934_p7 }
  0x38   :  { %p7937_p10 = pnand %p7936_p9, %p7930_p6 }
  0x3a   :  { %7940 = shalt.err (!%p7937_p10)
}
  0x3b   :  { %55 = dma.hbm_to_vmem [thread:$0]  %s9587_s2, 64, %s53_s21, [#allocation6]  }
  0x3c   :  { %s7949_s27 = scalar_lea.vmem %s80_s23, 48  ;;  %s7953_s0 = scalar_lea.vmem %s80_s23, 64 }
  0x3d   :  { %p7950_p11 = scmp.ne.s32.totalorder %s80_s23, %s7949_s27  ;;  %p7954_p12 = scmp.lt.s32.totalorder %s80_s23, %s80_s23 }
  0x3e   :  { %p7955_p13 = scmp.lt.s32.totalorder %s7953_s0, %s7949_s27 }
  0x40   :  { %p7956_p0 = por %p7955_p13, %p7954_p12 }
  0x42   :  { %p7957_p1 = pnand %p7956_p0, %p7950_p11 }
  0x44   :  { %7960 = shalt.err (!%p7957_p1)
}
  0x45   :  { %s8023_s28 = smov 1   ;;  %s8024_s15 = smov [#allocation13]  }
  0x46   :  { %85 = dma.hbm_to_vmem [thread:$0]  %s9592_s7, 48, %s80_s23, [#allocation9], %s8020_s18, %s8020_s18, %s8023_s28  }
  0x47   :  { %s106_s5 = sshll.u32 %s8024_s15, 4  ;;  %s107_s5 = int_to_ptr.vmem [resolvable:$true] %s106_s5 }
  0x48   :  { %s7969_s2 = scalar_lea.vmem %s107_s5, 64  ;;  %p7974_p3 = scmp.lt.s32.totalorder %s107_s5, %s107_s5 }
  0x49   :  { %p7970_p2 = scmp.ne.s32.totalorder %s107_s5, %s7969_s2  ;;  %p7975_p4 = scmp.lt.s32.totalorder %s7969_s2, %s7969_s2 }
  0x4b   :  { %p7976_p5 = por %p7975_p4, %p7974_p3 }
  0x4d   :  { %p7977_p6 = pnand %p7976_p5, %p7970_p2 }
  0x4f   :  { %7980 = shalt.err (!%p7977_p6)
}
  0x50   :  { %109 = dma.hbm_to_vmem [thread:$0]  %s9595_s10, 64, %s107_s5, [#allocation12]  }
  0x51   :  { %8001 = dma.done.wait [#allocation3], 512  }
  0x52   :  { %8002 = vsyncadd [#allocation3], 4294966784 }
  0x53   :  { %8003 = dma.done.wait [#allocation6], 128  }
  0x54   :  { %8004 = vsyncadd [#allocation6], 4294967168 }
  0x55   :  { %8005 = dma.done.wait [#allocation9], 8240  }
  0x56   :  { %8006 = vsyncadd [#allocation9], 4294959056 }
  0x57   :  { %8007 = dma.done.wait [#allocation12], 256  }
  0x58   :  { %8008 = vsyncadd [#allocation12], 4294967040  ;;  %v9602_v0 = vmov 0.0   ;;  %v9600_v1 = vmov 0   ;;  %v8027_v2 = vmov 1   ;;  %v139_v3 = vld [vmem:[#allocation2 + $0x8] sm:$0xff] }
  0x59   :  { %217 = vmatprep.mubr.f32.mxu0 %v9602_v0  ;;  %288 = vmatprep.mubr.f32.mxu1 %v9602_v0  ;;  %v142_v4 = vld [vmem:[#allocation2 + $0x18] sm:$0xff]  ;;  %v138_v5 = vld [vmem:[#allocation2] sm:$0xff]  ;;  %vm149_vm0 = vcmask 64512   ;;  %v141_v6 = vld [vmem:[#allocation2 + $0x10] sm:$0xff]  ;;  %v8028_v9 = vmov 2   ;;  %vm295_vm1 = vcmask 1043456  }
  0x5a   :  { %7723 = vset.pattern.permute.xlu0 %v9600_v1  ;;  %7724 = vset.pattern.permute.xlu1 %v8027_v2  ;;  %v143_v7 = vld [vmem:[#allocation5] sm:$0xf]  ;;  %v8151_v8 = vld [vmem:[#allocation7] sm:$0xf]  ;;  %s8029_s7 = smov 15   ;;  %s8030_s10 = smov 17  }
  0x5b   :  { %183 = vmatprep.subr.mxu0 %v139_v3  ;;  %254 = vmatprep.subr.mxu1 %v142_v4  ;;  %s8031_s20 = smov 127   ;;  %s8032_s8 = smov 113   ;;  %vm437_vm3 = vcmask 31744   ;;  %vm8038_vm11 = vmmov 0   ;;  %vm3084_vm12 = vcmask 523264  }
  0x5c   :  { %184 = vmatpush1.msra.mxu0 %v138_v5  ;;  %255 = vmatpush1.msra.mxu1 %v141_v6  ;;  %s8033_s21 = smov 112   ;;  %s8034_s22 = smov 111   ;;  %v361_v6 = vlaneseq }
  0x5d   :  { %6958 = vmatmul.mubr.msk.f32.vlgmr.msra.gmra.mxu0 %vm149_vm0, %v143_v7  ;;  %6959 = vmatmul.mubr.msk.f32.vlgmr.msra.gmra.mxu1 %vm149_vm0, %v143_v7  ;;  %s8043_s25 = smov [#allocation14]  }
  0x5e   :  { %146 = vperm.xlu0 %7723, %v8151_v8   ;;  %334 = vperm.xlu1 %7724, %v8151_v8   ;;  %v8238_v7 = vshrl.u32 %v361_v6, 7  ;;  %s6943_s26 = sshll.u32 %s8043_s25, 4  ;;  %s6944_s26 = int_to_ptr.vmem [resolvable:$true] %s6943_s26 }
  0x5f   :  { %517 = vmatprep.mubr.f32.mxu0 %v9602_v0  ;;  %588 = vmatprep.mubr.f32.mxu1 %v9602_v0  ;;  %p7986_p8 = scmp.lt.s32.totalorder %s6944_s26, %s6944_s26 }
  0x62   :  { %7725 = vset.pattern.permute.xlu1 %v8028_v9  ;;  %v8240_v9 = vand.u32 127, %v361_v6 }
  0x64   :  { %vm403_vm2 = vcmp.lt.s32.totalorder %v8240_v9, 16  ;;  %vm363_vm4 = vcmp.lt.s32.totalorder %v8240_v9, 17  ;;  %vm760_vm5 = vcmp.lt.s32.totalorder %v8240_v9, 15  ;;  %vm963_vm6 = vcmp.lt.s32.totalorder %v8240_v9, 1 }
  0x65   :  { %vm1356_vm7 = vcmp.lt.s32.totalorder %v8240_v9, 127  ;;  %vm1559_vm8 = vcmp.lt.s32.totalorder %v8240_v9, 113  ;;  %vm1762_vm9 = vcmp.lt.s32.totalorder %v8240_v9, 112  ;;  %vm1965_vm10 = vcmp.lt.s32.totalorder %v8240_v9, 111 }
  0xd9   :  { %v147_v10 = vpop.permute.xlu0 %146  ;;  %v335_v37 = vpop.permute.xlu1 %334 }
 0x11d   :  { %v219_v11 = vpop.f32.mrf.mxu0  ;;  %v290_v12 = vpop.f32.mrf.mxu1 }
 0x11e   :  { %v220_v13 = vadd.f32 %v219_v11, %v147_v10  ;;  %v291_v14 = vadd.f32 %v290_v12, %v147_v10 }
 0x11f   :  { %v221_v15 = vpop.f32.mrf.mxu0  ;;  %v292_v16 = vpop.f32.mrf.mxu1 }
 0x120   :  { %v222_v17 = vadd.f32 %v221_v15, %v147_v10  ;;  %v293_v18 = vadd.f32 %v292_v16, %v147_v10  ;;  %v306_v19 = vmul.f32 %v220_v13, %v220_v13  ;;  %v296_v22 = vsel %vm295_vm1, %v220_v13, 0.0  ;;  %v6960_v10 = vld [vmem:[%s9589_s4 + $0x4] sm:$0xf] }
 0x121   :  { %v308_v23 = vmul.f32 %v291_v14, %v291_v14  ;;  %v299_v25 = vsel %vm295_vm1, %v291_v14, 0.0 }
 0x122   :  { %v297_v20 = vsel %vm295_vm1, %v222_v17, 0.0  ;;  %v307_v21 = vmul.f32 %v222_v17, %v222_v17  ;;  %v309_v26 = vmul.f32 %v293_v18, %v293_v18  ;;  %v310_v27 = vsel %vm295_vm1, %v306_v19, 0.0 }
 0x123   :  { %v298_v24 = vadd.f32 %v297_v20, %v296_v22  ;;  %v301_v31 = vsel %vm295_vm1, %v293_v18, 0.0  ;;  %v313_v32 = vsel %vm295_vm1, %v308_v23, 0.0  ;;  %v8261_v19 = vsub.s32 2, %v8238_v7 }
 0x124   :  { %v311_v28 = vsel %vm295_vm1, %v307_v21, 0.0  ;;  %v315_v35 = vsel %vm295_vm1, %v309_v26, 0.0 }
 0x125   :  { %v300_v29 = vadd.f32 %v299_v25, %v298_v24  ;;  %v312_v30 = vadd.f32 %v311_v28, %v310_v27  ;;  %v8273_v24 = vrot.slane %v6960_v10, %v8261_v19 }
 0x127   :  { %v302_v33 = vadd.f32 %v301_v31, %v300_v29  ;;  %v314_v34 = vadd.f32 %v313_v32, %v312_v30  ;;  %v6961_v32 = vld [vmem:[%s9588_s3 + $0x4] sm:$0xf] }
 0x129   :  { %303 = vadd.xlane.f32.xlu0 %v302_v33  ;;  %v316_v36 = vadd.f32 %v315_v35, %v314_v34  ;;  %v368_v34 = vld [vmem:[%s9589_s4] sm:$0xf] }
 0x12b   :  { %317 = vadd.xlane.f32.xlu1 %v316_v36 }
 0x13c   :  { %342 = vperm.xlu1 %7725, %v8151_v8  }
 0x1b2   :  { %v304_v38 = vpop.xlane.xlu0 %303 }
 0x1b3   :  { %v305_v39 = vmul.f32 0.001953125, %v304_v38 }
 0x1b4   :  { %v318_v40 = vpop.xlane.xlu1 %317 }
 0x1b5   :  { %v319_v41 = vmul.f32 0.001953125, %v318_v40  ;;  %v320_v42 = vmul.f32 %v305_v39, %v305_v39  ;;  %v323_v46 = vsub.f32 %v220_v13, %v305_v39  ;;  %v324_v47 = vsub.f32 %v222_v17, %v305_v39 }
 0x1b6   :  { %v325_v48 = vsub.f32 %v291_v14, %v305_v39  ;;  %v326_v50 = vsub.f32 %v293_v18, %v305_v39  ;;  %v8246_v13 = vsub.s32 1, %v8238_v7  ;;  %v8255_v17 = vsub.s32 0, %v8238_v7 }
 0x1b7   :  { %v321_v43 = vsub.f32 %v319_v41, %v320_v42  ;;  %v8258_v18 = vsub.s32 3, %v8238_v7 }
 0x1b8   :  { %v343_v54 = vpop.permute.xlu1 %342  ;;  %v8250_v14 = vrot.slane %v6960_v10, %v8246_v13  ;;  %v8267_v22 = vrot.slane %v6960_v10, %v8255_v17  ;;  %v8297_v36 = vrot.slane %v368_v34, %v8246_v13  ;;  %v8308_v41 = vrot.slane %v368_v34, %v8255_v17 }
 0x1b9   :  { %v322_v44 = vmax.f32 %v321_v43, 0.0  ;;  %v8270_v23 = vrot.slane %v6960_v10, %v8258_v18  ;;  %v6982_v10 = vld [vmem:[%s9589_s4 + $0xc] sm:$0xf] }
 0x1ba   :  { %9635 = vst [vmem:[#allocation20_spill] sm:$0xff] %v8308_v41 }
 0x1bb   :  { %v327_v45 = vadd.f32 1e-05, %v322_v44 }
 0x1bd   :  { %7735 = vrsqrt.f32 %v327_v45 }
 0x1ca   :  { %v7736_v49 = vpop.eup %7735 }
 0x1cb   :  { %v329_v51 = vmul.f32 %v7736_v49, %v323_v46  ;;  %v330_v52 = vmul.f32 %v7736_v49, %v324_v47  ;;  %v331_v53 = vmul.f32 %v7736_v49, %v325_v48  ;;  %v332_v55 = vmul.f32 %v7736_v49, %v326_v50  ;;  %v394_v48 = vld [vmem:[%s9588_s3] sm:$0xf]  ;;  %v6974_v50 = vld [vmem:[%s9589_s4 + $0x8] sm:$0xf] }
 0x1cc   :  { %v8317_v46 = vrot.slane %v368_v34, %v8261_v19  ;;  %v8320_v47 = vrot.slane %v368_v34, %v8258_v18 }
 0x1cd   :  { %v337_v56 = vmul.f32 %v335_v37, %v329_v51  ;;  %v338_v57 = vmul.f32 %v335_v37, %v330_v52  ;;  %v339_v58 = vmul.f32 %v335_v37, %v331_v53  ;;  %v340_v61 = vmul.f32 %v335_v37, %v332_v55 }
 0x1ce   :  { %9636 = vst [vmem:[#allocation21_spill] sm:$0xff] %v8317_v46  ;;  %9637 = vst [vmem:[#allocation22_spill] sm:$0xff] %v8320_v47  ;;  %v8337_v55 = vrot.slane %v6974_v50, %v8246_v13 }
 0x1cf   :  { %v345_v59 = vadd.f32 %v343_v54, %v337_v56  ;;  %v347_v60 = vadd.f32 %v343_v54, %v339_v58  ;;  %v346_v62 = vadd.f32 %v343_v54, %v338_v57  ;;  %v348_v3 = vadd.f32 %v343_v54, %v340_v61 }
 0x1d0   :  { %9638 = vst [vmem:[#allocation23_spill] sm:$0xff] %v8337_v55  ;;  %v8353_v61 = vrot.slane %v6974_v50, %v8258_v18 }
 0x1d1   :  { %v8166_v63 = vmax.f32 %v345_v59, 0.0  ;;  %v8168_v2 = vmax.f32 %v347_v60, 0.0  ;;  %v8174_v4 = vmax.f32 %v346_v62, 0.0  ;;  %v8180_v5 = vmax.f32 %v348_v3, 0.0 }
 0x1d2   :  { %v8350_v60 = vrot.slane %v6974_v50, %v8255_v17  ;;  %9640 = vst [vmem:[#allocation25_spill] sm:$0xff] %v8353_v61  ;;  %v8357_v62 = vrot.slane %v6974_v50, %v8261_v19 }
 0x1d3   :  { %399 = vrot.lane.b32.xlu0 %v8168_v2, %s8020_s18  ;;  %395 = vrot.lane.b32.xlu1 %v8166_v63, %s8020_s18 }
 0x1d4   :  { %9639 = vst [vmem:[#allocation24_spill] sm:$0xff] %v8350_v60  ;;  %9641 = vst [vmem:[#allocation26_spill] sm:$0xff] %v8357_v62 }
 0x1d7   :  { %754 = vrot.lane.b32.xlu0 %v8174_v4, %s8029_s7  ;;  %397 = vrot.lane.b32.xlu1 %v8174_v4, %s8020_s18 }
 0x1db   :  { %756 = vrot.lane.b32.xlu0 %v8168_v2, %s8029_s7  ;;  %401 = vrot.lane.b32.xlu1 %v8180_v5, %s8020_s18 }
 0x1df   :  { %957 = vrot.lane.b32.xlu0 %v8174_v4, %s8023_s28  ;;  %353 = vrot.lane.b32.xlu1 %v8166_v63, %s8030_s10 }
 0x1e3   :  { %959 = vrot.lane.b32.xlu0 %v8168_v2, %s8023_s28  ;;  %355 = vrot.lane.b32.xlu1 %v8174_v4, %s8030_s10 }
 0x1e7   :  { %1352 = vrot.lane.b32.xlu0 %v8168_v2, %s8031_s20  ;;  %359 = vrot.lane.b32.xlu1 %v8180_v5, %s8030_s10 }
 0x1eb   :  { %1354 = vrot.lane.b32.xlu0 %v8180_v5, %s8031_s20  ;;  %357 = vrot.lane.b32.xlu1 %v8168_v2, %s8030_s10 }
 0x1ef   :  { %1555 = vrot.lane.b32.xlu0 %v8168_v2, %s8032_s8  ;;  %752 = vrot.lane.b32.xlu1 %v8166_v63, %s8029_s7 }
 0x1f3   :  { %1557 = vrot.lane.b32.xlu0 %v8180_v5, %s8032_s8  ;;  %758 = vrot.lane.b32.xlu1 %v8180_v5, %s8029_s7 }
 0x1f7   :  { %1758 = vrot.lane.b32.xlu0 %v8168_v2, %s8033_s21  ;;  %955 = vrot.lane.b32.xlu1 %v8166_v63, %s8023_s28 }
 0x1fb   :  { %1760 = vrot.lane.b32.xlu0 %v8180_v5, %s8033_s21  ;;  %961 = vrot.lane.b32.xlu1 %v8180_v5, %s8023_s28 }
 0x1ff   :  { %1961 = vrot.lane.b32.xlu0 %v8168_v2, %s8034_s22  ;;  %1350 = vrot.lane.b32.xlu1 %v8174_v4, %s8031_s20 }
 0x203   :  { %1963 = vrot.lane.b32.xlu0 %v8180_v5, %s8034_s22  ;;  %1348 = vrot.lane.b32.xlu1 %v8166_v63, %s8031_s20 }
 0x207   :  { %1553 = vrot.lane.b32.xlu1 %v8174_v4, %s8032_s8 }
 0x20b   :  { %1551 = vrot.lane.b32.xlu1 %v8166_v63, %s8032_s8 }
 0x20f   :  { %1756 = vrot.lane.b32.xlu1 %v8174_v4, %s8033_s21 }
 0x213   :  { %1754 = vrot.lane.b32.xlu1 %v8166_v63, %s8033_s21 }
 0x217   :  { %1959 = vrot.lane.b32.xlu1 %v8174_v4, %s8034_s22 }
 0x21b   :  { %1957 = vrot.lane.b32.xlu1 %v8166_v63, %s8034_s22 }
 0x245   :  { %v400_v11 = vpop.permute.xlu0 %399  ;;  %v396_v12 = vpop.permute.xlu1 %395 }
 0x249   :  { %v8252_v15 = vpop.permute.xlu0 %754  ;;  %v398_v16 = vpop.permute.xlu1 %397 }
 0x24a   :  { %v406_v20 = vsel %vm403_vm2, %v396_v12, %v398_v16  ;;  %v405_v25 = vsel %vm403_vm2, %v398_v16, %v400_v11 }
 0x24b   :  { %v432_v21 = vmul.f32 %v8250_v14, %v406_v20  ;;  %v433_v33 = vmul.f32 %v8273_v24, %v405_v25  ;;  %v6975_v25 = vld [vmem:[%s9588_s3 + $0x8] sm:$0xf] }
 0x24d   :  { %6962 = vmatprep.subr.msk.mxu0 %vm295_vm1, %v432_v21  ;;  %v402_v26 = vpop.permute.xlu1 %401  ;;  %v757_v27 = vpop.permute.xlu0 %756 }
 0x24e   :  { %v404_v28 = vsel %vm403_vm2, %v400_v11, %v402_v26  ;;  %v407_v29 = vsel %vm403_vm2, %v402_v26, %v396_v12  ;;  %v762_v3 = vsel %vm760_vm5, %v8252_v15, %v757_v27 }
 0x24f   :  { %v431_v30 = vmul.f32 %v8267_v22, %v407_v29  ;;  %v434_v31 = vmul.f32 %v8270_v23, %v404_v28  ;;  %v790_v26 = vmul.f32 %v8357_v62, %v762_v3  ;;  %v6990_v29 = vld [vmem:[%s9589_s4 + $0x10] sm:$0xf] }
 0x251   :  { %6963 = vmatpush1.msk.msra.mxu0 %vm295_vm1, %v431_v30  ;;  %6965 = vmatprep.subr.msk.mxu1 %vm295_vm1, %v434_v31  ;;  %v354_v35 = vpop.permute.xlu1 %353  ;;  %v8301_v37 = vpop.permute.xlu0 %957  ;;  %v8395_v31 = vrot.slane %v6982_v10, %v8255_v17 }
 0x252   :  { %6966 = vmatpush1.msk.msra.mxu1 %vm295_vm1, %v433_v33  ;;  %6964 = vmatmul.mubr.msk.f32.vlgmr.msra.gmra.mxu0 %vm437_vm3, %v6961_v32  ;;  %v8403_v33 = vrot.slane %v6982_v10, %v8261_v19 }
 0x253   :  { %6967 = vmatmul.mubr.msk.f32.vlgmr.msra.gmra.mxu1 %vm437_vm3, %v6961_v32  ;;  %674 = vmatprep.mubr.f32.mxu0 %v9602_v0  ;;  %9643 = vst [vmem:[#allocation28_spill] sm:$0xff] %v8395_v31  ;;  %v8398_v32 = vrot.slane %v6982_v10, %v8258_v18 }
 0x254   :  { %745 = vmatprep.mubr.f32.mxu1 %v9602_v0  ;;  %9645 = vst [vmem:[#allocation30_spill] sm:$0xff] %v8403_v33 }
 0x255   :  { %v356_v38 = vpop.permute.xlu1 %355  ;;  %v8311_v43 = vpop.permute.xlu0 %959  ;;  %9644 = vst [vmem:[#allocation29_spill] sm:$0xff] %v8398_v32 }
 0x256   :  { %v366_v39 = vsel %vm363_vm4, %v354_v35, %v356_v38 }
 0x257   :  { %v391_v40 = vmul.f32 %v8297_v36, %v366_v39  ;;  %v8414_v39 = vrot.slane %v6990_v29, %v8246_v13 }
 0x259   :  { %6968 = vmatprep.subr.msk.mxu0 %vm295_vm1, %v391_v40  ;;  %v360_v42 = vpop.permute.xlu1 %359  ;;  %v8340_v56 = vpop.permute.xlu0 %1352  ;;  %9646 = vst [vmem:[#allocation31_spill] sm:$0xff] %v8414_v39  ;;  %v8417_v40 = vrot.slane %v6990_v29, %v8255_v17 }
 0x25a   :  { %v367_v44 = vsel %vm363_vm4, %v360_v42, %v354_v35  ;;  %v965_v35 = vsel %vm963_vm6, %v8301_v37, %v8311_v43 }
 0x25b   :  { %v390_v45 = vmul.f32 %v8308_v41, %v367_v44  ;;  %9647 = vst [vmem:[#allocation32_spill] sm:$0xff] %v8417_v40 }
 0x25d   :  { %6969 = vmatpush1.msk.msra.mxu0 %vm295_vm1, %v390_v45  ;;  %v358_v49 = vpop.permute.xlu1 %357  ;;  %v8367_v11 = vpop.permute.xlu0 %1354  ;;  %v8428_v45 = vrot.slane %v6990_v29, %v8258_v18 }
 0x25e   :  { %v364_v51 = vsel %vm363_vm4, %v358_v49, %v360_v42  ;;  %v365_v52 = vsel %vm363_vm4, %v356_v38, %v358_v49  ;;  %6970 = vmatmul.mubr.msk.f32.vlgmr.msra.gmra.mxu0 %vm437_vm3, %v394_v48  ;;  %v6998_v42 = vld [vmem:[%s9589_s4 + $0x14] sm:$0xf] }
 0x25f   :  { %v392_v53 = vmul.f32 %v8317_v46, %v365_v52  ;;  %v393_v54 = vmul.f32 %v8320_v47, %v364_v51  ;;  %873 = vmatprep.mubr.f32.mxu0 %v9602_v0  ;;  %9648 = vst [vmem:[#allocation33_spill] sm:$0xff] %v8428_v45  ;;  %v8436_v51 = vrot.slane %v6998_v42, %v8246_v13 }
 0x260   :  { %v993_v52 = vmul.f32 %v8403_v33, %v965_v35  ;;  %v1184_v3 = vmul.f32 %v8428_v45, %v8180_v5 }
 0x261   :  { %6971 = vmatprep.subr.msk.mxu1 %vm295_vm1, %v393_v54  ;;  %v753_v57 = vpop.permute.xlu1 %752  ;;  %v8405_v34 = vpop.permute.xlu0 %1555  ;;  %9650 = vst [vmem:[#allocation35_spill] sm:$0xff] %v8436_v51  ;;  %v1182_v54 = vmul.f32 %v8414_v39, %v8174_v4 }
 0x262   :  { %v763_v58 = vsel %vm760_vm5, %v753_v57, %v8252_v15  ;;  %6972 = vmatpush1.msk.msra.mxu1 %vm295_vm1, %v392_v53  ;;  %v8376_v15 = vrot.slane %v6982_v10, %v8246_v13 }
 0x263   :  { %v789_v59 = vmul.f32 %v8337_v55, %v763_v58  ;;  %6973 = vmatmul.mubr.msk.f32.vlgmr.msra.gmra.mxu1 %vm437_vm3, %v394_v48  ;;  %v8431_v48 = vrot.slane %v6990_v29, %v8261_v19 }
 0x264   :  { %944 = vmatprep.mubr.f32.mxu1 %v9602_v0  ;;  %9642 = vst [vmem:[#allocation27_spill] sm:$0xff] %v8376_v15 }
 0x265   :  { %6976 = vmatprep.subr.msk.mxu0 %vm295_vm1, %v789_v59  ;;  %v759_v6 = vpop.permute.xlu1 %758  ;;  %9649 = vst [vmem:[#allocation34_spill] sm:$0xff] %v8431_v48  ;;  %v1558_v58 = vpop.permute.xlu0 %1557 }
 0x266   :  { %v761_v12 = vsel %vm760_vm5, %v757_v27, %v759_v6  ;;  %v764_v16 = vsel %vm760_vm5, %v759_v6, %v753_v57  ;;  %v1181_v57 = vmul.f32 %v8417_v40, %v8166_v63  ;;  %v1183_v6 = vmul.f32 %v8431_v48, %v8168_v2 }
 0x267   :  { %v788_v20 = vmul.f32 %v8350_v60, %v764_v16  ;;  %v791_v21 = vmul.f32 %v8353_v61, %v761_v12  ;;  %v8462_v12 = vrot.slane %v6998_v42, %v8255_v17  ;;  %v8465_v16 = vrot.slane %v6998_v42, %v8258_v18 }
 0x269   :  { %6977 = vmatpush1.msk.msra.mxu0 %vm295_vm1, %v788_v20  ;;  %6979 = vmatprep.subr.msk.mxu1 %vm295_vm1, %v791_v21  ;;  %v956_v27 = vpop.permute.xlu1 %955  ;;  %9651 = vst [vmem:[#allocation36_spill] sm:$0xff] %v8462_v12  ;;  %9652 = vst [vmem:[#allocation37_spill] sm:$0xff] %v8465_v16  ;;  %v6991_v20 = vld [vmem:[%s9588_s3 + $0x10] sm:$0xf]  ;;  %v8471_v21 = vrot.slane %v6998_v42, %v8261_v19  ;;  %v1759_v42 = vpop.permute.xlu0 %1758 }
 0x26a   :  { %v966_v28 = vsel %vm963_vm6, %v956_v27, %v8301_v37  ;;  %6980 = vmatpush1.msk.msra.mxu1 %vm295_vm1, %v790_v26  ;;  %6978 = vmatmul.mubr.msk.f32.vlgmr.msra.gmra.mxu0 %vm437_vm3, %v6975_v25 }
 0x26b   :  { %v992_v30 = vmul.f32 %v8376_v15, %v966_v28  ;;  %6981 = vmatmul.mubr.msk.f32.vlgmr.msra.gmra.mxu1 %vm437_vm3, %v6975_v25  ;;  %1076 = vmatprep.mubr.f32.mxu0 %v9602_v0  ;;  %9653 = vst [vmem:[#allocation38_spill] sm:$0xff] %v8471_v21  ;;  %v1357_v25 = vsel %vm1356_vm7, %v8340_v56, %v8367_v11 }
 0x26c   :  { %1147 = vmatprep.mubr.f32.mxu1 %v9602_v0 }
 0x26d   :  { %6984 = vmatprep.subr.msk.mxu0 %vm295_vm1, %v992_v30  ;;  %v962_v38 = vpop.permute.xlu1 %961 }
 0x26e   :  { %v964_v44 = vsel %vm963_vm6, %v8311_v43, %v962_v38  ;;  %v967_v37 = vsel %vm963_vm6, %v962_v38, %v956_v27  ;;  %v6983_v43 = vld [vmem:[%s9588_s3 + $0xc] sm:$0xf]  ;;  %v7006_v27 = vld [vmem:[%s9589_s4 + $0x18] sm:$0xf]  ;;  %v6999_v38 = vld [vmem:[%s9588_s3 + $0x14] sm:$0xf] }
 0x26f   :  { %v991_v49 = vmul.f32 %v8395_v31, %v967_v37  ;;  %v994_v50 = vmul.f32 %v8398_v32, %v964_v44  ;;  %v8495_v35 = vrot.slane %v7006_v27, %v8246_v13 }
 0x271   :  { %6985 = vmatpush1.msk.msra.mxu0 %vm295_vm1, %v991_v49  ;;  %6987 = vmatprep.subr.msk.mxu1 %vm295_vm1, %v994_v50  ;;  %v1351_v53 = vpop.permute.xlu1 %1350  ;;  %9654 = vst [vmem:[#allocation39_spill] sm:$0xff] %v8495_v35  ;;  %v8514_v50 = vrot.slane %v7006_v27, %v8255_v17 }
 0x272   :  { %v1358_v59 = vsel %vm1356_vm7, %v1351_v53, %v8340_v56  ;;  %6986 = vmatmul.mubr.msk.f32.vlgmr.msra.gmra.mxu0 %vm437_vm3, %v6983_v43  ;;  %6988 = vmatpush1.msk.msra.mxu1 %vm295_vm1, %v993_v52  ;;  %v8521_v52 = vrot.slane %v7006_v27, %v8261_v19 }
 0x273   :  { %v1385_v10 = vmul.f32 %v8436_v51, %v1358_v59  ;;  %6992 = vmatprep.subr.msk.mxu0 %vm295_vm1, %v1182_v54  ;;  %6989 = vmatmul.mubr.msk.f32.vlgmr.msra.gmra.mxu1 %vm437_vm3, %v6983_v43  ;;  %9655 = vst [vmem:[#allocation40_spill] sm:$0xff] %v8514_v50  ;;  %v8517_v43 = vrot.slane %v7006_v27, %v8258_v18  ;;  %v1761_v59 = vpop.permute.xlu0 %1760 }
 0x274   :  { %6993 = vmatpush1.msk.msra.mxu0 %vm295_vm1, %v1181_v57  ;;  %6995 = vmatprep.subr.msk.mxu1 %vm295_vm1, %v1184_v3  ;;  %9657 = vst [vmem:[#allocation42_spill] sm:$0xff] %v8521_v52  ;;  %v7014_v57 = vld [vmem:[%s9589_s4 + $0x1c] sm:$0xf] }
 0x275   :  { %6996 = vmatpush1.msk.msra.mxu1 %vm295_vm1, %v1183_v6  ;;  %1266 = vmatprep.mubr.f32.mxu0 %v9602_v0  ;;  %v1349_v26 = vpop.permute.xlu1 %1348  ;;  %9656 = vst [vmem:[#allocation41_spill] sm:$0xff] %v8517_v43 }
 0x276   :  { %v1359_v28 = vsel %vm1356_vm7, %v1349_v26, %v1351_v53  ;;  %v1360_v29 = vsel %vm1356_vm7, %v8367_v11, %v1349_v26  ;;  %7000 = vmatprep.subr.msk.mxu0 %vm295_vm1, %v1385_v10  ;;  %6994 = vmatmul.mubr.msk.f32.vlgmr.msra.gmra.mxu0 %vm437_vm3, %v6991_v20  ;;  %v1386_v11 = vmul.f32 %v8471_v21, %v1357_v25  ;;  %v7007_v25 = vld [vmem:[%s9588_s3 + $0x18] sm:$0xf] }
 0x277   :  { %v1384_v56 = vmul.f32 %v8462_v12, %v1359_v28  ;;  %v1387_v30 = vmul.f32 %v8465_v16, %v1360_v29  ;;  %1337 = vmatprep.mubr.f32.mxu1 %v9602_v0  ;;  %1469 = vmatprep.mubr.f32.mxu0 %v9602_v0  ;;  %v1560_v53 = vsel %vm1559_vm8, %v8405_v34, %v1558_v58 }
 0x278   :  { %6997 = vmatmul.mubr.msk.f32.vlgmr.msra.gmra.mxu1 %vm437_vm3, %v6991_v20  ;;  %v8539_v20 = vrot.slane %v7014_v57, %v8246_v13  ;;  %v1589_v26 = vmul.f32 %v8521_v52, %v1560_v53  ;;  %v8555_v29 = vrot.slane %v7014_v57, %v8255_v17 }
 0x279   :  { %7003 = vmatprep.subr.msk.mxu1 %vm295_vm1, %v1387_v30  ;;  %v1554_v44 = vpop.permute.xlu1 %1553  ;;  %7001 = vmatpush1.msk.msra.mxu0 %vm295_vm1, %v1384_v56  ;;  %v8558_v56 = vrot.slane %v7014_v57, %v8258_v18  ;;  %v8562_v30 = vrot.slane %v7014_v57, %v8261_v19 }
 0x27a   :  { %v1561_v37 = vsel %vm1559_vm8, %v1554_v44, %v8405_v34  ;;  %7002 = vmatmul.mubr.msk.f32.vlgmr.msra.gmra.mxu0 %vm437_vm3, %v6999_v38  ;;  %7004 = vmatpush1.msk.msra.mxu1 %vm295_vm1, %v1386_v11  ;;  %9658 = vst [vmem:[#allocation43_spill] sm:$0xff] %v8539_v20  ;;  %9659 = vst [vmem:[#allocation44_spill] sm:$0xff] %v8555_v29  ;;  %v1763_v11 = vsel %vm1762_vm9, %v1759_v42, %v1761_v59 }
 0x27b   :  { %v1588_v49 = vmul.f32 %v8495_v35, %v1561_v37  ;;  %1540 = vmatprep.mubr.f32.mxu1 %v9602_v0  ;;  %1672 = vmatprep.mubr.f32.mxu0 %v9602_v0  ;;  %9660 = vst [vmem:[#allocation45_spill] sm:$0xff] %v8558_v56  ;;  %9661 = vst [vmem:[#allocation46_spill] sm:$0xff] %v8562_v30  ;;  %v7022_v37 = vld [vmem:[%s9589_s4 + $0x20] sm:$0xf] }
 0x27c   :  { %7005 = vmatmul.mubr.msk.f32.vlgmr.msra.gmra.mxu1 %vm437_vm3, %v6999_v38  ;;  %v1962_v38 = vpop.permute.xlu0 %1961 }
 0x27d   :  { %v1552_v54 = vpop.permute.xlu1 %1551  ;;  %7008 = vmatprep.subr.msk.mxu0 %vm295_vm1, %v1588_v49  ;;  %1743 = vmatprep.mubr.f32.mxu1 %v9602_v0 }
 0x27e   :  { %v1562_v3 = vsel %vm1559_vm8, %v1552_v54, %v1554_v44  ;;  %v1563_v6 = vsel %vm1559_vm8, %v1558_v58, %v1552_v54 }
 0x27f   :  { %v1587_v10 = vmul.f32 %v8514_v50, %v1562_v3  ;;  %v1590_v34 = vmul.f32 %v8517_v43, %v1563_v6  ;;  %v8578_v3 = vrot.slane %v7022_v37, %v8246_v13  ;;  %v1792_v6 = vmul.f32 %v8562_v30, %v1763_v11 }
 0x281   :  { %7011 = vmatprep.subr.msk.mxu1 %vm295_vm1, %v1590_v34  ;;  %v1757_v27 = vpop.permute.xlu1 %1756  ;;  %7009 = vmatpush1.msk.msra.mxu0 %vm295_vm1, %v1587_v10  ;;  %9662 = vst [vmem:[#allocation47_spill] sm:$0xff] %v8578_v3 }
 0x282   :  { %v1764_v58 = vsel %vm1762_vm9, %v1757_v27, %v1759_v42  ;;  %7010 = vmatmul.mubr.msk.f32.vlgmr.msra.gmra.mxu0 %vm437_vm3, %v7007_v25  ;;  %7012 = vmatpush1.msk.msra.mxu1 %vm295_vm1, %v1589_v26  ;;  %v7015_v42 = vld [vmem:[%s9588_s3 + $0x1c] sm:$0xf]  ;;  %v8597_v26 = vrot.slane %v7022_v37, %v8258_v18 }
 0x283   :  { %v1791_v28 = vmul.f32 %v8539_v20, %v1764_v58  ;;  %7013 = vmatmul.mubr.msk.f32.vlgmr.msra.gmra.mxu1 %vm437_vm3, %v7007_v25  ;;  %1875 = vmatprep.mubr.f32.mxu0 %v9602_v0  ;;  %v8594_v25 = vrot.slane %v7022_v37, %v8255_v17 }
 0x284   :  { %1946 = vmatprep.mubr.f32.mxu1 %v9602_v0  ;;  %9664 = vst [vmem:[#allocation49_spill] sm:$0xff] %v8597_v26 }
 0x285   :  { %v1755_v44 = vpop.permute.xlu1 %1754  ;;  %7016 = vmatprep.subr.msk.mxu0 %vm295_vm1, %v1791_v28  ;;  %9663 = vst [vmem:[#allocation48_spill] sm:$0xff] %v8594_v25 }
 0x286   :  { %v1765_v49 = vsel %vm1762_vm9, %v1755_v44, %v1757_v27  ;;  %v1766_v53 = vsel %vm1762_vm9, %v1761_v59, %v1755_v44  ;;  %v1964_v59 = vpop.permute.xlu0 %1963  ;;  %v8601_v27 = vrot.slane %v7022_v37, %v8261_v19  ;;  %v7023_v19 = vld [vmem:[%s9588_s3 + $0x20] sm:$0xf] }
 0x287   :  { %v1790_v54 = vmul.f32 %v8555_v29, %v1765_v49  ;;  %v1793_v57 = vmul.f32 %v8558_v56, %v1766_v53  ;;  %v1966_v58 = vsel %vm1965_vm10, %v1962_v38, %v1964_v59  ;;  %v2175_v49 = vld [vmem:[#allocation8 + $0x78] sm:$0xff] }
 0x288   :  { %9665 = vst [vmem:[#allocation50_spill] sm:$0xff] %v8601_v27  ;;  %v1995_v37 = vmul.f32 %v8601_v27, %v1966_v58  ;;  %v2223_v53 = vld [vmem:[#allocation8 + $0x1f8] sm:$0xff]  ;;  %v2188_v58 = vld [vmem:[#allocation8 + $0xe0] sm:$0xff] }
 0x289   :  { %7019 = vmatprep.subr.msk.mxu1 %vm295_vm1, %v1793_v57  ;;  %v1960_v10 = vpop.permute.xlu1 %1959  ;;  %7017 = vmatpush1.msk.msra.mxu0 %vm295_vm1, %v1790_v54  ;;  %v2190_v54 = vld [vmem:[#allocation8 + $0xf0] sm:$0xff]  ;;  %v2207_v57 = vld [vmem:[#allocation8 + $0x178] sm:$0xff] }
 0x28a   :  { %v1967_v34 = vsel %vm1965_vm10, %v1960_v10, %v1962_v38  ;;  %7018 = vmatmul.mubr.msk.f32.vlgmr.msra.gmra.mxu0 %vm437_vm3, %v7015_v42  ;;  %7020 = vmatpush1.msk.msra.mxu1 %vm295_vm1, %v1792_v6  ;;  %v2191_v38 = vld [vmem:[#allocation8 + $0xf8] sm:$0xff]  ;;  %v2222_v6 = vld [vmem:[#allocation8 + $0x1f0] sm:$0xff] }
 0x28b   :  { %v1994_v13 = vmul.f32 %v8578_v3, %v1967_v34  ;;  %7021 = vmatmul.mubr.msk.f32.vlgmr.msra.gmra.mxu1 %vm437_vm3, %v7015_v42  ;;  %2078 = vmatprep.mubr.f32.mxu0 %v9602_v0  ;;  %v2174_v42 = vld [vmem:[#allocation8 + $0x70] sm:$0xff]  ;;  %v2173_v34 = vld [vmem:[#allocation8 + $0x68] sm:$0xff] }
 0x28c   :  { %2149 = vmatprep.mubr.f32.mxu1 %v9602_v0 }
 0x28d   :  { %v1958_v28 = vpop.permute.xlu1 %1957  ;;  %7024 = vmatprep.subr.msk.mxu0 %vm295_vm1, %v1994_v13  ;;  %v2221_v13 = vld [vmem:[#allocation8 + $0x1e8] sm:$0xff] }
 0x28e   :  { %v1968_v17 = vsel %vm1965_vm10, %v1958_v28, %v1960_v10  ;;  %v1969_v18 = vsel %vm1965_vm10, %v1964_v59, %v1958_v28  ;;  %v2189_v10 = vld [vmem:[#allocation8 + $0xe8] sm:$0xff]  ;;  %v2206_v59 = vld [vmem:[#allocation8 + $0x170] sm:$0xff] }
 0x28f   :  { %v1993_v11 = vmul.f32 %v8594_v25, %v1968_v17  ;;  %v1996_v44 = vmul.f32 %v8597_v26, %v1969_v18  ;;  %v2205_v28 = vld [vmem:[#allocation8 + $0x168] sm:$0xff]  ;;  %v2172_v17 = vld [vmem:[#allocation8 + $0x60] sm:$0xff] }
 0x290   :  { %v2220_v18 = vld [vmem:[#allocation8 + $0x1e0] sm:$0xff] }
 0x291   :  { %7025 = vmatpush1.msk.msra.mxu0 %vm295_vm1, %v1993_v11  ;;  %7027 = vmatprep.subr.msk.mxu1 %vm295_vm1, %v1996_v44  ;;  %v2187_v11 = vld [vmem:[#allocation8 + $0xd8] sm:$0xff]  ;;  %v2204_v44 = vld [vmem:[#allocation8 + $0x160] sm:$0xff] }
 0x292   :  { %7026 = vmatmul.mubr.msk.f32.vlgmr.msra.gmra.mxu0 %vm437_vm3, %v7023_v19  ;;  %7028 = vmatpush1.msk.msra.mxu1 %vm295_vm1, %v1995_v37  ;;  %v2219_v37 = vld [vmem:[#allocation8 + $0x1d8] sm:$0xff] }
 0x293   :  { %7029 = vmatmul.mubr.msk.f32.vlgmr.msra.gmra.mxu1 %vm437_vm3, %v7023_v19  ;;  %7234 = vmatprep.subr.mxu0 %v2191_v38  ;;  %v2171_v19 = vld [vmem:[#allocation8 + $0x58] sm:$0xff]  ;;  %v2186_v38 = vld [vmem:[#allocation8 + $0xd0] sm:$0xff] }
 0x294   :  { %7235 = vmatpush3.msra.mxu0 %v2175_v49  ;;  %7269 = vmatprep.subr.mxu1 %v2223_v53  ;;  %v2203_v49 = vld [vmem:[#allocation8 + $0x158] sm:$0xff]  ;;  %v2170_v53 = vld [vmem:[#allocation8 + $0x50] sm:$0xff] }
 0x295   :  { %7236 = vmatprep.subr.mxu0 %v2190_v54  ;;  %7270 = vmatpush3.msra.mxu1 %v2207_v57  ;;  %v2218_v54 = vld [vmem:[#allocation8 + $0x1d0] sm:$0xff]  ;;  %v2185_v57 = vld [vmem:[#allocation8 + $0xc8] sm:$0xff] }
 0x296   :  { %7237 = vmatpush3.msra.mxu0 %v2174_v42  ;;  %7271 = vmatprep.subr.mxu1 %v2222_v6  ;;  %v2202_v42 = vld [vmem:[#allocation8 + $0x150] sm:$0xff]  ;;  %v2169_v6 = vld [vmem:[#allocation8 + $0x48] sm:$0xff] }
 0x297   :  { %7238 = vmatprep.subr.mxu0 %v2189_v10  ;;  %7272 = vmatpush3.msra.mxu1 %v2206_v59  ;;  %v2217_v10 = vld [vmem:[#allocation8 + $0x1c8] sm:$0xff]  ;;  %v2184_v59 = vld [vmem:[#allocation8 + $0xc0] sm:$0xff] }
 0x298   :  { %7239 = vmatpush3.msra.mxu0 %v2173_v34  ;;  %7273 = vmatprep.subr.mxu1 %v2221_v13  ;;  %v2201_v34 = vld [vmem:[#allocation8 + $0x148] sm:$0xff]  ;;  %v2168_v13 = vld [vmem:[#allocation8 + $0x40] sm:$0xff] }
 0x299   :  { %7240 = vmatprep.subr.mxu0 %v2188_v58  ;;  %7274 = vmatpush3.msra.mxu1 %v2205_v28  ;;  %v2216_v58 = vld [vmem:[#allocation8 + $0x1c0] sm:$0xff]  ;;  %v2183_v28 = vld [vmem:[#allocation8 + $0xb8] sm:$0xff] }
 0x29a   :  { %7241 = vmatpush3.msra.mxu0 %v2172_v17  ;;  %7275 = vmatprep.subr.mxu1 %v2220_v18  ;;  %v2200_v17 = vld [vmem:[#allocation8 + $0x140] sm:$0xff]  ;;  %v2167_v18 = vld [vmem:[#allocation8 + $0x38] sm:$0xff] }
 0x29b   :  { %7242 = vmatprep.subr.mxu0 %v2187_v11  ;;  %7276 = vmatpush3.msra.mxu1 %v2204_v44  ;;  %v2215_v11 = vld [vmem:[#allocation8 + $0x1b8] sm:$0xff]  ;;  %v2182_v44 = vld [vmem:[#allocation8 + $0xb0] sm:$0xff] }
 0x29c   :  { %7243 = vmatpush3.msra.mxu0 %v2171_v19  ;;  %7277 = vmatprep.subr.mxu1 %v2219_v37  ;;  %v2199_v19 = vld [vmem:[#allocation8 + $0x138] sm:$0xff]  ;;  %v2166_v37 = vld [vmem:[#allocation8 + $0x30] sm:$0xff] }
 0x29d   :  { %7244 = vmatprep.subr.mxu0 %v2186_v38  ;;  %7278 = vmatpush3.msra.mxu1 %v2203_v49  ;;  %v2214_v38 = vld [vmem:[#allocation8 + $0x1b0] sm:$0xff]  ;;  %v2181_v49 = vld [vmem:[#allocation8 + $0xa8] sm:$0xff] }
 0x29e   :  { %7245 = vmatpush3.msra.mxu0 %v2170_v53  ;;  %7279 = vmatprep.subr.mxu1 %v2218_v54  ;;  %v2198_v53 = vld [vmem:[#allocation8 + $0x130] sm:$0xff]  ;;  %v2165_v54 = vld [vmem:[#allocation8 + $0x28] sm:$0xff] }
 0x29f   :  { %7246 = vmatprep.subr.mxu0 %v2185_v57  ;;  %7280 = vmatpush3.msra.mxu1 %v2202_v42  ;;  %v2213_v57 = vld [vmem:[#allocation8 + $0x1a8] sm:$0xff]  ;;  %v2180_v42 = vld [vmem:[#allocation8 + $0xa0] sm:$0xff] }
 0x2a0   :  { %7247 = vmatpush3.msra.mxu0 %v2169_v6  ;;  %7281 = vmatprep.subr.mxu1 %v2217_v10  ;;  %v2197_v6 = vld [vmem:[#allocation8 + $0x128] sm:$0xff]  ;;  %v2164_v10 = vld [vmem:[#allocation8 + $0x20] sm:$0xff] }
 0x2a1   :  { %7248 = vmatprep.subr.mxu0 %v2184_v59  ;;  %7282 = vmatpush3.msra.mxu1 %v2201_v34  ;;  %v2212_v59 = vld [vmem:[#allocation8 + $0x1a0] sm:$0xff]  ;;  %v2179_v34 = vld [vmem:[#allocation8 + $0x98] sm:$0xff] }
 0x2a2   :  { %7249 = vmatpush3.msra.mxu0 %v2168_v13  ;;  %7283 = vmatprep.subr.mxu1 %v2216_v58  ;;  %v2196_v13 = vld [vmem:[#allocation8 + $0x120] sm:$0xff]  ;;  %v2163_v58 = vld [vmem:[#allocation8 + $0x18] sm:$0xff] }
 0x2a3   :  { %7250 = vmatprep.subr.mxu0 %v2183_v28  ;;  %7284 = vmatpush3.msra.mxu1 %v2200_v17  ;;  %v2211_v28 = vld [vmem:[#allocation8 + $0x198] sm:$0xff]  ;;  %v2178_v17 = vld [vmem:[#allocation8 + $0x90] sm:$0xff] }
 0x2a4   :  { %7251 = vmatpush3.msra.mxu0 %v2167_v18  ;;  %7285 = vmatprep.subr.mxu1 %v2215_v11  ;;  %v2195_v18 = vld [vmem:[#allocation8 + $0x118] sm:$0xff]  ;;  %v2162_v11 = vld [vmem:[#allocation8 + $0x10] sm:$0xff] }
 0x2a5   :  { %7252 = vmatprep.subr.mxu0 %v2182_v44  ;;  %7286 = vmatpush3.msra.mxu1 %v2199_v19  ;;  %v2210_v44 = vld [vmem:[#allocation8 + $0x190] sm:$0xff]  ;;  %v2177_v19 = vld [vmem:[#allocation8 + $0x88] sm:$0xff] }
 0x2a6   :  { %7253 = vmatpush3.msra.mxu0 %v2166_v37  ;;  %7287 = vmatprep.subr.mxu1 %v2214_v38  ;;  %v2194_v37 = vld [vmem:[#allocation8 + $0x110] sm:$0xff]  ;;  %v2161_v38 = vld [vmem:[#allocation8 + $0x8] sm:$0xff] }
 0x2a7   :  { %7254 = vmatprep.subr.mxu0 %v2181_v49  ;;  %7288 = vmatpush3.msra.mxu1 %v2198_v53  ;;  %v2209_v49 = vld [vmem:[#allocation8 + $0x188] sm:$0xff]  ;;  %v2176_v53 = vld [vmem:[#allocation8 + $0x80] sm:$0xff] }
 0x2a8   :  { %7255 = vmatpush3.msra.mxu0 %v2165_v54  ;;  %7289 = vmatprep.subr.mxu1 %v2213_v57  ;;  %v2193_v54 = vld [vmem:[#allocation8 + $0x108] sm:$0xff]  ;;  %v2160_v57 = vld [vmem:[#allocation8] sm:$0xff] }
 0x2a9   :  { %7256 = vmatprep.subr.mxu0 %v2180_v42  ;;  %7290 = vmatpush3.msra.mxu1 %v2197_v6  ;;  %v2208_v42 = vld [vmem:[#allocation8 + $0x180] sm:$0xff] }
 0x2aa   :  { %7257 = vmatpush3.msra.mxu0 %v2164_v10  ;;  %7291 = vmatprep.subr.mxu1 %v2212_v59  ;;  %v2192_v6 = vld [vmem:[#allocation8 + $0x100] sm:$0xff]  ;;  %v8035_v10 = vmov 3  }
 0x2ab   :  { %7258 = vmatprep.subr.mxu0 %v2179_v34  ;;  %7292 = vmatpush3.msra.mxu1 %v2196_v13 }
 0x2ac   :  { %7259 = vmatpush3.msra.mxu0 %v2163_v58  ;;  %7293 = vmatprep.subr.mxu1 %v2211_v28 }
 0x2ad   :  { %7260 = vmatprep.subr.mxu0 %v2178_v17  ;;  %7294 = vmatpush3.msra.mxu1 %v2195_v18 }
 0x2ae   :  { %7261 = vmatpush3.msra.mxu0 %v2162_v11  ;;  %7295 = vmatprep.subr.mxu1 %v2210_v44 }
 0x2af   :  { %7262 = vmatprep.subr.mxu0 %v2177_v19  ;;  %7296 = vmatpush3.msra.mxu1 %v2194_v37 }
 0x2b0   :  { %7263 = vmatpush3.msra.mxu0 %v2161_v38  ;;  %7297 = vmatprep.subr.mxu1 %v2209_v49 }
 0x2b1   :  { %7264 = vmatprep.subr.mxu0 %v2176_v53  ;;  %7298 = vmatpush3.msra.mxu1 %v2193_v54 }
 0x2b2   :  { %7265 = vmatpush3.msra.mxu0 %v2160_v57  ;;  %7299 = vmatprep.subr.mxu1 %v2208_v42 }
 0x2b3   :  { %7300 = vmatpush3.msra.mxu1 %v2192_v6  ;;  %7432 = vmatprep.subr.mxu0 %v9602_v0 }
 0x2b4   :  { %7726 = vset.pattern.permute.xlu1 %v8035_v10  ;;  %7437 = vmatprep.subr.mxu1 %v9602_v0 }
 0x2b5   :  { %2225 = vperm.xlu1 %7726, %v8151_v8  }
 0x312   :  { %v519_v59 = vpop.f32.mrf.mxu0 }
 0x313   :  { %v590_v34 = vpop.f32.mrf.mxu1 }
 0x314   :  { %v521_v13 = vpop.f32.mrf.mxu0 }
 0x315   :  { %v592_v58 = vpop.f32.mrf.mxu1 }
 0x31e   :  { %v676_v28 = vpop.f32.mrf.mxu0 }
 0x31f   :  { %v677_v1 = vadd.f32 %v676_v28, %v519_v59 }
 0x320   :  { %v678_v18 = vpop.f32.mrf.mxu0 }
 0x321   :  { %v679_v25 = vadd.f32 %v678_v18, %v521_v13 }
 0x323   :  { %v747_v17 = vpop.f32.mrf.mxu1 }
 0x324   :  { %v748_v27 = vadd.f32 %v747_v17, %v590_v34 }
 0x325   :  { %v749_v11 = vpop.f32.mrf.mxu1 }
 0x326   :  { %v750_v0 = vadd.f32 %v749_v11, %v592_v58 }
 0x32a   :  { %v875_v44 = vpop.f32.mrf.mxu0 }
 0x32b   :  { %v946_v19 = vpop.f32.mrf.mxu1  ;;  %v951_v56 = vadd.f32 %v875_v44, %v677_v1 }
 0x32c   :  { %v877_v37 = vpop.f32.mrf.mxu0  ;;  %v953_v20 = vadd.f32 %v946_v19, %v748_v27 }
 0x32d   :  { %v948_v38 = vpop.f32.mrf.mxu1  ;;  %v952_v43 = vadd.f32 %v877_v37, %v679_v25 }
 0x32e   :  { %v954_v30 = vadd.f32 %v948_v38, %v750_v0 }
 0x332   :  { %v1078_v49 = vpop.f32.mrf.mxu0 }
 0x333   :  { %v1149_v53 = vpop.f32.mrf.mxu1  ;;  %v1154_v16 = vadd.f32 %v1078_v49, %v951_v56 }
 0x334   :  { %v1080_v54 = vpop.f32.mrf.mxu0  ;;  %v1156_v12 = vadd.f32 %v1149_v53, %v953_v20 }
 0x335   :  { %v1151_v57 = vpop.f32.mrf.mxu1  ;;  %v1155_v51 = vadd.f32 %v1080_v54, %v952_v43 }
 0x336   :  { %v1268_v42 = vpop.f32.mrf.mxu0  ;;  %v1157_v21 = vadd.f32 %v1151_v57, %v954_v30 }
 0x337   :  { %v1344_v59 = vadd.f32 %v1268_v42, %v1154_v16 }
 0x338   :  { %v1339_v6 = vpop.f32.mrf.mxu1  ;;  %v1270_v10 = vpop.f32.mrf.mxu0 }
 0x339   :  { %v1346_v34 = vadd.f32 %v1339_v6, %v1156_v12  ;;  %v1345_v13 = vadd.f32 %v1270_v10, %v1155_v51 }
 0x33a   :  { %v1341_v8 = vpop.f32.mrf.mxu1  ;;  %v1471_v26 = vpop.f32.mrf.mxu0 }
 0x33b   :  { %v1347_v58 = vadd.f32 %v1341_v8, %v1157_v21  ;;  %v1547_v0 = vadd.f32 %v1471_v26, %v1344_v59 }
 0x33c   :  { %v1542_v3 = vpop.f32.mrf.mxu1  ;;  %v1473_v29 = vpop.f32.mrf.mxu0 }
 0x33d   :  { %v1548_v1 = vadd.f32 %v1473_v29, %v1345_v13  ;;  %v1549_v25 = vadd.f32 %v1542_v3, %v1346_v34  ;;  %v2226_v3 = vpop.permute.xlu1 %2225  ;;  %v9666_v34 = vmov 0.0  }
 0x33e   :  { %v1544_v52 = vpop.f32.mrf.mxu1 }
 0x33f   :  { %v1550_v18 = vadd.f32 %v1544_v52, %v1347_v58 }
 0x342   :  { %v1674_v50 = vpop.f32.mrf.mxu0 }
 0x343   :  { %v1745_v35 = vpop.f32.mrf.mxu1  ;;  %v1750_v19 = vadd.f32 %v1674_v50, %v1547_v0 }
 0x344   :  { %v1676_v48 = vpop.f32.mrf.mxu0  ;;  %v1752_v20 = vadd.f32 %v1745_v35, %v1549_v25 }
 0x345   :  { %v1747_v45 = vpop.f32.mrf.mxu1  ;;  %v1751_v11 = vadd.f32 %v1676_v48, %v1548_v1  ;;  %v8036_v48 = vmov 4  }
 0x346   :  { %v1753_v56 = vadd.f32 %v1747_v45, %v1550_v18  ;;  %7727 = vset.pattern.permute.xlu0 %v8036_v48  ;;  %v8037_v45 = vmov 5   ;;  %v7043_v48 = vld [vmem:[#allocation10 + $0x2] ss:$0 sm:$0xff] }
 0x347   :  { %7728 = vset.pattern.permute.xlu1 %v8037_v45  ;;  %v7031_v45 = vld [vmem:[%s9591_s6 + $0xc] sm:$0xf] }
 0x34a   :  { %v1877_v28 = vpop.f32.mrf.mxu0 }
 0x34b   :  { %v1948_v17 = vpop.f32.mrf.mxu1  ;;  %v1953_v38 = vadd.f32 %v1877_v28, %v1750_v19  ;;  %v7839_v28 = vld [vmem:[#allocation7] sm:$0xf] }
 0x34c   :  { %v1879_v27 = vpop.f32.mrf.mxu0  ;;  %v1955_v49 = vadd.f32 %v1948_v17, %v1752_v20 }
 0x34d   :  { %v1950_v44 = vpop.f32.mrf.mxu1  ;;  %v1954_v43 = vadd.f32 %v1879_v27, %v1751_v11 }
 0x34e   :  { %v1956_v16 = vadd.f32 %v1950_v44, %v1753_v56 }
 0x352   :  { %v2080_v30 = vpop.f32.mrf.mxu0 }
 0x353   :  { %v2151_v37 = vpop.f32.mrf.mxu1  ;;  %v2156_v53 = vadd.f32 %v2080_v30, %v1953_v38  ;;  %v7032_v38 = vld [vmem:[#allocation10 + $0x1] ss:$0 sm:$0xff] }
 0x354   :  { %v2082_v21 = vpop.f32.mrf.mxu0  ;;  %v2158_v26 = vadd.f32 %v2151_v37, %v1955_v49  ;;  %v7033_v49 = vld [vmem:[%s9591_s6 + $0x4] sm:$0xf] }
 0x355   :  { %v2157_v12 = vadd.f32 %v2082_v21, %v1954_v43  ;;  %v2153_v51 = vpop.f32.mrf.mxu1 }
 0x356   :  { %v2159_v29 = vadd.f32 %v2153_v51, %v1956_v16  ;;  %v7030_v51 = vld [vmem:[#allocation10] ss:$0 sm:$0xff] }
 0x357   :  { %2292 = vmatprep.mubr.f32.mxu0 %v2157_v12  ;;  %v7036_v12 = vld [vmem:[%s9591_s6 + $0x10] sm:$0xf] }
 0x358   :  { %2293 = vmatmul.mubr.f32.vlgmr.msra.gmra.mxu0 %v2156_v53  ;;  %2362 = vmatprep.mubr.f32.mxu1 %v2159_v29 }
 0x359   :  { %2363 = vmatmul.mubr.f32.vlgmr.msra.gmra.mxu1 %v2158_v26  ;;  %7434 = vmatprep.mubr.msk.f32.mxu0 %vm8038_vm11, %v9666_v34  ;;  %v2405_v26 = vld [vmem:[%s9591_s6] sm:$0xf] }
 0x35a   :  { %7439 = vmatprep.mubr.msk.f32.mxu1 %vm8038_vm11, %v9666_v34 }
 0x418   :  { %v7266_v35 = vpop.f32.mrf.mxu0 }
 0x419   :  { %v7301_v50 = vpop.f32.mrf.mxu1 }
 0x41a   :  { %v7267_v52 = vpop.f32.mrf.mxu0 }
 0x41b   :  { %v7268_v54 = vadd.f32 %v7267_v52, %v7266_v35  ;;  %v7302_v57 = vpop.f32.mrf.mxu1  ;;  %v7044_v52 = vld [vmem:[%s9591_s6 + $0x8] sm:$0xf] }
 0x41c   :  { %v7303_v42 = vadd.f32 %v7302_v57, %v7301_v50 }
 0x41d   :  { %v2295_v6 = vadd.f32 %v7268_v54, %v2226_v3  ;;  %v7047_v3 = vld [vmem:[%s9591_s6 + $0x14] sm:$0xf] }
 0x41f   :  { %v2365_v10 = vadd.f32 %v7303_v42, %v2295_v6 }
 0x421   :  { %v2368_v8 = vsel %vm295_vm1, %v2365_v10, 0.0  ;;  %v2372_v59 = vmul.f32 %v2365_v10, %v2365_v10 }
 0x422   :  { %2369 = vadd.xlane.f32.xlu0 %v2368_v8 }
 0x423   :  { %v2373_v58 = vsel %vm295_vm1, %v2372_v59, 0.0 }
 0x424   :  { %2374 = vadd.xlane.f32.xlu1 %v2373_v58 }
 0x435   :  { %2390 = vperm.xlu1 %7728, %v7839_v28  }
 0x438   :  { %2385 = vperm.xlu0 %7727, %v7839_v28  }
 0x4ab   :  { %v2370_v13 = vpop.xlane.xlu0 %2369 }
 0x4ac   :  { %v2371_v17 = vmul.f32 0.0078125, %v2370_v13 }
 0x4ad   :  { %v2375_v1 = vpop.xlane.xlu1 %2374 }
 0x4ae   :  { %v2377_v0 = vmul.f32 %v2371_v17, %v2371_v17  ;;  %v2376_v18 = vmul.f32 0.0078125, %v2375_v1  ;;  %v2380_v44 = vsub.f32 %v2365_v10, %v2371_v17 }
 0x4b0   :  { %v2378_v27 = vsub.f32 %v2376_v18, %v2377_v0 }
 0x4b1   :  { %v2391_v20 = vpop.permute.xlu1 %2390 }
 0x4b2   :  { %v2379_v25 = vmax.f32 %v2378_v27, 0.0 }
 0x4b3   :  { %v2386_v56 = vpop.permute.xlu0 %2385 }
 0x4b4   :  { %v2381_v11 = vadd.f32 1e-05, %v2379_v25 }
 0x4b6   :  { %7737 = vrsqrt.f32 %v2381_v11 }
 0x4c3   :  { %v7738_v19 = vpop.eup %7737 }
 0x4c4   :  { %v2383_v30 = vmul.f32 %v7738_v19, %v2380_v44 }
 0x4c6   :  { %v2388_v43 = vmul.f32 %v2386_v56, %v2383_v30 }
 0x4c8   :  { %v2393_v37 = vadd.f32 %v2391_v20, %v2388_v43 }
 0x4ca   :  { %v8631_v16 = vmax.f32 %v2393_v37, 0.0 }
 0x4cc   :  { %2395 = vrot.lane.b32.xlu1 %v8631_v16, %s8023_s28  ;;  %v2416_v21 = vmul.f32 %v7032_v38, %v8631_v16 }
 0x4ce   :  { %7433 = vmatpush3.msk.msra.mxu0 %vm295_vm1, %v2416_v21  ;;  %7438 = vmatpush3.msk.msra.mxu1 %vm295_vm1, %v2416_v21 }
 0x4cf   :  { %7435 = vmatmul.mubr.msk.f32.vlgmr.msra.gmra.mxu0 %vm437_vm3, %v7033_v49  ;;  %7442 = vmatprep.subr.mxu0 %v9666_v34 }
 0x4d0   :  { %2719 = vrot.lane.b32.xlu1 %v8631_v16, %s8031_s20  ;;  %7447 = vmatprep.subr.mxu1 %v9666_v34 }
 0x4d1   :  { %7440 = vmatmul.mubr.msk.f32.vlgmr.msra.gmra.mxu1 %vm437_vm3, %v7036_v12  ;;  %7444 = vmatprep.mubr.msk.f32.mxu0 %vm8038_vm11, %v9666_v34 }
 0x4d2   :  { %7449 = vmatprep.mubr.msk.f32.mxu1 %vm8038_vm11, %v9666_v34 }
 0x53e   :  { %v2396_v53 = vpop.permute.xlu1 %2395 }
 0x53f   :  { %v2404_v29 = vmul.f32 %v7030_v51, %v2396_v53 }
 0x541   :  { %7443 = vmatpush3.msk.msra.mxu0 %vm295_vm1, %v2404_v29  ;;  %7448 = vmatpush3.msk.msra.mxu1 %vm295_vm1, %v2404_v29 }
 0x542   :  { %v2720_v35 = vpop.permute.xlu1 %2719  ;;  %7445 = vmatmul.mubr.msk.f32.vlgmr.msra.gmra.mxu0 %vm437_vm3, %v2405_v26  ;;  %7452 = vmatprep.subr.mxu0 %v9666_v34 }
 0x543   :  { %v2729_v50 = vmul.f32 %v7043_v48, %v2720_v35  ;;  %7457 = vmatprep.subr.mxu1 %v9666_v34  ;;  %7450 = vmatmul.mubr.msk.f32.vlgmr.msra.gmra.mxu1 %vm437_vm3, %v7031_v45 }
 0x544   :  { %7454 = vmatprep.mubr.msk.f32.mxu0 %vm8038_vm11, %v9666_v34  ;;  %7459 = vmatprep.mubr.msk.f32.mxu1 %vm8038_vm11, %v9666_v34 }
 0x545   :  { %7453 = vmatpush3.msk.msra.mxu0 %vm295_vm1, %v2729_v50  ;;  %7458 = vmatpush3.msk.msra.mxu1 %vm295_vm1, %v2729_v50 }
 0x546   :  { %7455 = vmatmul.mubr.msk.f32.vlgmr.msra.gmra.mxu0 %vm437_vm3, %v7044_v52 }
 0x547   :  { %7460 = vmatmul.mubr.msk.f32.vlgmr.msra.gmra.mxu1 %vm437_vm3, %v7047_v3 }
 0x58f   :  { %v2491_v54 = vpop.f32.mrf.mxu0 }
 0x591   :  { %v7436_v57 = vpop.f32.mrf.mxu0  ;;  %v2566_v42 = vpop.f32.mrf.mxu1 }
 0x593   :  { %v7441_v6 = vpop.f32.mrf.mxu1 }
 0x602   :  { %v2642_v10 = vpop.f32.mrf.mxu0 }
 0x603   :  { %v2715_v8 = vpop.f32.mrf.mxu1  ;;  %v2643_v28 = vadd.f32 %v2642_v10, %v2491_v54 }
 0x604   :  { %v7446_v59 = vpop.f32.mrf.mxu0  ;;  %v2716_v58 = vadd.f32 %v2715_v8, %v2566_v42 }
 0x605   :  { %v7451_v13 = vpop.f32.mrf.mxu1 }
 0x606   :  { %v2804_v17 = vpop.f32.mrf.mxu0 }
 0x607   :  { %v8680_v1 = vadd.f32 %v2804_v17, %v2643_v28  ;;  %v2879_v0 = vpop.f32.mrf.mxu1 }
 0x608   :  { %v7456_v18 = vpop.f32.mrf.mxu0  ;;  %v2884_v27 = vadd.f32 %v2879_v0, %v2716_v58 }
 0x609   :  { %v2885_v25 = vand.u32 2147483647, %v8680_v1  ;;  %v7461_v11 = vpop.f32.mrf.mxu1 }
 0x60a   :  { %v8683_v44 = vand.u32 2147483647, %v2884_v27 }
 0x60b   :  { %2920 = vxpose.xlu1.b32.start.end [1/1] (short) (narrow) %v2885_v25, 64 }
 0x60c   :  { %7462 = vmatprep.subr.msk.mxu0 %vm295_vm1, %v8683_v44 }
 0x60d   :  { %7463 = vmatpush3.msk.msra.mxu0 %vm295_vm1, %v8683_v44 }
 0x60e   :  { %7504 = vmatprep.subr.mxu0 %v9666_v34 }
 0x687   :  { %v2936_v19 = vpop.trf.xlu1 }
 0x688   :  { %7464 = vmatprep.mubr.msk.f32.mxu0 %vm437_vm3, %v2936_v19 }
 0x68b   :  { %v2937_v56 = vpop.trf.xlu1 }
 0x68c   :  { %7465 = vmatmul.mubr.msk.f32.vlgmr.msra.gmra.mxu0 %vm437_vm3, %v2937_v56 }
 0x68f   :  { %v2938_v30 = vpop.trf.xlu1 }
 0x690   :  { %7467 = vmatprep.mubr.msk.f32.mxu0 %vm437_vm3, %v2938_v30 }
 0x693   :  { %v2939_v20 = vpop.trf.xlu1 }
 0x694   :  { %7468 = vmatmul.mubr.msk.f32.gmra.mxu0 %vm437_vm3, %v2939_v20 }
 0x697   :  { %v2940_v43 = vpop.trf.xlu1 }
 0x698   :  { %7470 = vmatprep.mubr.msk.f32.mxu0 %vm437_vm3, %v2940_v43 }
 0x69b   :  { %v2941_v37 = vpop.trf.xlu1 }
 0x69c   :  { %7471 = vmatmul.mubr.msk.f32.gmra.mxu0 %vm437_vm3, %v2941_v37 }
 0x69f   :  { %v2942_v38 = vpop.trf.xlu1 }
 0x6a0   :  { %7473 = vmatprep.mubr.msk.f32.mxu0 %vm437_vm3, %v2942_v38 }
 0x6a3   :  { %v2943_v21 = vpop.trf.xlu1 }
 0x6a4   :  { %7474 = vmatmul.mubr.msk.f32.gmra.mxu0 %vm437_vm3, %v2943_v21 }
 0x6a5   :  { %7520 = vmatprep.mubr.msk.f32.mxu0 %vm8038_vm11, %v9666_v34 }
 0x74c   :  { %v7466_v49 = vpop.f32.mrf.mxu0 }
 0x74d   :  { %v3088_v42 = vsel %vm3084_vm12, %v7466_v49, -inf }
 0x74e   :  { %v3045_v12 = vpop.f32.mrf.mxu0 }
 0x74f   :  { %v3085_v6 = vsel %vm3084_vm12, %v3045_v12, -inf }
 0x754   :  { %v7469_v51 = vpop.f32.mrf.mxu0 }
 0x755   :  { %v3094_v54 = vsel %vm3084_vm12, %v7469_v51, -inf }
 0x756   :  { %v3055_v53 = vpop.f32.mrf.mxu0 }
 0x757   :  { %v3091_v57 = vsel %vm3084_vm12, %v3055_v53, -inf }
 0x75c   :  { %v7472_v29 = vpop.f32.mrf.mxu0 }
 0x75d   :  { %v3100_v52 = vsel %vm3084_vm12, %v7472_v29, -inf }
 0x75e   :  { %v3065_v26 = vpop.f32.mrf.mxu0 }
 0x75f   :  { %v3097_v3 = vsel %vm3084_vm12, %v3065_v26, -inf }
 0x764   :  { %v7475_v48 = vpop.f32.mrf.mxu0 }
 0x765   :  { %v3106_v45 = vsel %vm3084_vm12, %v7475_v48, -inf }
 0x766   :  { %3107 = vmax.xlane.f32.xlu0 %v3106_v45  ;;  %v3075_v35 = vpop.f32.mrf.mxu0 }
 0x767   :  { %v3103_v50 = vsel %vm3084_vm12, %v3075_v35, -inf }
 0x768   :  { %3104 = vmax.xlane.f32.xlu1 %v3103_v50 }
 0x76a   :  { %3101 = vmax.xlane.f32.xlu0 %v3100_v52 }
 0x76e   :  { %3098 = vmax.xlane.f32.xlu0 %v3097_v3 }
 0x772   :  { %3095 = vmax.xlane.f32.xlu0 %v3094_v54 }
 0x776   :  { %3092 = vmax.xlane.f32.xlu0 %v3091_v57 }
 0x77a   :  { %3089 = vmax.xlane.f32.xlu0 %v3088_v42 }
 0x77e   :  { %3086 = vmax.xlane.f32.xlu0 %v3085_v6 }
 0x7ef   :  { %v3108_v10 = vpop.xlane.xlu0 %3107 }
 0x7f0   :  { %v3116_v27 = vsub.f32 %v7475_v48, %v3108_v10 }
 0x7f1   :  { %v3105_v19 = vpop.xlane.xlu1 %3104 }
 0x7f2   :  { %v3131_v30 = vmul.f32 1.442695, %v3116_v27  ;;  %v3115_v20 = vsub.f32 %v3075_v35, %v3105_v19 }
 0x7f3   :  { %v3102_v8 = vpop.xlane.xlu0 %3101 }
 0x7f4   :  { %v3114_v58 = vsub.f32 %v7472_v29, %v3102_v8  ;;  %v3129_v37 = vmul.f32 1.442695, %v3115_v20 }
 0x7f6   :  { %v3127_v17 = vmul.f32 1.442695, %v3114_v58 }
 0x7f7   :  { %v3099_v59 = vpop.xlane.xlu0 %3098 }
 0x7f8   :  { %v3113_v0 = vsub.f32 %v3065_v26, %v3099_v59 }
 0x7fa   :  { %v3125_v11 = vmul.f32 1.442695, %v3113_v0 }
 0x7fb   :  { %v3096_v28 = vpop.xlane.xlu0 %3095 }
 0x7fc   :  { %v3112_v13 = vsub.f32 %v7469_v51, %v3096_v28 }
 0x7fe   :  { %v3123_v18 = vmul.f32 1.442695, %v3112_v13 }
 0x7ff   :  { %v3093_v56 = vpop.xlane.xlu0 %3092 }
 0x800   :  { %7739 = vpow2.f32 %v3123_v18  ;;  %v3111_v38 = vsub.f32 %v3055_v53, %v3093_v56  ;;  %v2893_v18 = vadd.s32 40, %v8238_v7 }
 0x801   :  { %7741 = vpow2.f32 %v3127_v17 }
 0x802   :  { %7743 = vpow2.f32 %v3125_v11  ;;  %v3121_v29 = vmul.f32 1.442695, %v3111_v38  ;;  %v2891_v11 = vadd.s32 24, %v8238_v7  ;;  %vm2901_vm13 = vcmp.eq.s32.totalorder %v2893_v18, %v8240_v9 }
 0x803   :  { %v3090_v43 = vpop.xlane.xlu0 %3089  ;;  %7745 = vpow2.f32 %v3131_v30  ;;  %v8735_v20 = vsel %vm2901_vm13, 1.0, %v9666_v34  ;;  %v2895_v38 = vadd.s32 56, %v8238_v7 }
 0x804   :  { %7747 = vpow2.f32 %v3129_v37  ;;  %v3110_v51 = vsub.f32 %v7466_v49, %v3090_v43  ;;  %vm2899_vm14 = vcmp.eq.s32.totalorder %v2891_v11, %v8240_v9 }
 0x805   :  { %7749 = vpow2.f32 %v3121_v29  ;;  %vm2903_vm15 = vcmp.eq.s32.totalorder %v2895_v38, %v8240_v9 }
 0x806   :  { %v3119_v48 = vmul.f32 1.442695, %v3110_v51  ;;  %v8739_v51 = vsel %vm2899_vm14, 1.0, %v9666_v34 }
 0x807   :  { %v3087_v50 = vpop.xlane.xlu0 %3086 }
 0x808   :  { %v3109_v52 = vsub.f32 %v3045_v12, %v3087_v50  ;;  %7751 = vpow2.f32 %v3119_v48 }
 0x80a   :  { %v3117_v54 = vmul.f32 1.442695, %v3109_v52  ;;  %v2892_v52 = vadd.s32 32, %v8238_v7 }
 0x80c   :  { %7753 = vpow2.f32 %v3117_v54  ;;  %v8753_v54 = vsel %vm2903_vm15, 1.0, %v9666_v34  ;;  %vm2900_vm13 = vcmp.eq.s32.totalorder %v2892_v52, %v8240_v9 }
 0x80d   :  { %v7740_v21 = vpop.eup %7739  ;;  %v8771_v11 = vsel %vm2900_vm13, 1.0, %v9666_v34 }
 0x80e   :  { %v3142_v26 = vsel %vm3084_vm12, %v7740_v21, 0.0  ;;  %v7742_v45 = vpop.eup %7741 }
 0x80f   :  { %3143 = vadd.xlane.f32.xlu0 %v3142_v26  ;;  %v3148_v3 = vsel %vm3084_vm12, %v7742_v45, 0.0  ;;  %v8712_v35 = vpop.eup %7743 }
 0x810   :  { %v3145_v53 = vsel %vm3084_vm12, %v8712_v35, 0.0  ;;  %v7746_v57 = vpop.eup %7745 }
 0x811   :  { %v3154_v49 = vsel %vm3084_vm12, %v7746_v57, 0.0  ;;  %v7748_v42 = vpop.eup %7747 }
 0x812   :  { %v3151_v6 = vsel %vm3084_vm12, %v7748_v42, 0.0  ;;  %v8718_v12 = vpop.eup %7749 }
 0x813   :  { %3149 = vadd.xlane.f32.xlu0 %v3148_v3  ;;  %v3139_v10 = vsel %vm3084_vm12, %v8718_v12, 0.0 }
 0x815   :  { %v8722_v8 = vpop.eup %7751 }
 0x816   :  { %v3136_v59 = vsel %vm3084_vm12, %v8722_v8, 0.0 }
 0x817   :  { %3146 = vadd.xlane.f32.xlu0 %v3145_v53 }
 0x819   :  { %v8726_v58 = vpop.eup %7753 }
 0x81a   :  { %v3133_v28 = vsel %vm3084_vm12, %v8726_v58, 0.0 }
 0x81b   :  { %3155 = vadd.xlane.f32.xlu0 %v3154_v49 }
 0x81f   :  { %3152 = vadd.xlane.f32.xlu0 %v3151_v6 }
 0x823   :  { %3140 = vadd.xlane.f32.xlu0 %v3139_v10 }
 0x827   :  { %3137 = vadd.xlane.f32.xlu0 %v3136_v59 }
 0x82b   :  { %3134 = vadd.xlane.f32.xlu0 %v3133_v28  ;;  %v2890_v28 = vadd.s32 16, %v8238_v7 }
 0x82d   :  { %vm2898_vm14 = vcmp.eq.s32.totalorder %v2890_v28, %v8240_v9 }
 0x898   :  { %v3144_v13 = vpop.xlane.xlu0 %3143 }
 0x899   :  { %7755 = vrcp.f32 %v3144_v13 }
 0x89c   :  { %v3150_v17 = vpop.xlane.xlu0 %3149 }
 0x89d   :  { %7757 = vrcp.f32 %v3150_v17 }
 0x8a0   :  { %v3147_v0 = vpop.xlane.xlu0 %3146 }
 0x8a4   :  { %v3156_v27 = vpop.xlane.xlu0 %3155 }
 0x8a5   :  { %7759 = vrcp.f32 %v3156_v27  ;;  %v2889_v27 = vadd.s32 8, %v8238_v7 }
 0x8a6   :  { %7761 = vrcp.f32 %v3147_v0  ;;  %v7756_v19 = vpop.eup %7755 }
 0x8a7   :  { %v3168_v37 = vmul.f32 %v7756_v19, %v7740_v21  ;;  %v2894_v21 = vadd.s32 48, %v8238_v7  ;;  %vm2897_vm15 = vcmp.eq.s32.totalorder %v2889_v27, %v8240_v9 }
 0x8a8   :  { %v3153_v56 = vpop.xlane.xlu0 %3152  ;;  %v8788_v38 = vsel %vm2897_vm15, 1.0, %v9666_v34 }
 0x8a9   :  { %7763 = vrcp.f32 %v3153_v56  ;;  %v8747_v48 = vadd.f32 %v8739_v51, %v3168_v37  ;;  %vm2902_vm0 = vcmp.eq.s32.totalorder %v2894_v21, %v8240_v9 }
 0x8aa   :  { %v7758_v30 = vpop.eup %7757  ;;  %v8764_v17 = vsel %vm2902_vm0, 1.0, %v9666_v34  ;;  %vm2896_vm0 = vcmp.eq.s32.totalorder %v8238_v7, %v8240_v9  ;;  %v8041_v9 = vmov 8  }
 0x8ab   :  { %v3170_v43 = vmul.f32 %v7758_v30, %v7742_v45  ;;  %v3190_v53 = vsel %vm3084_vm12, %v8747_v48, 0.0  ;;  %v8802_v52 = vsel %vm2896_vm0, 1.0, %v9666_v34 }
 0x8ac   :  { %v3141_v29 = vpop.xlane.xlu0 %3140 }
 0x8ad   :  { %7765 = vrcp.f32 %v3141_v29  ;;  %v8742_v26 = vadd.f32 %v8735_v20, %v3170_v43 }
 0x8af   :  { %v3196_v50 = vsel %vm3084_vm12, %v8742_v26, 0.0 }
 0x8b0   :  { %3197 = vadd.xlane.f32.xlu1 %v3196_v50  ;;  %v3138_v45 = vpop.xlane.xlu0 %3137 }
 0x8b1   :  { %7767 = vrcp.f32 %v3138_v45 }
 0x8b2   :  { %v7760_v3 = vpop.eup %7759 }
 0x8b3   :  { %v3172_v49 = vmul.f32 %v7760_v3, %v7746_v57  ;;  %v7762_v6 = vpop.eup %7761 }
 0x8b4   :  { %3191 = vadd.xlane.f32.xlu1 %v3190_v53  ;;  %v3135_v10 = vpop.xlane.xlu0 %3134  ;;  %v3169_v18 = vmul.f32 %v7762_v6, %v8712_v35 }
 0x8b5   :  { %7769 = vrcp.f32 %v3135_v10  ;;  %v8759_v59 = vadd.f32 %v8753_v54, %v3172_v49 }
 0x8b6   :  { %v7764_v13 = vpop.eup %7763  ;;  %v8780_v43 = vadd.f32 %v8771_v11, %v3169_v18 }
 0x8b7   :  { %v3202_v57 = vsel %vm3084_vm12, %v8759_v59, 0.0  ;;  %v3171_v0 = vmul.f32 %v7764_v13, %v7748_v42  ;;  %v8785_v42 = vsel %vm2898_vm14, 1.0, %v9666_v34 }
 0x8b8   :  { %3203 = vadd.xlane.f32.xlu0 %v3202_v57  ;;  %v3193_v29 = vsel %vm3084_vm12, %v8780_v43, 0.0 }
 0x8b9   :  { %v8774_v19 = vadd.f32 %v8764_v17, %v3171_v0 }
 0x8ba   :  { %v7766_v56 = vpop.eup %7765 }
 0x8bb   :  { %v3199_v30 = vsel %vm3084_vm12, %v8774_v19, 0.0  ;;  %v3167_v35 = vmul.f32 %v7766_v56, %v8718_v12 }
 0x8bc   :  { %3200 = vadd.xlane.f32.xlu0 %v3199_v30 }
 0x8bd   :  { %v8793_v50 = vadd.f32 %v8785_v42, %v3167_v35 }
 0x8be   :  { %v7768_v37 = vpop.eup %7767 }
 0x8bf   :  { %v3166_v21 = vmul.f32 %v7768_v37, %v8722_v8  ;;  %v3187_v3 = vsel %vm3084_vm12, %v8793_v50, 0.0 }
 0x8c0   :  { %3194 = vadd.xlane.f32.xlu0 %v3193_v29 }
 0x8c1   :  { %v8799_v12 = vadd.f32 %v8788_v38, %v3166_v21 }
 0x8c2   :  { %v7770_v45 = vpop.eup %7769 }
 0x8c3   :  { %v3184_v53 = vsel %vm3084_vm12, %v8799_v12, 0.0  ;;  %v3165_v49 = vmul.f32 %v7770_v45, %v8726_v58 }
 0x8c4   :  { %3188 = vadd.xlane.f32.xlu0 %v3187_v3  ;;  %3185 = vadd.xlane.f32.xlu1 %v3184_v53 }
 0x8c5   :  { %v3173_v7 = vadd.f32 %v8802_v52, %v3165_v49 }
 0x8c7   :  { %v3181_v8 = vsel %vm3084_vm12, %v3173_v7, 0.0 }
 0x8c8   :  { %3182 = vadd.xlane.f32.xlu0 %v3181_v8 }
 0x8d5   :  { %3927 = vrot.lane.b32.xlu1 %v2885_v25, %s8016_s1 }
 0x8de   :  { %3962 = vrot.lane.b32.xlu0 %v8683_v44, %s8016_s1 }
 0x939   :  { %v3198_v6 = vpop.xlane.xlu1 %3197 }
 0x93d   :  { %v3192_v58 = vpop.xlane.xlu1 %3191 }
 0x941   :  { %v3204_v10 = vpop.xlane.xlu0 %3203 }
 0x942   :  { %7771 = vrsqrt.f32 %v3204_v10 }
 0x943   :  { %7773 = vrsqrt.f32 %v3198_v6 }
 0x945   :  { %v3201_v28 = vpop.xlane.xlu0 %3200 }
 0x946   :  { %7775 = vrsqrt.f32 %v3201_v28 }
 0x947   :  { %7777 = vrsqrt.f32 %v3192_v58 }
 0x949   :  { %v3195_v13 = vpop.xlane.xlu0 %3194 }
 0x94a   :  { %7779 = vrsqrt.f32 %v3195_v13 }
 0x94d   :  { %v3189_v57 = vpop.xlane.xlu0 %3188  ;;  %v3186_v0 = vpop.xlane.xlu1 %3185 }
 0x94e   :  { %7781 = vrsqrt.f32 %v3189_v57 }
 0x94f   :  { %v7772_v18 = vpop.eup %7771  ;;  %7783 = vrsqrt.f32 %v3186_v0 }
 0x950   :  { %v3228_v1 = vmul.f32 %v7772_v18, %v8753_v54  ;;  %v7774_v44 = vpop.eup %7773 }
 0x951   :  { %v3183_v25 = vpop.xlane.xlu0 %3182  ;;  %v3928_v27 = vpop.permute.xlu1 %3927  ;;  %v3226_v37 = vmul.f32 %v7774_v44, %v8735_v20 }
 0x952   :  { %7785 = vrsqrt.f32 %v3183_v25  ;;  %7476 = vmatprep.subr.mxu1 %v3228_v1  ;;  %3930 = vxpose.xlu1.b32.start.end [1/1] (short) (narrow) %v3928_v27, 64 }
 0x953   :  { %v7776_v56 = vpop.eup %7775  ;;  %7477 = vmatpush3.msra.mxu1 %v3228_v1 }
 0x954   :  { %v3227_v30 = vmul.f32 %v7776_v56, %v8764_v17  ;;  %v7778_v35 = vpop.eup %7777 }
 0x955   :  { %v3224_v45 = vmul.f32 %v7778_v35, %v8739_v51  ;;  %v3216_v57 = vmul.f32 %v7778_v35, %v8747_v48 }
 0x956   :  { %7478 = vmatprep.subr.mxu1 %v3227_v30 }
 0x957   :  { %v7780_v29 = vpop.eup %7779  ;;  %7479 = vmatpush3.msra.mxu1 %v3227_v30 }
 0x958   :  { %7480 = vmatprep.subr.mxu1 %v3226_v37  ;;  %v3225_v21 = vmul.f32 %v7780_v29, %v8771_v11  ;;  %v3217_v0 = vmul.f32 %v7780_v29, %v8780_v43  ;;  %v8905_v29 = vld [vmem:[#allocation11 + $0x4] sm:$0xf] }
 0x959   :  { %7481 = vmatpush3.msra.mxu1 %v3226_v37 }
 0x95a   :  { %7482 = vmatprep.subr.mxu1 %v3225_v21 }
 0x95b   :  { %v7782_v3 = vpop.eup %7781  ;;  %7483 = vmatpush3.msra.mxu1 %v3225_v21 }
 0x95c   :  { %v7784_v53 = vpop.eup %7783  ;;  %7484 = vmatprep.subr.mxu1 %v3224_v45  ;;  %v3223_v49 = vmul.f32 %v7782_v3, %v8785_v42  ;;  %v3215_v13 = vmul.f32 %v7782_v3, %v8793_v50  ;;  %v3220_v50 = vmul.f32 %v7772_v18, %v8759_v59  ;;  %v8874_v18 = vld [vmem:[#allocation11] sm:$0xf]  ;;  %v3963_v3 = vpop.permute.xlu0 %3962 }
 0x95d   :  { %7485 = vmatpush3.msra.mxu1 %v3224_v45  ;;  %v3222_v8 = vmul.f32 %v7784_v53, %v8788_v38  ;;  %v3214_v58 = vmul.f32 %v7784_v53, %v8799_v12  ;;  %v3219_v12 = vmul.f32 %v7776_v56, %v8774_v19 }
 0x95e   :  { %7486 = vmatprep.subr.mxu1 %v3223_v49 }
 0x95f   :  { %v7786_v6 = vpop.eup %7785  ;;  %7487 = vmatpush3.msra.mxu1 %v3223_v49 }
 0x960   :  { %7488 = vmatprep.subr.mxu1 %v3222_v8  ;;  %v3221_v10 = vmul.f32 %v7786_v6, %v8802_v52  ;;  %v3213_v28 = vmul.f32 %v7786_v6, %v3173_v7  ;;  %v3218_v7 = vmul.f32 %v7774_v44, %v8742_v26 }
 0x961   :  { %7489 = vmatpush3.msra.mxu1 %v3222_v8 }
 0x962   :  { %7490 = vmatprep.subr.mxu1 %v3221_v10  ;;  %7492 = vmatprep.mubr.msk.f32.mxu1 %vm3084_vm12, %v3213_v28 }
 0x963   :  { %7491 = vmatpush3.msra.mxu1 %v3221_v10 }
 0x964   :  { %7493 = vmatmul.mubr.msk.f32.vlgmr.msra.gmra.mxu1 %vm3084_vm12, %v3214_v58  ;;  %7523 = vmatprep.subr.mxu1 %v9666_v34 }
 0x965   :  { %7495 = vmatprep.mubr.msk.f32.mxu1 %vm3084_vm12, %v3215_v13 }
 0x968   :  { %7496 = vmatmul.mubr.msk.f32.gmra.mxu1 %vm3084_vm12, %v3216_v57 }
 0x969   :  { %7498 = vmatprep.mubr.msk.f32.mxu1 %vm3084_vm12, %v3217_v0 }
 0x96c   :  { %7499 = vmatmul.mubr.msk.f32.gmra.mxu1 %vm3084_vm12, %v3218_v7 }
 0x96d   :  { %7501 = vmatprep.mubr.msk.f32.mxu1 %vm3084_vm12, %v3219_v12  ;;  %v8943_v12 = vld [vmem:[#allocation11 + $0x8] sm:$0xf] }
 0x970   :  { %7502 = vmatmul.mubr.msk.f32.gmra.mxu1 %vm3084_vm12, %v3220_v50 }
 0x971   :  { %7525 = vmatprep.mubr.msk.f32.mxu1 %vm8038_vm11, %v9666_v34 }
 0x9ce   :  { %v3946_v53 = vpop.trf.xlu1 }
 0x9d2   :  { %v3947_v49 = vpop.trf.xlu1 }
 0x9d6   :  { %v3948_v8 = vpop.trf.xlu1 }
 0x9da   :  { %v3949_v6 = vpop.trf.xlu1 }
 0x9de   :  { %v3950_v10 = vpop.trf.xlu1 }
 0x9e2   :  { %v3951_v57 = vpop.trf.xlu1 }
 0x9e6   :  { %v3952_v0 = vpop.trf.xlu1 }
 0x9ea   :  { %v3953_v7 = vpop.trf.xlu1 }
 0xa24   :  { %v8842_v48 = vpop.f32.mrf.mxu1 }
 0xa26   :  { %v8844_v43 = vpop.f32.mrf.mxu1 }
 0xa28   :  { %v8846_v1 = vpop.f32.mrf.mxu1 }
 0xa2a   :  { %v8848_v26 = vpop.f32.mrf.mxu1 }
 0xa2c   :  { %v7500_v19 = vpop.f32.mrf.mxu1 }
 0xa2e   :  { %v3339_v25 = vpop.f32.mrf.mxu1 }
 0xa30   :  { %v7503_v27 = vpop.f32.mrf.mxu1 }
 0xa31   :  { %7505 = vmatpush3.xpose.msk.msra.mxu0 %vm3084_vm12, %v7503_v27 }
 0xa32   :  { %7506 = vmatprep.subr.mxu0 %v9666_v34  ;;  %v3349_v59 = vpop.f32.mrf.mxu1 }
 0xa35   :  { %7507 = vmatpush3.xpose.msk.msra.mxu0 %vm3084_vm12, %v3349_v59 }
 0xa36   :  { %7508 = vmatprep.subr.mxu0 %v9666_v34 }
 0xa39   :  { %7509 = vmatpush3.xpose.msk.msra.mxu0 %vm3084_vm12, %v7500_v19 }
 0xa3a   :  { %7510 = vmatprep.subr.mxu0 %v9666_v34 }
 0xa3d   :  { %7511 = vmatpush3.xpose.msk.msra.mxu0 %vm3084_vm12, %v3339_v25 }
 0xa3e   :  { %7512 = vmatprep.subr.mxu0 %v9666_v34 }
 0xa41   :  { %7513 = vmatpush3.xpose.msk.msra.mxu0 %vm3084_vm12, %v8846_v1 }
 0xa42   :  { %7514 = vmatprep.subr.mxu0 %v9666_v34 }
 0xa45   :  { %7515 = vmatpush3.xpose.msk.msra.mxu0 %vm3084_vm12, %v8848_v26 }
 0xa46   :  { %7516 = vmatprep.subr.mxu0 %v9666_v34 }
 0xa49   :  { %7517 = vmatpush3.xpose.msk.msra.mxu0 %vm3084_vm12, %v8842_v48 }
 0xa4a   :  { %7518 = vmatprep.subr.mxu0 %v9666_v34 }
 0xa4d   :  { %7519 = vmatpush3.xpose.msk.msra.mxu0 %vm3084_vm12, %v8844_v43 }
 0xa4e   :  { %7547 = vmatprep.subr.mxu0 %v9666_v34 }
 0xa50   :  { %7521 = vmatmul.mubr.msk.f32.vlgmr.msra.gmra.mxu0 %vm3084_vm12, %v8631_v16 }
 0xa51   :  { %7549 = vmatprep.mubr.msk.f32.mxu0 %vm8038_vm11, %v9666_v34 }
 0xb10   :  { %v3452_v44 = vpop.f32.mrf.mxu0 }
 0xb11   :  { %7524 = vmatpush3.msk.msra.mxu1 %vm295_vm1, %v3452_v44 }
 0xb12   :  { %v7522_v56 = vpop.f32.mrf.mxu0  ;;  %7526 = vmatmul.mubr.msk.f32.vlgmr.msra.gmra.mxu1 %vm437_vm3, %v8874_v18  ;;  %7528 = vmatprep.subr.mxu1 %v9666_v34 }
 0xb13   :  { %7529 = vmatpush3.xpose.msk.msra.mxu1 %vm3084_vm12, %v7503_v27  ;;  %7544 = vmatprep.mubr.msk.f32.mxu1 %vm8038_vm11, %v9666_v34 }
 0xb14   :  { %7530 = vmatprep.subr.mxu1 %v9666_v34 }
 0xb17   :  { %7531 = vmatpush3.xpose.msk.msra.mxu1 %vm3084_vm12, %v3349_v59 }
 0xb18   :  { %7532 = vmatprep.subr.mxu1 %v9666_v34 }
 0xb1b   :  { %7533 = vmatpush3.xpose.msk.msra.mxu1 %vm3084_vm12, %v7500_v19 }
 0xb1c   :  { %7534 = vmatprep.subr.mxu1 %v9666_v34 }
 0xb1f   :  { %7535 = vmatpush3.xpose.msk.msra.mxu1 %vm3084_vm12, %v3339_v25 }
 0xb20   :  { %7536 = vmatprep.subr.mxu1 %v9666_v34 }
 0xb23   :  { %7537 = vmatpush3.xpose.msk.msra.mxu1 %vm3084_vm12, %v8846_v1 }
 0xb24   :  { %7538 = vmatprep.subr.mxu1 %v9666_v34 }
 0xb27   :  { %7539 = vmatpush3.xpose.msk.msra.mxu1 %vm3084_vm12, %v8848_v26 }
 0xb28   :  { %7540 = vmatprep.subr.mxu1 %v9666_v34 }
 0xb2b   :  { %7541 = vmatpush3.xpose.msk.msra.mxu1 %vm3084_vm12, %v8842_v48 }
 0xb2c   :  { %7542 = vmatprep.subr.mxu1 %v9666_v34 }
 0xb2f   :  { %7543 = vmatpush3.xpose.msk.msra.mxu1 %vm3084_vm12, %v8844_v43 }
 0xb30   :  { %7571 = vmatprep.subr.mxu1 %v9666_v34 }
 0xbd2   :  { %v3528_v30 = vpop.f32.mrf.mxu1 }
 0xbd3   :  { %v3532_v35 = vmax.f32 %v3528_v30, 0.0 }
 0xbd4   :  { %v7527_v37 = vpop.f32.mrf.mxu1 }
 0xbd5   :  { %7545 = vmatmul.mubr.msk.f32.vlgmr.msra.gmra.mxu1 %vm3084_vm12, %v3532_v35 }
 0xbd6   :  { %7573 = vmatprep.mubr.msk.f32.mxu1 %vm8038_vm11, %v9666_v34 }
 0xc95   :  { %v3604_v21 = vpop.f32.mrf.mxu1 }
 0xc96   :  { %7548 = vmatpush3.msk.msra.mxu0 %vm295_vm1, %v3604_v21 }
 0xc97   :  { %v7546_v45 = vpop.f32.mrf.mxu1  ;;  %7550 = vmatmul.mubr.msk.f32.vlgmr.msra.gmra.mxu0 %vm437_vm3, %v8905_v29  ;;  %7552 = vmatprep.subr.mxu0 %v9666_v34 }
 0xc98   :  { %7553 = vmatpush3.xpose.msk.msra.mxu0 %vm3084_vm12, %v7503_v27  ;;  %7568 = vmatprep.mubr.msk.f32.mxu0 %vm8038_vm11, %v9666_v34 }
 0xc99   :  { %7554 = vmatprep.subr.mxu0 %v9666_v34 }
 0xc9c   :  { %7555 = vmatpush3.xpose.msk.msra.mxu0 %vm3084_vm12, %v3349_v59 }
 0xc9d   :  { %7556 = vmatprep.subr.mxu0 %v9666_v34 }
 0xca0   :  { %7557 = vmatpush3.xpose.msk.msra.mxu0 %vm3084_vm12, %v7500_v19 }
 0xca1   :  { %7558 = vmatprep.subr.mxu0 %v9666_v34 }
 0xca4   :  { %7559 = vmatpush3.xpose.msk.msra.mxu0 %vm3084_vm12, %v3339_v25 }
 0xca5   :  { %7560 = vmatprep.subr.mxu0 %v9666_v34 }
 0xca8   :  { %7561 = vmatpush3.xpose.msk.msra.mxu0 %vm3084_vm12, %v8846_v1 }
 0xca9   :  { %7562 = vmatprep.subr.mxu0 %v9666_v34 }
 0xcac   :  { %7563 = vmatpush3.xpose.msk.msra.mxu0 %vm3084_vm12, %v8848_v26 }
 0xcad   :  { %7564 = vmatprep.subr.mxu0 %v9666_v34 }
 0xcb0   :  { %7565 = vmatpush3.xpose.msk.msra.mxu0 %vm3084_vm12, %v8842_v48 }
 0xcb1   :  { %7566 = vmatprep.subr.mxu0 %v9666_v34 }
 0xcb4   :  { %7567 = vmatpush3.xpose.msk.msra.mxu0 %vm3084_vm12, %v8844_v43 }
 0xcb5   :  { %7576 = vmatprep.subr.msk.mxu0 %vm295_vm1, %v3963_v3 }
 0xd57   :  { %v3680_v28 = vpop.f32.mrf.mxu0 }
 0xd58   :  { %v3684_v58 = vmax.f32 %v3680_v28, 0.0  ;;  %v8991_v28 = vld [vmem:[%s9594_s9 + $0x58] sm:$0xff] }
 0xd59   :  { %v7551_v13 = vpop.f32.mrf.mxu0 }
 0xd5a   :  { %7569 = vmatmul.mubr.msk.f32.vlgmr.msra.gmra.mxu0 %vm3084_vm12, %v3684_v58  ;;  %v8998_v58 = vld [vmem:[%s9594_s9 + $0x50] sm:$0xff]  ;;  %v9003_v13 = vld [vmem:[%s9594_s9 + $0x48] sm:$0xff] }
 0xd5b   :  { %7577 = vmatpush3.msk.msra.mxu0 %vm295_vm1, %v3963_v3  ;;  %7578 = vmatprep.mubr.msk.f32.mxu0 %vm437_vm3, %v3946_v53 }
 0xd5e   :  { %7579 = vmatmul.mubr.msk.f32.vlgmr.msra.gmra.mxu0 %vm437_vm3, %v3947_v49  ;;  %v8969_v49 = vld [vmem:[%s9594_s9 + $0x78] sm:$0xff] }
 0xd5f   :  { %7581 = vmatprep.mubr.msk.f32.mxu0 %vm437_vm3, %v3948_v8  ;;  %v8975_v8 = vld [vmem:[%s9594_s9 + $0x70] sm:$0xff] }
 0xd62   :  { %7582 = vmatmul.mubr.msk.f32.gmra.mxu0 %vm437_vm3, %v3949_v6  ;;  %v8980_v6 = vld [vmem:[%s9594_s9 + $0x68] sm:$0xff] }
 0xd63   :  { %7584 = vmatprep.mubr.msk.f32.mxu0 %vm437_vm3, %v3950_v10  ;;  %v8985_v10 = vld [vmem:[%s9594_s9 + $0x60] sm:$0xff] }
 0xd66   :  { %7585 = vmatmul.mubr.msk.f32.gmra.mxu0 %vm437_vm3, %v3951_v57  ;;  %v9009_v57 = vld [vmem:[%s9594_s9 + $0x40] sm:$0xff] }
 0xd67   :  { %7587 = vmatprep.mubr.msk.f32.mxu0 %vm437_vm3, %v3952_v0  ;;  %v9015_v0 = vld [vmem:[%s9594_s9 + $0x38] sm:$0xff] }
 0xd6a   :  { %7588 = vmatmul.mubr.msk.f32.gmra.mxu0 %vm437_vm3, %v3953_v7  ;;  %v9022_v7 = vld [vmem:[%s9594_s9 + $0x30] sm:$0xff] }
 0xe1a   :  { %v3756_v50 = vpop.f32.mrf.mxu0 }
 0xe1b   :  { %7572 = vmatpush3.msk.msra.mxu1 %vm295_vm1, %v3756_v50  ;;  %v9027_v50 = vld [vmem:[%s9594_s9 + $0x28] sm:$0xff] }
 0xe1c   :  { %v7570_v48 = vpop.f32.mrf.mxu0  ;;  %7574 = vmatmul.mubr.msk.f32.vlgmr.msra.gmra.mxu1 %vm437_vm3, %v8943_v12  ;;  %3871 = vmatprep.subr.mxu1 %v8969_v49 }
 0xe1d   :  { %3919 = vmatprep.mubr.f32.mxu1 %v9666_v34  ;;  %3872 = vmatpush1.msra.mxu1 %v8975_v8  ;;  %v9033_v48 = vld [vmem:[%s9594_s9 + $0x20] sm:$0xff] }
 0xe1e   :  { %v8949_v43 = vpop.f32.mrf.mxu0  ;;  %3873 = vmatprep.subr.mxu1 %v8980_v6 }
 0xe1f   :  { %v4098_v3 = vsel %vm3084_vm12, %v8949_v43, -inf  ;;  %3874 = vmatpush1.msra.mxu1 %v8985_v10 }
 0xe20   :  { %v8951_v1 = vpop.f32.mrf.mxu0  ;;  %3875 = vmatprep.subr.mxu1 %v8991_v28 }
 0xe21   :  { %v4095_v53 = vsel %vm3084_vm12, %v8951_v1, -inf  ;;  %3876 = vmatpush1.msra.mxu1 %v8998_v58 }
 0xe22   :  { %v7583_v26 = vpop.f32.mrf.mxu0  ;;  %3877 = vmatprep.subr.mxu1 %v9003_v13 }
 0xe23   :  { %v4104_v30 = vsel %vm3084_vm12, %v7583_v26, -inf  ;;  %3878 = vmatpush1.msra.mxu1 %v9009_v57 }
 0xe24   :  { %v8953_v19 = vpop.f32.mrf.mxu0  ;;  %3879 = vmatprep.subr.mxu1 %v9015_v0 }
 0xe25   :  { %v4101_v45 = vsel %vm3084_vm12, %v8953_v19, -inf  ;;  %3880 = vmatpush1.msra.mxu1 %v9022_v7 }
 0xe26   :  { %v7586_v25 = vpop.f32.mrf.mxu0  ;;  %3881 = vmatprep.subr.mxu1 %v9027_v50 }
 0xe27   :  { %v4110_v27 = vsel %vm3084_vm12, %v7586_v25, -inf  ;;  %3882 = vmatpush1.msra.mxu1 %v9033_v48 }
 0xe28   :  { %4111 = vmax.xlane.f32.xlu0 %v4110_v27  ;;  %v4076_v59 = vpop.f32.mrf.mxu0  ;;  %v9039_v27 = vld [vmem:[%s9594_s9 + $0x18] sm:$0xff] }
 0xe29   :  { %v4107_v44 = vsel %vm3084_vm12, %v4076_v59, -inf  ;;  %3883 = vmatprep.subr.mxu1 %v9039_v27 }
 0xe2a   :  { %4108 = vmax.xlane.f32.xlu1 %v4107_v44  ;;  %v7589_v56 = vpop.f32.mrf.mxu0  ;;  %v9046_v44 = vld [vmem:[%s9594_s9 + $0x10] sm:$0xff] }
 0xe2b   :  { %v4116_v35 = vsel %vm3084_vm12, %v7589_v56, -inf  ;;  %3884 = vmatpush1.msra.mxu1 %v9046_v44 }
 0xe2c   :  { %4105 = vmax.xlane.f32.xlu0 %v4104_v30  ;;  %v4086_v37 = vpop.f32.mrf.mxu0  ;;  %v9051_v30 = vld [vmem:[%s9594_s9 + $0x8] sm:$0xff] }
 0xe2d   :  { %v4113_v21 = vsel %vm3084_vm12, %v4086_v37, -inf  ;;  %3885 = vmatprep.subr.mxu1 %v9051_v30 }
 0xe30   :  { %4117 = vmax.xlane.f32.xlu0 %v4116_v35  ;;  %v9059_v35 = vld [vmem:[%s9594_s9] sm:$0xff] }
 0xe31   :  { %3886 = vmatpush1.msra.mxu1 %v9059_v35 }
 0xe32   :  { %7618 = vmatprep.subr.mxu1 %v9666_v34 }
 0xe34   :  { %4114 = vmax.xlane.f32.xlu0 %v4113_v21 }
 0xe38   :  { %4102 = vmax.xlane.f32.xlu0 %v4101_v45 }
 0xe3c   :  { %4099 = vmax.xlane.f32.xlu0 %v4098_v3 }
 0xe40   :  { %4096 = vmax.xlane.f32.xlu0 %v4095_v53 }
 0xeb1   :  { %v4112_v21 = vpop.xlane.xlu0 %4111 }
 0xeb2   :  { %v4124_v45 = vsub.f32 %v7586_v25, %v4112_v21 }
 0xeb3   :  { %v4109_v3 = vpop.xlane.xlu1 %4108 }
 0xeb4   :  { %v4137_v33 = vmul.f32 1.442695, %v4124_v45  ;;  %v4123_v40 = vsub.f32 %v4076_v59, %v4109_v3 }
 0xeb5   :  { %v4106_v53 = vpop.xlane.xlu0 %4105 }
 0xeb6   :  { %v4122_v32 = vsub.f32 %v7583_v26, %v4106_v53  ;;  %v4135_v15 = vmul.f32 1.442695, %v4123_v40 }
 0xeb8   :  { %v4133_v39 = vmul.f32 1.442695, %v4122_v32 }
 0xeb9   :  { %v4118_v31 = vpop.xlane.xlu0 %4117 }
 0xeba   :  { %7787 = vpow2.f32 %v4133_v39  ;;  %v4126_v61 = vsub.f32 %v7589_v56, %v4118_v31 }
 0xebb   :  { %7789 = vpow2.f32 %v4137_v33 }
 0xebc   :  { %7791 = vpow2.f32 %v4135_v15  ;;  %v4141_v60 = vmul.f32 1.442695, %v4126_v61 }
 0xebd   :  { %v4115_v62 = vpop.xlane.xlu0 %4114 }
 0xebe   :  { %v4125_v55 = vsub.f32 %v4086_v37, %v4115_v62  ;;  %7793 = vpow2.f32 %v4141_v60 }
 0xec0   :  { %v4139_v46 = vmul.f32 1.442695, %v4125_v55 }
 0xec1   :  { %v4103_v47 = vpop.xlane.xlu0 %4102 }
 0xec2   :  { %v4121_v25 = vsub.f32 %v8953_v19, %v4103_v47  ;;  %7795 = vpow2.f32 %v4139_v46 }
 0xec4   :  { %v4131_v26 = vmul.f32 1.442695, %v4121_v25 }
 0xec5   :  { %v4100_v21 = vpop.xlane.xlu0 %4099 }
 0xec6   :  { %v4120_v32 = vsub.f32 %v8949_v43, %v4100_v21  ;;  %7797 = vpow2.f32 %v4131_v26 }
 0xec7   :  { %v7788_v41 = vpop.eup %7787 }
 0xec8   :  { %v4152_v39 = vsel %vm3084_vm12, %v7788_v41, 0.0  ;;  %v7790_v33 = vpop.eup %7789  ;;  %v4129_v15 = vmul.f32 1.442695, %v4120_v32 }
 0xec9   :  { %4153 = vadd.xlane.f32.xlu0 %v4152_v39  ;;  %v4097_v31 = vpop.xlane.xlu0 %4096  ;;  %v4158_v60 = vsel %vm3084_vm12, %v7790_v33, 0.0  ;;  %v7792_v55 = vpop.eup %7791 }
 0xeca   :  { %v4119_v61 = vsub.f32 %v8951_v1, %v4097_v31  ;;  %7799 = vpow2.f32 %v4129_v15  ;;  %v4155_v46 = vsel %vm3084_vm12, %v7792_v55, 0.0 }
 0xecb   :  { %v7794_v62 = vpop.eup %7793 }
 0xecc   :  { %v4127_v47 = vmul.f32 1.442695, %v4119_v61  ;;  %v4164_v40 = vsel %vm3084_vm12, %v7794_v62, 0.0 }
 0xecd   :  { %4159 = vadd.xlane.f32.xlu0 %v4158_v60 }
 0xece   :  { %7801 = vpow2.f32 %v4127_v47 }
 0xecf   :  { %v7796_v43 = vpop.eup %7795 }
 0xed0   :  { %v4161_v19 = vsel %vm3084_vm12, %v7796_v43, 0.0 }
 0xed1   :  { %4156 = vadd.xlane.f32.xlu0 %v4155_v46 }
 0xed3   :  { %v7798_v59 = vpop.eup %7797 }
 0xed4   :  { %v4149_v56 = vsel %vm3084_vm12, %v7798_v59, 0.0 }
 0xed5   :  { %4165 = vadd.xlane.f32.xlu0 %v4164_v40 }
 0xed7   :  { %v7800_v37 = vpop.eup %7799 }
 0xed8   :  { %v4146_v3 = vsel %vm3084_vm12, %v7800_v37, 0.0 }
 0xed9   :  { %4162 = vadd.xlane.f32.xlu0 %v4161_v19 }
 0xedb   :  { %v7802_v53 = vpop.eup %7801 }
 0xedc   :  { %v3832_v1 = vpop.f32.mrf.mxu1  ;;  %v4143_v25 = vsel %vm3084_vm12, %v7802_v53, 0.0 }
 0xedd   :  { %7108 = vmatmul.mubr.msk.f32.vlgmr.msra.gmra.mxu1 %vm3084_vm12, %v3832_v1  ;;  %4150 = vadd.xlane.f32.xlu0 %v4149_v56 }
 0xede   :  { %v7575_v45 = vpop.f32.mrf.mxu1  ;;  %7634 = vmatprep.mubr.msk.f32.mxu1 %vm8038_vm11, %v9666_v34 }
 0xee1   :  { %4147 = vadd.xlane.f32.xlu0 %v4146_v3 }
 0xee5   :  { %4144 = vadd.xlane.f32.xlu0 %v4143_v25 }
 0xf52   :  { %v4154_v21 = vpop.xlane.xlu0 %4153 }
 0xf53   :  { %7803 = vrcp.f32 %v4154_v21 }
 0xf56   :  { %v4160_v26 = vpop.xlane.xlu0 %4159 }
 0xf57   :  { %7805 = vrcp.f32 %v4160_v26 }
 0xf5a   :  { %v4157_v32 = vpop.xlane.xlu0 %4156 }
 0xf5e   :  { %v4166_v39 = vpop.xlane.xlu0 %4165 }
 0xf5f   :  { %7807 = vrcp.f32 %v4166_v39 }
 0xf60   :  { %v7804_v31 = vpop.eup %7803  ;;  %7809 = vrcp.f32 %v4157_v32 }
 0xf61   :  { %v4178_v15 = vmul.f32 %v7804_v31, %v7788_v41 }
 0xf62   :  { %v4163_v61 = vpop.xlane.xlu0 %4162 }
 0xf63   :  { %7811 = vrcp.f32 %v4163_v61  ;;  %v9078_v60 = vadd.f32 %v8739_v51, %v4178_v15 }
 0xf64   :  { %v7806_v47 = vpop.eup %7805 }
 0xf65   :  { %v4200_v46 = vsel %vm3084_vm12, %v9078_v60, 0.0  ;;  %v4180_v40 = vmul.f32 %v7806_v47, %v7790_v33 }
 0xf66   :  { %4201 = vadd.xlane.f32.xlu1 %v4200_v46  ;;  %v4151_v19 = vpop.xlane.xlu0 %4150 }
 0xf67   :  { %7813 = vrcp.f32 %v4151_v19  ;;  %v9083_v1 = vadd.f32 %v8735_v20, %v4180_v40 }
 0xf69   :  { %v4206_v56 = vsel %vm3084_vm12, %v9083_v1, 0.0 }
 0xf6a   :  { %4207 = vadd.xlane.f32.xlu0 %v4206_v56  ;;  %v4148_v41 = vpop.xlane.xlu0 %4147 }
 0xf6b   :  { %7815 = vrcp.f32 %v4148_v41 }
 0xf6c   :  { %v7808_v45 = vpop.eup %7807 }
 0xf6d   :  { %v4182_v3 = vmul.f32 %v7808_v45, %v7794_v62  ;;  %v7810_v25 = vpop.eup %7809 }
 0xf6e   :  { %v4145_v21 = vpop.xlane.xlu0 %4144  ;;  %v4179_v31 = vmul.f32 %v7810_v25, %v7792_v55 }
 0xf6f   :  { %7817 = vrcp.f32 %v4145_v21  ;;  %v9088_v26 = vadd.f32 %v8753_v54, %v4182_v3 }
 0xf70   :  { %v7812_v33 = vpop.eup %7811  ;;  %v9098_v47 = vadd.f32 %v8771_v11, %v4179_v31 }
 0xf71   :  { %v4212_v32 = vsel %vm3084_vm12, %v9088_v26, 0.0  ;;  %v4181_v39 = vmul.f32 %v7812_v33, %v7796_v43 }
 0xf72   :  { %4213 = vadd.xlane.f32.xlu0 %v4212_v32  ;;  %v4203_v19 = vsel %vm3084_vm12, %v9098_v47, 0.0 }
 0xf73   :  { %v9093_v15 = vadd.f32 %v8764_v17, %v4181_v39 }
 0xf74   :  { %v7814_v61 = vpop.eup %7813 }
 0xf75   :  { %v4209_v62 = vsel %vm3084_vm12, %v9093_v15, 0.0  ;;  %v4177_v46 = vmul.f32 %v7814_v61, %v7798_v59 }
 0xf76   :  { %4210 = vadd.xlane.f32.xlu0 %v4209_v62 }
 0xf77   :  { %v9103_v43 = vadd.f32 %v8785_v42, %v4177_v46 }
 0xf78   :  { %v7816_v40 = vpop.eup %7815 }
 0xf79   :  { %v4176_v55 = vmul.f32 %v7816_v40, %v7800_v37  ;;  %v4197_v45 = vsel %vm3084_vm12, %v9103_v43, 0.0 }
 0xf7a   :  { %4204 = vadd.xlane.f32.xlu0 %v4203_v19 }
 0xf7b   :  { %v4184_v56 = vadd.f32 %v8788_v38, %v4176_v55 }
 0xf7c   :  { %v7818_v41 = vpop.eup %7817 }
 0xf7d   :  { %v4194_v3 = vsel %vm3084_vm12, %v4184_v56, 0.0  ;;  %v4175_v25 = vmul.f32 %v7818_v41, %v7802_v53 }
 0xf7e   :  { %4198 = vadd.xlane.f32.xlu0 %v4197_v45  ;;  %4195 = vadd.xlane.f32.xlu1 %v4194_v3 }
 0xf7f   :  { %v4183_v59 = vadd.f32 %v8802_v52, %v4175_v25 }
 0xf81   :  { %v4191_v21 = vsel %vm3084_vm12, %v4183_v59, 0.0 }
 0xf82   :  { %4192 = vadd.xlane.f32.xlu0 %v4191_v21 }
 0xf8f   :  { %4368 = vrot.lane.b32.xlu1 %v8631_v16, %s8016_s1 }
 0xfef   :  { %v4202_v39 = vpop.xlane.xlu1 %4201 }
 0xff3   :  { %v4208_v37 = vpop.xlane.xlu0 %4207 }
 0xffb   :  { %v4214_v33 = vpop.xlane.xlu0 %4213 }
 0xffc   :  { %7819 = vrsqrt.f32 %v4214_v33 }
 0xffd   :  { %7821 = vrsqrt.f32 %v4208_v37 }
 0xfff   :  { %v4211_v32 = vpop.xlane.xlu0 %4210 }
0x1000   :  { %7823 = vrsqrt.f32 %v4211_v32 }
0x1001   :  { %7825 = vrsqrt.f32 %v4202_v39 }
0x1003   :  { %v4205_v31 = vpop.xlane.xlu0 %4204 }
0x1004   :  { %7827 = vrsqrt.f32 %v4205_v31 }
0x1007   :  { %v4199_v53 = vpop.xlane.xlu0 %4198  ;;  %v4196_v61 = vpop.xlane.xlu1 %4195 }
0x1008   :  { %7829 = vrsqrt.f32 %v4199_v53 }
0x1009   :  { %v7820_v62 = vpop.eup %7819  ;;  %7831 = vrsqrt.f32 %v4196_v61 }
0x100a   :  { %v4238_v46 = vmul.f32 %v7820_v62, %v8753_v54  ;;  %v7822_v19 = vpop.eup %7821 }
0x100b   :  { %v4193_v40 = vpop.xlane.xlu0 %4192  ;;  %v4236_v45 = vmul.f32 %v7822_v19, %v8735_v20  ;;  %v4369_v61 = vpop.permute.xlu1 %4368 }
0x100c   :  { %7833 = vrsqrt.f32 %v4193_v40  ;;  %7590 = vmatprep.subr.mxu0 %v4238_v46 }
0x100d   :  { %v7824_v16 = vpop.eup %7823  ;;  %7591 = vmatpush3.msra.mxu0 %v4238_v46 }
0x100e   :  { %v4237_v55 = vmul.f32 %v7824_v16, %v8764_v17  ;;  %v7826_v41 = vpop.eup %7825 }
0x100f   :  { %v4234_v54 = vmul.f32 %v7826_v41, %v8739_v51 }
0x1010   :  { %7592 = vmatprep.subr.mxu0 %v4237_v55 }
0x1011   :  { %v7828_v3 = vpop.eup %7827  ;;  %7593 = vmatpush3.msra.mxu0 %v4237_v55 }
0x1012   :  { %7594 = vmatprep.subr.mxu0 %v4236_v45  ;;  %v4235_v25 = vmul.f32 %v7828_v3, %v8771_v11 }
0x1013   :  { %7595 = vmatpush3.msra.mxu0 %v4236_v45 }
0x1014   :  { %7596 = vmatprep.subr.mxu0 %v4235_v25 }
0x1015   :  { %v7830_v21 = vpop.eup %7829  ;;  %7597 = vmatpush3.msra.mxu0 %v4235_v25 }
0x1016   :  { %v7832_v37 = vpop.eup %7831  ;;  %7598 = vmatprep.subr.mxu0 %v4234_v54  ;;  %v4233_v33 = vmul.f32 %v7830_v21, %v8785_v42  ;;  %v4225_v51 = vmul.f32 %v7830_v21, %v9103_v43  ;;  %v4226_v42 = vmul.f32 %v7826_v41, %v9078_v60  ;;  %v4230_v43 = vmul.f32 %v7820_v62, %v9088_v26  ;;  %v3921_v62 = vpop.f32.mrf.mxu1 }
0x1017   :  { %7599 = vmatpush3.msra.mxu0 %v4234_v54  ;;  %v4232_v17 = vmul.f32 %v7832_v37, %v8788_v38  ;;  %v4224_v39 = vmul.f32 %v7832_v37, %v4184_v56  ;;  %v4227_v38 = vmul.f32 %v7828_v3, %v9098_v47  ;;  %v4229_v56 = vmul.f32 %v7824_v16, %v9093_v15 }
0x1018   :  { %7600 = vmatprep.subr.mxu0 %v4233_v33  ;;  %v3923_v46 = vpop.f32.mrf.mxu1  ;;  %v4907_v54 = vadd.f32 %v3921_v62, %v8166_v63 }
0x1019   :  { %v7834_v20 = vpop.eup %7833  ;;  %7601 = vmatpush3.msra.mxu0 %v4233_v33 }
0x101a   :  { %7602 = vmatprep.subr.mxu0 %v4232_v17  ;;  %v4231_v32 = vmul.f32 %v7834_v20, %v8802_v52  ;;  %v4223_v11 = vmul.f32 %v7834_v20, %v4183_v59  ;;  %v4228_v52 = vmul.f32 %v7822_v19, %v9083_v1 }
0x101b   :  { %7603 = vmatpush3.msra.mxu0 %v4232_v17 }
0x101c   :  { %7604 = vmatprep.subr.mxu0 %v4231_v32  ;;  %7606 = vmatprep.mubr.msk.f32.mxu0 %vm3084_vm12, %v4223_v11 }
0x101d   :  { %7605 = vmatpush3.msra.mxu0 %v4231_v32 }
0x101e   :  { %7607 = vmatmul.mubr.msk.f32.vlgmr.msra.gmra.mxu0 %vm3084_vm12, %v4224_v39  ;;  %7637 = vmatprep.subr.mxu0 %v9666_v34 }
0x101f   :  { %7609 = vmatprep.mubr.msk.f32.mxu0 %vm3084_vm12, %v4225_v51 }
0x1022   :  { %7610 = vmatmul.mubr.msk.f32.gmra.mxu0 %vm3084_vm12, %v4226_v42 }
0x1023   :  { %7612 = vmatprep.mubr.msk.f32.mxu0 %vm3084_vm12, %v4227_v38 }
0x1026   :  { %7613 = vmatmul.mubr.msk.f32.gmra.mxu0 %vm3084_vm12, %v4228_v52 }
0x1027   :  { %7615 = vmatprep.mubr.msk.f32.mxu0 %vm3084_vm12, %v4229_v56 }
0x102a   :  { %7616 = vmatmul.mubr.msk.f32.gmra.mxu0 %vm3084_vm12, %v4230_v43 }
0x102b   :  { %7639 = vmatprep.mubr.msk.f32.mxu0 %vm8038_vm11, %v9666_v34 }
0x10de   :  { %v9138_v60 = vpop.f32.mrf.mxu0 }
0x10e0   :  { %v9140_v47 = vpop.f32.mrf.mxu0 }
0x10e2   :  { %v9142_v59 = vpop.f32.mrf.mxu0 }
0x10e4   :  { %v9144_v1 = vpop.f32.mrf.mxu0 }
0x10e6   :  { %v7614_v15 = vpop.f32.mrf.mxu0 }
0x10e8   :  { %v9146_v31 = vpop.f32.mrf.mxu0 }
0x10ea   :  { %v7617_v53 = vpop.f32.mrf.mxu0 }
0x10eb   :  { %7619 = vmatpush3.xpose.msk.msra.mxu1 %vm3084_vm12, %v7617_v53 }
0x10ec   :  { %7620 = vmatprep.subr.mxu1 %v9666_v34  ;;  %v4359_v26 = vpop.f32.mrf.mxu0 }
0x10ef   :  { %7621 = vmatpush3.xpose.msk.msra.mxu1 %vm3084_vm12, %v4359_v26 }
0x10f0   :  { %7622 = vmatprep.subr.mxu1 %v9666_v34 }
0x10f3   :  { %7623 = vmatpush3.xpose.msk.msra.mxu1 %vm3084_vm12, %v7614_v15 }
0x10f4   :  { %7624 = vmatprep.subr.mxu1 %v9666_v34 }
0x10f7   :  { %7625 = vmatpush3.xpose.msk.msra.mxu1 %vm3084_vm12, %v9146_v31 }
0x10f8   :  { %7626 = vmatprep.subr.mxu1 %v9666_v34 }
0x10fb   :  { %7627 = vmatpush3.xpose.msk.msra.mxu1 %vm3084_vm12, %v9142_v59 }
0x10fc   :  { %7628 = vmatprep.subr.mxu1 %v9666_v34 }
0x10ff   :  { %7629 = vmatpush3.xpose.msk.msra.mxu1 %vm3084_vm12, %v9144_v1 }
0x1100   :  { %7630 = vmatprep.subr.mxu1 %v9666_v34 }
0x1103   :  { %7631 = vmatpush3.xpose.msk.msra.mxu1 %vm3084_vm12, %v9138_v60 }
0x1104   :  { %7632 = vmatprep.subr.mxu1 %v9666_v34 }
0x1107   :  { %7633 = vmatpush3.xpose.msk.msra.mxu1 %vm3084_vm12, %v9140_v47 }
0x1108   :  { %7661 = vmatprep.subr.mxu1 %v9666_v34 }
0x110a   :  { %7635 = vmatmul.mubr.msk.f32.vlgmr.msra.gmra.mxu1 %vm3084_vm12, %v4369_v61 }
0x110b   :  { %7663 = vmatprep.mubr.msk.f32.mxu1 %vm8038_vm11, %v9666_v34 }
0x11ca   :  { %v4462_v40 = vpop.f32.mrf.mxu1 }
0x11cb   :  { %7638 = vmatpush3.msk.msra.mxu0 %vm295_vm1, %v4462_v40 }
0x11cc   :  { %v7636_v19 = vpop.f32.mrf.mxu1  ;;  %7640 = vmatmul.mubr.msk.f32.vlgmr.msra.gmra.mxu0 %vm437_vm3, %v8874_v18  ;;  %7642 = vmatprep.subr.mxu0 %v9666_v34 }
0x11cd   :  { %7643 = vmatpush3.xpose.msk.msra.mxu0 %vm3084_vm12, %v7617_v53  ;;  %7658 = vmatprep.mubr.msk.f32.mxu0 %vm8038_vm11, %v9666_v34 }
0x11ce   :  { %7644 = vmatprep.subr.mxu0 %v9666_v34 }
0x11d1   :  { %7645 = vmatpush3.xpose.msk.msra.mxu0 %vm3084_vm12, %v4359_v26 }
0x11d2   :  { %7646 = vmatprep.subr.mxu0 %v9666_v34 }
0x11d5   :  { %7647 = vmatpush3.xpose.msk.msra.mxu0 %vm3084_vm12, %v7614_v15 }
0x11d6   :  { %7648 = vmatprep.subr.mxu0 %v9666_v34 }
0x11d9   :  { %7649 = vmatpush3.xpose.msk.msra.mxu0 %vm3084_vm12, %v9146_v31 }
0x11da   :  { %7650 = vmatprep.subr.mxu0 %v9666_v34 }
0x11dd   :  { %7651 = vmatpush3.xpose.msk.msra.mxu0 %vm3084_vm12, %v9142_v59 }
0x11de   :  { %7652 = vmatprep.subr.mxu0 %v9666_v34 }
0x11e1   :  { %7653 = vmatpush3.xpose.msk.msra.mxu0 %vm3084_vm12, %v9144_v1 }
0x11e2   :  { %7654 = vmatprep.subr.mxu0 %v9666_v34 }
0x11e5   :  { %7655 = vmatpush3.xpose.msk.msra.mxu0 %vm3084_vm12, %v9138_v60 }
0x11e6   :  { %7656 = vmatprep.subr.mxu0 %v9666_v34 }
0x11e9   :  { %7657 = vmatpush3.xpose.msk.msra.mxu0 %vm3084_vm12, %v9140_v47 }
0x11ea   :  { %7685 = vmatprep.subr.mxu0 %v9666_v34 }
0x128c   :  { %v4535_v18 = vpop.f32.mrf.mxu0 }
0x128d   :  { %v4539_v16 = vmax.f32 %v4535_v18, 0.0 }
0x128e   :  { %v7641_v55 = vpop.f32.mrf.mxu0 }
0x128f   :  { %7659 = vmatmul.mubr.msk.f32.vlgmr.msra.gmra.mxu0 %vm3084_vm12, %v4539_v16 }
0x1290   :  { %7687 = vmatprep.mubr.msk.f32.mxu0 %vm8038_vm11, %v9666_v34 }
0x134f   :  { %v4609_v41 = vpop.f32.mrf.mxu0 }
0x1350   :  { %7662 = vmatpush3.msk.msra.mxu1 %vm295_vm1, %v4609_v41 }
0x1351   :  { %7664 = vmatmul.mubr.msk.f32.vlgmr.msra.gmra.mxu1 %vm437_vm3, %v8905_v29  ;;  %7666 = vmatprep.subr.mxu1 %v9666_v34  ;;  %v7660_v45 = vpop.f32.mrf.mxu0  ;;  %v4908_v29 = vadd.f32 %v3923_v46, %v8174_v4 }
0x1352   :  { %7667 = vmatpush3.xpose.msk.msra.mxu1 %vm3084_vm12, %v7617_v53  ;;  %7682 = vmatprep.mubr.msk.f32.mxu1 %vm8038_vm11, %v9666_v34 }
0x1353   :  { %7668 = vmatprep.subr.mxu1 %v9666_v34 }
0x1356   :  { %7669 = vmatpush3.xpose.msk.msra.mxu1 %vm3084_vm12, %v4359_v26 }
0x1357   :  { %7670 = vmatprep.subr.mxu1 %v9666_v34 }
0x135a   :  { %7671 = vmatpush3.xpose.msk.msra.mxu1 %vm3084_vm12, %v7614_v15 }
0x135b   :  { %7672 = vmatprep.subr.mxu1 %v9666_v34 }
0x135e   :  { %7673 = vmatpush3.xpose.msk.msra.mxu1 %vm3084_vm12, %v9146_v31 }
0x135f   :  { %7674 = vmatprep.subr.mxu1 %v9666_v34 }
0x1362   :  { %7675 = vmatpush3.xpose.msk.msra.mxu1 %vm3084_vm12, %v9142_v59 }
0x1363   :  { %7676 = vmatprep.subr.mxu1 %v9666_v34 }
0x1366   :  { %7677 = vmatpush3.xpose.msk.msra.mxu1 %vm3084_vm12, %v9144_v1 }
0x1367   :  { %7678 = vmatprep.subr.mxu1 %v9666_v34 }
0x136a   :  { %7679 = vmatpush3.xpose.msk.msra.mxu1 %vm3084_vm12, %v9138_v60 }
0x136b   :  { %7680 = vmatprep.subr.mxu1 %v9666_v34 }
0x136e   :  { %7681 = vmatpush3.xpose.msk.msra.mxu1 %vm3084_vm12, %v9140_v47 }
0x136f   :  { %7160 = vmatprep.subr.msk.mxu1 %vm295_vm1, %v4908_v29 }
0x1411   :  { %v4682_v3 = vpop.f32.mrf.mxu1 }
0x1412   :  { %v4686_v25 = vmax.f32 %v4682_v3, 0.0 }
0x1413   :  { %v7665_v21 = vpop.f32.mrf.mxu1 }
0x1414   :  { %7683 = vmatmul.mubr.msk.f32.vlgmr.msra.gmra.mxu1 %vm3084_vm12, %v4686_v25 }
0x1415   :  { %7161 = vmatpush1.msk.msra.mxu1 %vm295_vm1, %v4907_v54  ;;  %4991 = vmatprep.mubr.f32.mxu1 %v9666_v34 }
0x14d4   :  { %v4756_v37 = vpop.f32.mrf.mxu1 }
0x14d5   :  { %7686 = vmatpush3.msk.msra.mxu0 %vm295_vm1, %v4756_v37 }
0x14d6   :  { %7688 = vmatmul.mubr.msk.f32.vlgmr.msra.gmra.mxu0 %vm437_vm3, %v8943_v12  ;;  %v7684_v4 = vpop.f32.mrf.mxu1  ;;  %4852 = vmatprep.subr.mxu0 %v8969_v49  ;;  %v4911_v49 = vld [vmem:[#allocation13] sm:$0xf] }
0x14d7   :  { %4853 = vmatpush1.msra.mxu0 %v8975_v8  ;;  %4900 = vmatprep.mubr.f32.mxu0 %v9666_v34 }
0x14d8   :  { %4854 = vmatprep.subr.mxu0 %v8980_v6  ;;  %7162 = vmatmul.mubr.msk.f32.vlgmr.msra.gmra.mxu1 %vm437_vm3, %v4911_v49 }
0x14d9   :  { %4855 = vmatpush1.msra.mxu0 %v8985_v10  ;;  %5062 = vmatprep.mubr.f32.mxu1 %v9666_v34 }
0x14da   :  { %4856 = vmatprep.subr.mxu0 %v8991_v28 }
0x14db   :  { %4857 = vmatpush1.msra.mxu0 %v8998_v58  ;;  %v8039_v58 = vmov 6  }
0x14dc   :  { %4858 = vmatprep.subr.mxu0 %v9003_v13  ;;  %7729 = vset.pattern.permute.xlu0 %v8039_v58  ;;  %v8040_v13 = vmov 7  }
0x14dd   :  { %4859 = vmatpush1.msra.mxu0 %v9009_v57  ;;  %7730 = vset.pattern.permute.xlu1 %v8040_v13  ;;  %v9264_v57 = vld [vmem:[#allocation7] sm:$0xf] }
0x14de   :  { %4860 = vmatprep.subr.mxu0 %v9015_v0  ;;  %5115 = vperm.xlu1 %7730, %v9264_v57  }
0x14df   :  { %4861 = vmatpush1.msra.mxu0 %v9022_v7 }
0x14e0   :  { %4862 = vmatprep.subr.mxu0 %v9027_v50 }
0x14e1   :  { %4863 = vmatpush1.msra.mxu0 %v9033_v48 }
0x14e2   :  { %4864 = vmatprep.subr.mxu0 %v9039_v27 }
0x14e3   :  { %4865 = vmatpush1.msra.mxu0 %v9046_v44 }
0x14e4   :  { %4866 = vmatprep.subr.mxu0 %v9051_v30 }
0x14e5   :  { %4867 = vmatpush1.msra.mxu0 %v9059_v35 }
0x1559   :  { %v5116_v41 = vpop.permute.xlu1 %5115 }
0x1596   :  { %v4829_v63 = vpop.f32.mrf.mxu0 }
0x1597   :  { %7159 = vmatmul.mubr.msk.f32.vlgmr.msra.gmra.mxu0 %vm3084_vm12, %v4829_v63 }
0x1598   :  { %v7689_v12 = vpop.f32.mrf.mxu0  ;;  %5236 = vmatprep.mubr.f32.mxu0 %v9666_v34  ;;  %v4993_v0 = vpop.f32.mrf.mxu1 }
0x1599   :  { %v5079_v7 = vmul.f32 %v4993_v0, %v4993_v0  ;;  %v5069_v50 = vsel %vm295_vm1, %v4993_v0, 0.0 }
0x159b   :  { %v5083_v27 = vsel %vm295_vm1, %v5079_v7, 0.0  ;;  %v7166_v7 = vld [vmem:[%s9596_s11 + $0x4] sm:$0xf] }
0x1657   :  { %v4902_v8 = vpop.f32.mrf.mxu0 }
0x1658   :  { %v4909_v28 = vadd.f32 %v4902_v8, %v8168_v2 }
0x1659   :  { %v4904_v6 = vpop.f32.mrf.mxu0 }
0x165a   :  { %v4910_v10 = vadd.f32 %v4904_v6, %v8180_v5  ;;  %v4995_v5 = vpop.f32.mrf.mxu1 }
0x165b   :  { %v5080_v2 = vmul.f32 %v4995_v5, %v4995_v5  ;;  %v5070_v48 = vsel %vm295_vm1, %v4995_v5, 0.0 }
0x165c   :  { %7163 = vmatprep.subr.msk.mxu1 %vm295_vm1, %v4910_v10  ;;  %v5071_v30 = vadd.f32 %v5070_v48, %v5069_v50 }
0x165d   :  { %7164 = vmatpush1.msk.msra.mxu1 %vm295_vm1, %v4909_v28  ;;  %v5084_v44 = vsel %vm295_vm1, %v5080_v2, 0.0 }
0x165e   :  { %7165 = vmatmul.mubr.msk.f32.vlgmr.msra.gmra.mxu1 %vm437_vm3, %v4911_v49  ;;  %v5085_v20 = vadd.f32 %v5084_v44, %v5083_v27 }
0x165f   :  { %5307 = vmatprep.mubr.f32.mxu1 %v9666_v34 }
0x171e   :  { %v5064_v35 = vpop.f32.mrf.mxu1 }
0x171f   :  { %v5072_v33 = vsel %vm295_vm1, %v5064_v35, 0.0  ;;  %v5081_v17 = vmul.f32 %v5064_v35, %v5064_v35 }
0x1720   :  { %v5073_v32 = vadd.f32 %v5072_v33, %v5071_v30  ;;  %v5066_v11 = vpop.f32.mrf.mxu1 }
0x1721   :  { %v5086_v39 = vsel %vm295_vm1, %v5081_v17, 0.0  ;;  %v5074_v51 = vsel %vm295_vm1, %v5066_v11, 0.0  ;;  %v5082_v42 = vmul.f32 %v5066_v11, %v5066_v11 }
0x1722   :  { %v5075_v38 = vadd.f32 %v5074_v51, %v5073_v32  ;;  %v5087_v52 = vadd.f32 %v5086_v39, %v5085_v20  ;;  %v9667_v32 = vld [vmem:[#allocation20_spill] sm:$0xff] }
0x1723   :  { %v5088_v56 = vsel %vm295_vm1, %v5082_v42, 0.0  ;;  %v5138_v39 = vld [vmem:[%s9596_s11] sm:$0xf] }
0x1724   :  { %5076 = vadd.xlane.f32.xlu0 %v5075_v38  ;;  %v5089_v43 = vadd.f32 %v5088_v56, %v5087_v52  ;;  %v9668_v38 = vld [vmem:[#allocation21_spill] sm:$0xff]  ;;  %v9669_v56 = vld [vmem:[#allocation22_spill] sm:$0xff] }
0x1728   :  { %5090 = vadd.xlane.f32.xlu0 %v5089_v43 }
0x173e   :  { %5107 = vperm.xlu0 %7729, %v9264_v57  }
0x1742   :  { %7731 = vset.pattern.permute.xlu0 %v8041_v9 }
0x17ad   :  { %v5077_v60 = vpop.xlane.xlu0 %5076 }
0x17ae   :  { %v5078_v47 = vmul.f32 0.001953125, %v5077_v60 }
0x17b0   :  { %v5093_v1 = vmul.f32 %v5078_v47, %v5078_v47  ;;  %v5096_v61 = vsub.f32 %v4993_v0, %v5078_v47  ;;  %v5097_v62 = vsub.f32 %v4995_v5, %v5078_v47  ;;  %v5099_v46 = vsub.f32 %v5066_v11, %v5078_v47 }
0x17b1   :  { %v5091_v59 = vpop.xlane.xlu0 %5090  ;;  %v5098_v37 = vsub.f32 %v5064_v35, %v5078_v47 }
0x17b2   :  { %v5092_v15 = vmul.f32 0.001953125, %v5091_v59 }
0x17b4   :  { %v5094_v31 = vsub.f32 %v5092_v15, %v5093_v1  ;;  %v9670_v15 = vld [vmem:[#allocation23_spill] sm:$0xff] }
0x17b6   :  { %v5095_v53 = vmax.f32 %v5094_v31, 0.0 }
0x17b8   :  { %v5100_v26 = vadd.f32 1e-05, %v5095_v53  ;;  %v9671_v53 = vld [vmem:[#allocation24_spill] sm:$0xff] }
0x17b9   :  { %v5108_v19 = vpop.permute.xlu0 %5107 }
0x17ba   :  { %7835 = vrsqrt.f32 %v5100_v26 }
0x17c7   :  { %v7836_v40 = vpop.eup %7835 }
0x17c8   :  { %v5102_v18 = vmul.f32 %v7836_v40, %v5096_v61  ;;  %v5103_v16 = vmul.f32 %v7836_v40, %v5097_v62  ;;  %v5105_v55 = vmul.f32 %v7836_v40, %v5099_v46  ;;  %v5104_v4 = vmul.f32 %v7836_v40, %v5098_v37  ;;  %v7179_v61 = vld [vmem:[%s9596_s11 + $0x8] sm:$0xf]  ;;  %v9674_v37 = vld [vmem:[#allocation27_spill] sm:$0xff] }
0x17ca   :  { %v5110_v45 = vmul.f32 %v5108_v19, %v5102_v18  ;;  %v5111_v29 = vmul.f32 %v5108_v19, %v5103_v16  ;;  %v5113_v3 = vmul.f32 %v5108_v19, %v5105_v55  ;;  %v5112_v63 = vmul.f32 %v5108_v19, %v5104_v4  ;;  %v9672_v19 = vld [vmem:[#allocation26_spill] sm:$0xff]  ;;  %v9673_v16 = vld [vmem:[#allocation25_spill] sm:$0xff] }
0x17cc   :  { %v9276_v25 = vadd.f32 %v5116_v41, %v5110_v45  ;;  %v9282_v54 = vadd.f32 %v5116_v41, %v5111_v29  ;;  %v9284_v21 = vadd.f32 %v5116_v41, %v5113_v3  ;;  %v9302_v12 = vadd.f32 %v5116_v41, %v5112_v63  ;;  %v9675_v63 = vld [vmem:[#allocation28_spill] sm:$0xff] }
0x17ce   :  { %5471 = vrot.lane.b32.xlu0 %v9276_v25, %s8029_s7  ;;  %5139 = vrot.lane.b32.xlu1 %v9276_v25, %s8020_s18 }
0x17d2   :  { %5477 = vrot.lane.b32.xlu0 %v9284_v21, %s8029_s7  ;;  %5141 = vrot.lane.b32.xlu1 %v9282_v54, %s8020_s18 }
0x17d6   :  { %5650 = vrot.lane.b32.xlu0 %v9276_v25, %s8023_s28  ;;  %5145 = vrot.lane.b32.xlu1 %v9284_v21, %s8020_s18 }
0x17da   :  { %5656 = vrot.lane.b32.xlu0 %v9284_v21, %s8023_s28  ;;  %5122 = vrot.lane.b32.xlu1 %v9276_v25, %s8030_s10 }
0x17de   :  { %5998 = vrot.lane.b32.xlu0 %v9282_v54, %s8031_s20  ;;  %5124 = vrot.lane.b32.xlu1 %v9282_v54, %s8030_s10 }
0x17e2   :  { %5996 = vrot.lane.b32.xlu0 %v9276_v25, %s8031_s20  ;;  %5143 = vrot.lane.b32.xlu1 %v9302_v12, %s8020_s18 }
0x17e6   :  { %6177 = vrot.lane.b32.xlu0 %v9282_v54, %s8032_s8  ;;  %5128 = vrot.lane.b32.xlu1 %v9284_v21, %s8030_s10 }
0x17ea   :  { %6175 = vrot.lane.b32.xlu0 %v9276_v25, %s8032_s8  ;;  %5126 = vrot.lane.b32.xlu1 %v9302_v12, %s8030_s10 }
0x17ee   :  { %6356 = vrot.lane.b32.xlu0 %v9282_v54, %s8033_s21  ;;  %5473 = vrot.lane.b32.xlu1 %v9282_v54, %s8029_s7 }
0x17f2   :  { %6354 = vrot.lane.b32.xlu0 %v9276_v25, %s8033_s21  ;;  %5475 = vrot.lane.b32.xlu1 %v9302_v12, %s8029_s7 }
0x17f6   :  { %6535 = vrot.lane.b32.xlu0 %v9282_v54, %s8034_s22  ;;  %5652 = vrot.lane.b32.xlu1 %v9282_v54, %s8023_s28 }
0x17fa   :  { %6533 = vrot.lane.b32.xlu0 %v9276_v25, %s8034_s22  ;;  %5654 = vrot.lane.b32.xlu1 %v9302_v12, %s8023_s28 }
0x17fe   :  { %6000 = vrot.lane.b32.xlu1 %v9302_v12, %s8031_s20 }
0x1802   :  { %6002 = vrot.lane.b32.xlu1 %v9284_v21, %s8031_s20 }
0x1806   :  { %6179 = vrot.lane.b32.xlu1 %v9302_v12, %s8032_s8 }
0x180a   :  { %6181 = vrot.lane.b32.xlu1 %v9284_v21, %s8032_s8 }
0x180e   :  { %6358 = vrot.lane.b32.xlu1 %v9302_v12, %s8033_s21 }
0x1812   :  { %6360 = vrot.lane.b32.xlu1 %v9284_v21, %s8033_s21 }
0x1816   :  { %6537 = vrot.lane.b32.xlu1 %v9302_v12, %s8034_s22 }
0x181a   :  { %6539 = vrot.lane.b32.xlu1 %v9284_v21, %s8034_s22 }
0x1840   :  { %v5140_v49 = vpop.permute.xlu1 %5139  ;;  %v5472_v8 = vpop.permute.xlu0 %5471 }
0x1844   :  { %v5142_v6 = vpop.permute.xlu1 %5141  ;;  %v5478_v13 = vpop.permute.xlu0 %5477 }
0x1845   :  { %v5149_v10 = vsel %vm403_vm2, %v5140_v49, %v5142_v6  ;;  %v5482_v60 = vsel %vm760_vm5, %v5478_v13, %v5472_v8 }
0x1846   :  { %v5152_v28 = vmul.f32 %v5149_v10, %v8250_v14  ;;  %v5483_v26 = vmul.f32 %v5482_v60, %v9671_v53  ;;  %v9676_v10 = vld [vmem:[#allocation31_spill] sm:$0xff] }
0x1848   :  { %7167 = vmatprep.subr.msk.mxu0 %vm295_vm1, %v5152_v28  ;;  %v5146_v58 = vpop.permute.xlu1 %5145  ;;  %v5651_v14 = vpop.permute.xlu0 %5650  ;;  %v5830_v28 = vmul.f32 %v9282_v54, %v9676_v10  ;;  %v9692_v10 = vld [vmem:[#allocation46_spill] sm:$0xff] }
0x1849   :  { %v5150_v0 = vsel %vm403_vm2, %v5146_v58, %v5140_v49 }
0x184a   :  { %v5151_v5 = vmul.f32 %v5150_v0, %v8267_v22 }
0x184c   :  { %7168 = vmatpush1.msk.msra.mxu0 %vm295_vm1, %v5151_v5  ;;  %v5123_v2 = vpop.permute.xlu1 %5122  ;;  %v5657_v44 = vpop.permute.xlu0 %5656  ;;  %v9677_v5 = vld [vmem:[#allocation32_spill] sm:$0xff] }
0x184d   :  { %7169 = vmatmul.mubr.msk.f32.vlgmr.msra.gmra.mxu0 %vm437_vm3, %v7166_v7  ;;  %v5661_v45 = vsel %vm963_vm6, %v5657_v44, %v5651_v14 }
0x184e   :  { %5393 = vmatprep.mubr.f32.mxu0 %v9666_v34  ;;  %v5662_v49 = vmul.f32 %v5661_v45, %v9675_v63  ;;  %v9690_v45 = vld [vmem:[#allocation43_spill] sm:$0xff] }
0x1850   :  { %v5125_v50 = vpop.permute.xlu1 %5124  ;;  %v5999_v51 = vpop.permute.xlu0 %5998 }
0x1851   :  { %v5132_v48 = vsel %vm363_vm4, %v5123_v2, %v5125_v50 }
0x1852   :  { %v5135_v27 = vmul.f32 %v5132_v48, %v8297_v36 }
0x1854   :  { %7173 = vmatprep.subr.msk.mxu0 %vm295_vm1, %v5135_v27  ;;  %v5144_v22 = vpop.permute.xlu1 %5143  ;;  %v9393_v59 = vpop.permute.xlu0 %5996 }
0x1855   :  { %v5147_v30 = vsel %vm403_vm2, %v5144_v22, %v5146_v58  ;;  %v5148_v35 = vsel %vm403_vm2, %v5142_v6, %v5144_v22  ;;  %v6006_v54 = vsel %vm1356_vm7, %v9393_v59, %v5999_v51 }
0x1856   :  { %v5153_v33 = vmul.f32 %v5148_v35, %v8273_v24  ;;  %v5154_v17 = vmul.f32 %v5147_v30, %v8270_v23  ;;  %v9681_v35 = vld [vmem:[#allocation34_spill] sm:$0xff] }
0x1858   :  { %7170 = vmatprep.subr.msk.mxu1 %vm295_vm1, %v5154_v17  ;;  %v5129_v20 = vpop.permute.xlu1 %5128  ;;  %v6178_v41 = vpop.permute.xlu0 %6177  ;;  %v9682_v17 = vld [vmem:[#allocation35_spill] sm:$0xff] }
0x1859   :  { %v5133_v36 = vsel %vm363_vm4, %v5129_v20, %v5123_v2  ;;  %7171 = vmatpush1.msk.msra.mxu1 %vm295_vm1, %v5153_v33  ;;  %v9678_v2 = vld [vmem:[#allocation30_spill] sm:$0xff]  ;;  %v5831_v33 = vmul.f32 %v9302_v12, %v9681_v35  ;;  %v7200_v12 = vld [vmem:[%s9596_s11 + $0x14] sm:$0xf]  ;;  %v9697_v35 = vld [vmem:[#allocation49_spill] sm:$0xff] }
0x185a   :  { %v5134_v11 = vmul.f32 %v5133_v36, %v9667_v32  ;;  %7172 = vmatmul.mubr.msk.f32.vlgmr.msra.gmra.mxu1 %vm437_vm3, %v7166_v7  ;;  %v5829_v7 = vmul.f32 %v9276_v25, %v9677_v5  ;;  %v9680_v25 = vld [vmem:[#allocation33_spill] sm:$0xff]  ;;  %v9683_v36 = vld [vmem:[#allocation36_spill] sm:$0xff] }
0x185b   :  { %5464 = vmatprep.mubr.f32.mxu1 %v9666_v34  ;;  %v5832_v22 = vmul.f32 %v9284_v21, %v9680_v25  ;;  %v6008_v21 = vmul.f32 %v6006_v54, %v9683_v36  ;;  %v7221_v54 = vld [vmem:[%s9596_s11 + $0x20] sm:$0xf] }
0x185c   :  { %7174 = vmatpush1.msk.msra.mxu0 %vm295_vm1, %v5134_v11  ;;  %v5127_v23 = vpop.permute.xlu1 %5126  ;;  %v6176_v58 = vpop.permute.xlu0 %6175 }
0x185d   :  { %v5130_v24 = vsel %vm363_vm4, %v5127_v23, %v5129_v20  ;;  %v5131_v42 = vsel %vm363_vm4, %v5125_v50, %v5127_v23  ;;  %7175 = vmatmul.mubr.msk.f32.vlgmr.msra.gmra.mxu0 %vm437_vm3, %v5138_v39  ;;  %v9679_v50 = vld [vmem:[#allocation29_spill] sm:$0xff]  ;;  %v9684_v23 = vld [vmem:[#allocation38_spill] sm:$0xff] }
0x185e   :  { %v5136_v52 = vmul.f32 %v5131_v42, %v9668_v38  ;;  %v5137_v43 = vmul.f32 %v5130_v24, %v9669_v56  ;;  %5568 = vmatprep.mubr.f32.mxu0 %v9666_v34  ;;  %v9685_v42 = vld [vmem:[#allocation37_spill] sm:$0xff] }
0x1860   :  { %7176 = vmatprep.subr.msk.mxu1 %vm295_vm1, %v5137_v43  ;;  %v5474_v47 = vpop.permute.xlu1 %5473  ;;  %v6357_v32 = vpop.permute.xlu0 %6356 }
0x1861   :  { %v5481_v1 = vsel %vm760_vm5, %v5472_v8, %v5474_v47  ;;  %7177 = vmatpush1.msk.msra.mxu1 %vm295_vm1, %v5136_v52  ;;  %v7186_v8 = vld [vmem:[%s9596_s11 + $0xc] sm:$0xf]  ;;  %v6185_v52 = vsel %vm1559_vm8, %v6176_v58, %v6178_v41 }
0x1862   :  { %v5484_v31 = vmul.f32 %v5481_v1, %v9670_v15  ;;  %7178 = vmatmul.mubr.msk.f32.vlgmr.msra.gmra.mxu1 %vm437_vm3, %v5138_v39  ;;  %v9687_v1 = vld [vmem:[#allocation40_spill] sm:$0xff] }
0x1863   :  { %5639 = vmatprep.mubr.f32.mxu1 %v9666_v34  ;;  %v6187_v15 = vmul.f32 %v6185_v52, %v9687_v1 }
0x1864   :  { %7180 = vmatprep.subr.msk.mxu0 %vm295_vm1, %v5484_v31  ;;  %v5476_v62 = vpop.permute.xlu1 %5475  ;;  %v6355_v43 = vpop.permute.xlu0 %6354  ;;  %v7207_v31 = vld [vmem:[%s9596_s11 + $0x18] sm:$0xf] }
0x1865   :  { %v5479_v46 = vsel %vm760_vm5, %v5476_v62, %v5478_v13  ;;  %v5480_v40 = vsel %vm760_vm5, %v5474_v47, %v5476_v62  ;;  %7181 = vmatpush1.msk.msra.mxu0 %vm295_vm1, %v5483_v26  ;;  %v9686_v47 = vld [vmem:[#allocation39_spill] sm:$0xff]  ;;  %v9688_v62 = vld [vmem:[#allocation42_spill] sm:$0xff] }
0x1866   :  { %v5485_v18 = vmul.f32 %v5480_v40, %v9672_v19  ;;  %v5486_v55 = vmul.f32 %v5479_v46, %v9673_v16  ;;  %7182 = vmatmul.mubr.msk.f32.vlgmr.msra.gmra.mxu0 %vm437_vm3, %v7179_v61  ;;  %v9689_v40 = vld [vmem:[#allocation41_spill] sm:$0xff]  ;;  %v6364_v16 = vsel %vm1762_vm9, %v6355_v43, %v6357_v32 }
0x1867   :  { %5747 = vmatprep.mubr.f32.mxu0 %v9666_v34 }
0x1868   :  { %7183 = vmatprep.subr.msk.mxu1 %vm295_vm1, %v5486_v55  ;;  %v5653_v29 = vpop.permute.xlu1 %5652 }
0x1869   :  { %v5660_v3 = vsel %vm963_vm6, %v5651_v14, %v5653_v29  ;;  %7184 = vmatpush1.msk.msra.mxu1 %vm295_vm1, %v5485_v18  ;;  %v6536_v18 = vpop.permute.xlu0 %6535 }
0x186a   :  { %v5663_v4 = vmul.f32 %v5660_v3, %v9674_v37  ;;  %7185 = vmatmul.mubr.msk.f32.vlgmr.msra.gmra.mxu1 %vm437_vm3, %v7179_v61  ;;  %v9691_v3 = vld [vmem:[#allocation44_spill] sm:$0xff] }
0x186b   :  { %5818 = vmatprep.mubr.f32.mxu1 %v9666_v34  ;;  %v6366_v37 = vmul.f32 %v6364_v16, %v9691_v3 }
0x186c   :  { %7187 = vmatprep.subr.msk.mxu0 %vm295_vm1, %v5663_v4  ;;  %v5655_v6 = vpop.permute.xlu1 %5654  ;;  %v7214_v4 = vld [vmem:[%s9596_s11 + $0x1c] sm:$0xf] }
0x186d   :  { %v5658_v13 = vsel %vm963_vm6, %v5655_v6, %v5657_v44  ;;  %v5659_v0 = vsel %vm963_vm6, %v5653_v29, %v5655_v6  ;;  %7188 = vmatpush1.msk.msra.mxu0 %vm295_vm1, %v5662_v49  ;;  %v7193_v44 = vld [vmem:[%s9596_s11 + $0x10] sm:$0xf]  ;;  %v6534_v49 = vpop.permute.xlu0 %6533 }
0x186e   :  { %v5664_v14 = vmul.f32 %v5659_v0, %v9678_v2  ;;  %v5665_v48 = vmul.f32 %v5658_v13, %v9679_v50  ;;  %7194 = vmatprep.subr.msk.mxu0 %vm295_vm1, %v5830_v28  ;;  %7189 = vmatmul.mubr.msk.f32.vlgmr.msra.gmra.mxu0 %vm437_vm3, %v7186_v8  ;;  %v6543_v0 = vsel %vm1965_vm10, %v6534_v49, %v6536_v18  ;;  %v9694_v2 = vld [vmem:[#allocation47_spill] sm:$0xff]  ;;  %v9695_v50 = vld [vmem:[#allocation48_spill] sm:$0xff] }
0x186f   :  { %7195 = vmatpush1.msk.msra.mxu0 %vm295_vm1, %v5829_v7  ;;  %5914 = vmatprep.mubr.f32.mxu0 %v9666_v34 }
0x1870   :  { %7190 = vmatprep.subr.msk.mxu1 %vm295_vm1, %v5665_v48  ;;  %v6001_v27 = vpop.permute.xlu1 %6000  ;;  %v6545_v48 = vmul.f32 %v6543_v0, %v9695_v50 }
0x1871   :  { %v6005_v30 = vsel %vm1356_vm7, %v5999_v51, %v6001_v27  ;;  %7191 = vmatpush1.msk.msra.mxu1 %vm295_vm1, %v5664_v14 }
0x1872   :  { %v6009_v20 = vmul.f32 %v6005_v30, %v9682_v17  ;;  %7197 = vmatprep.subr.msk.mxu1 %vm295_vm1, %v5832_v22  ;;  %7192 = vmatmul.mubr.msk.f32.vlgmr.msra.gmra.mxu1 %vm437_vm3, %v7186_v8  ;;  %v8042_v17 = vmov 9  }
0x1873   :  { %7198 = vmatpush1.msk.msra.mxu1 %vm295_vm1, %v5831_v33  ;;  %7196 = vmatmul.mubr.msk.f32.vlgmr.msra.gmra.mxu0 %vm437_vm3, %v7193_v44 }
0x1874   :  { %v6003_v11 = vpop.permute.xlu1 %6002  ;;  %7201 = vmatprep.subr.msk.mxu0 %vm295_vm1, %v6009_v20  ;;  %5985 = vmatprep.mubr.f32.mxu1 %v9666_v34 }
0x1875   :  { %v6004_v39 = vsel %vm1356_vm7, %v6001_v27, %v6003_v11  ;;  %v6007_v51 = vsel %vm1356_vm7, %v6003_v11, %v9393_v59  ;;  %7202 = vmatpush1.msk.msra.mxu0 %vm295_vm1, %v6008_v21  ;;  %6093 = vmatprep.mubr.f32.mxu0 %v9666_v34 }
0x1876   :  { %v6010_v24 = vmul.f32 %v6004_v39, %v9684_v23  ;;  %v6011_v38 = vmul.f32 %v6007_v51, %v9685_v42  ;;  %7199 = vmatmul.mubr.msk.f32.vlgmr.msra.gmra.mxu1 %vm437_vm3, %v7193_v44  ;;  %v9696_v44 = vld [vmem:[#allocation50_spill] sm:$0xff]  ;;  %7732 = vset.pattern.permute.xlu1 %v8042_v17 }
0x1877   :  { %7203 = vmatmul.mubr.msk.f32.vlgmr.msra.gmra.mxu0 %vm437_vm3, %v7200_v12  ;;  %6164 = vmatprep.mubr.f32.mxu1 %v9666_v34 }
0x1878   :  { %7204 = vmatprep.subr.msk.mxu1 %vm295_vm1, %v6011_v38  ;;  %v6180_v56 = vpop.permute.xlu1 %6179  ;;  %6272 = vmatprep.mubr.f32.mxu0 %v9666_v34 }
0x1879   :  { %v6184_v60 = vsel %vm1559_vm8, %v6178_v41, %v6180_v56  ;;  %7205 = vmatpush1.msk.msra.mxu1 %vm295_vm1, %v6010_v24 }
0x187a   :  { %v6188_v59 = vmul.f32 %v6184_v60, %v9686_v47  ;;  %7206 = vmatmul.mubr.msk.f32.vlgmr.msra.gmra.mxu1 %vm437_vm3, %v7200_v12 }
0x187b   :  { %6343 = vmatprep.mubr.f32.mxu1 %v9666_v34 }
0x187c   :  { %v6182_v53 = vpop.permute.xlu1 %6181  ;;  %7208 = vmatprep.subr.msk.mxu0 %vm295_vm1, %v6188_v59 }
0x187d   :  { %v6183_v26 = vsel %vm1559_vm8, %v6180_v56, %v6182_v53  ;;  %v6186_v61 = vsel %vm1559_vm8, %v6182_v53, %v6176_v58  ;;  %7209 = vmatpush1.msk.msra.mxu0 %vm295_vm1, %v6187_v15  ;;  %v9693_v58 = vld [vmem:[#allocation45_spill] sm:$0xff] }
0x187e   :  { %v6189_v46 = vmul.f32 %v6183_v26, %v9688_v62  ;;  %v6190_v19 = vmul.f32 %v6186_v61, %v9689_v40  ;;  %7210 = vmatmul.mubr.msk.f32.vlgmr.msra.gmra.mxu0 %vm437_vm3, %v7207_v31 }
0x187f   :  { %6451 = vmatprep.mubr.f32.mxu0 %v9666_v34 }
0x1880   :  { %7211 = vmatprep.subr.msk.mxu1 %vm295_vm1, %v6190_v19  ;;  %v6359_v55 = vpop.permute.xlu1 %6358 }
0x1881   :  { %v6363_v41 = vsel %vm1762_vm9, %v6357_v32, %v6359_v55  ;;  %7212 = vmatpush1.msk.msra.mxu1 %vm295_vm1, %v6189_v46 }
0x1882   :  { %v6367_v29 = vmul.f32 %v6363_v41, %v9690_v45  ;;  %7213 = vmatmul.mubr.msk.f32.vlgmr.msra.gmra.mxu1 %vm437_vm3, %v7207_v31 }
0x1883   :  { %6522 = vmatprep.mubr.f32.mxu1 %v9666_v34 }
0x1884   :  { %v6361_v63 = vpop.permute.xlu1 %6360  ;;  %7215 = vmatprep.subr.msk.mxu0 %vm295_vm1, %v6367_v29 }
0x1885   :  { %v6362_v8 = vsel %vm1762_vm9, %v6359_v55, %v6361_v63  ;;  %v6365_v6 = vsel %vm1762_vm9, %v6361_v63, %v6355_v43  ;;  %7216 = vmatpush1.msk.msra.mxu0 %vm295_vm1, %v6366_v37 }
0x1886   :  { %v6368_v28 = vmul.f32 %v6362_v8, %v9692_v10  ;;  %v6369_v13 = vmul.f32 %v6365_v6, %v9693_v58  ;;  %7217 = vmatmul.mubr.msk.f32.vlgmr.msra.gmra.mxu0 %vm437_vm3, %v7214_v4 }
0x1887   :  { %6630 = vmatprep.mubr.f32.mxu0 %v9666_v34 }
0x1888   :  { %7218 = vmatprep.subr.msk.mxu1 %vm295_vm1, %v6369_v13  ;;  %v6538_v5 = vpop.permute.xlu1 %6537 }
0x1889   :  { %v6542_v7 = vsel %vm1965_vm10, %v6536_v18, %v6538_v5  ;;  %7219 = vmatpush1.msk.msra.mxu1 %vm295_vm1, %v6368_v28 }
0x188a   :  { %v6546_v14 = vmul.f32 %v6542_v7, %v9694_v2  ;;  %7220 = vmatmul.mubr.msk.f32.vlgmr.msra.gmra.mxu1 %vm437_vm3, %v7214_v4 }
0x188b   :  { %6701 = vmatprep.mubr.f32.mxu1 %v9666_v34 }
0x188c   :  { %v6540_v27 = vpop.permute.xlu1 %6539  ;;  %7222 = vmatprep.subr.msk.mxu0 %vm295_vm1, %v6546_v14 }
0x188d   :  { %v6541_v25 = vsel %vm1965_vm10, %v6538_v5, %v6540_v27  ;;  %v6544_v22 = vsel %vm1965_vm10, %v6540_v27, %v6534_v49  ;;  %7223 = vmatpush1.msk.msra.mxu0 %vm295_vm1, %v6545_v48 }
0x188e   :  { %v6547_v30 = vmul.f32 %v6541_v25, %v9696_v44  ;;  %v6548_v33 = vmul.f32 %v6544_v22, %v9697_v35  ;;  %7224 = vmatmul.mubr.msk.f32.vlgmr.msra.gmra.mxu0 %vm437_vm3, %v7221_v54 }
0x188f   :  { %6855 = vmatprep.mubr.f32.mxu0 %v9666_v34 }
0x1890   :  { %7225 = vmatprep.subr.msk.mxu1 %vm295_vm1, %v6548_v33 }
0x1891   :  { %7226 = vmatpush1.msk.msra.mxu1 %vm295_vm1, %v6547_v30 }
0x1892   :  { %7227 = vmatmul.mubr.msk.f32.vlgmr.msra.gmra.mxu1 %vm437_vm3, %v7221_v54 }
0x1893   :  { %6926 = vmatprep.mubr.f32.mxu1 %v9666_v34 }
0x190d   :  { %v5238_v20 = vpop.f32.mrf.mxu0 }
0x190f   :  { %v5240_v36 = vpop.f32.mrf.mxu0 }
0x191a   :  { %v5309_v21 = vpop.f32.mrf.mxu1 }
0x191c   :  { %v5311_v11 = vpop.f32.mrf.mxu1 }
0x191d   :  { %v5395_v32 = vpop.f32.mrf.mxu0 }
0x191e   :  { %v5396_v1 = vadd.f32 %v5395_v32, %v5238_v20 }
0x191f   :  { %v5397_v12 = vpop.f32.mrf.mxu0 }
0x1920   :  { %v5398_v53 = vadd.f32 %v5397_v12, %v5240_v36 }
0x1922   :  { %v5466_v39 = vpop.f32.mrf.mxu1 }
0x1923   :  { %v5467_v26 = vadd.f32 %v5466_v39, %v5309_v21 }
0x1924   :  { %v5468_v23 = vpop.f32.mrf.mxu1 }
0x1925   :  { %v5469_v46 = vadd.f32 %v5468_v23, %v5311_v11 }
0x1926   :  { %v5570_v51 = vpop.f32.mrf.mxu0 }
0x1927   :  { %v5646_v61 = vadd.f32 %v5570_v51, %v5396_v1 }
0x1928   :  { %v5572_v24 = vpop.f32.mrf.mxu0 }
0x1929   :  { %v5647_v19 = vadd.f32 %v5572_v24, %v5398_v53 }
0x192a   :  { %v5641_v42 = vpop.f32.mrf.mxu1 }
0x192b   :  { %v5648_v18 = vadd.f32 %v5641_v42, %v5467_v26  ;;  %v9698_v26 = vmov 0  }
0x192c   :  { %v5643_v52 = vpop.f32.mrf.mxu1 }
0x192d   :  { %v5649_v45 = vadd.f32 %v5643_v52, %v5469_v46 }
0x192e   :  { %v5749_v38 = vpop.f32.mrf.mxu0 }
0x192f   :  { %v5825_v16 = vadd.f32 %v5749_v38, %v5646_v61  ;;  %v6770_v61 = vld [vmem:[%s9598_s13] sm:$0xff] }
0x1930   :  { %v5751_v56 = vpop.f32.mrf.mxu0 }
0x1931   :  { %v5826_v29 = vadd.f32 %v5751_v56, %v5647_v19 }
0x1932   :  { %v5820_v43 = vpop.f32.mrf.mxu1 }
0x1933   :  { %v5916_v34 = vpop.f32.mrf.mxu0  ;;  %v5827_v3 = vadd.f32 %v5820_v43, %v5648_v18 }
0x1934   :  { %v5822_v60 = vpop.f32.mrf.mxu1  ;;  %v5992_v37 = vadd.f32 %v5916_v34, %v5825_v16 }
0x1935   :  { %v5918_v59 = vpop.f32.mrf.mxu0  ;;  %v5828_v49 = vadd.f32 %v5822_v60, %v5649_v45 }
0x1936   :  { %v5987_v47 = vpop.f32.mrf.mxu1  ;;  %v5993_v6 = vadd.f32 %v5918_v59, %v5826_v29 }
0x1937   :  { %v6095_v31 = vpop.f32.mrf.mxu0  ;;  %v5994_v10 = vadd.f32 %v5987_v47, %v5827_v3 }
0x1938   :  { %v5989_v15 = vpop.f32.mrf.mxu1  ;;  %v6171_v28 = vadd.f32 %v6095_v31, %v5992_v37 }
0x1939   :  { %v6097_v40 = vpop.f32.mrf.mxu0  ;;  %v5995_v7 = vadd.f32 %v5989_v15, %v5828_v49 }
0x193a   :  { %v6166_v62 = vpop.f32.mrf.mxu1  ;;  %v6172_v13 = vadd.f32 %v6097_v40, %v5993_v6 }
0x193b   :  { %v6173_v14 = vadd.f32 %v6166_v62, %v5994_v10 }
0x193c   :  { %v6168_v41 = vpop.f32.mrf.mxu1 }
0x193d   :  { %v6174_v54 = vadd.f32 %v6168_v41, %v5995_v7 }
0x193e   :  { %v6274_v55 = vpop.f32.mrf.mxu0 }
0x193f   :  { %v6350_v0 = vadd.f32 %v6274_v55, %v6171_v28 }
0x1940   :  { %v6276_v63 = vpop.f32.mrf.mxu0 }
0x1941   :  { %v6351_v50 = vadd.f32 %v6276_v63, %v6172_v13 }
0x1942   :  { %v6345_v4 = vpop.f32.mrf.mxu1 }
0x1943   :  { %v6352_v25 = vadd.f32 %v6345_v4, %v6173_v14 }
0x1944   :  { %v6347_v58 = vpop.f32.mrf.mxu1 }
0x1945   :  { %v6353_v35 = vadd.f32 %v6347_v58, %v6174_v54 }
0x1946   :  { %v6453_v8 = vpop.f32.mrf.mxu0 }
0x1947   :  { %v6529_v48 = vadd.f32 %v6453_v8, %v6350_v0 }
0x1948   :  { %v6455_v2 = vpop.f32.mrf.mxu0 }
0x1949   :  { %v6530_v22 = vadd.f32 %v6455_v2, %v6351_v50 }
0x194a   :  { %v6524_v5 = vpop.f32.mrf.mxu1 }
0x194b   :  { %v6531_v9 = vadd.f32 %v6524_v5, %v6352_v25  ;;  %v6769_v25 = vld [vmem:[%s9597_s12] sm:$0xff]  ;;  %s7981_s12 = scalar_lea.vmem %s6944_s26, 512 }
0x194c   :  { %v6526_v44 = vpop.f32.mrf.mxu1  ;;  %p7982_p7 = scmp.ne.s32.totalorder %s6944_s26, %s7981_s12  ;;  %p7987_p9 = scmp.lt.s32.totalorder %s7981_s12, %s7981_s12 }
0x194d   :  { %v6532_v36 = vadd.f32 %v6526_v44, %v6353_v35 }
0x194e   :  { %v6632_v27 = vpop.f32.mrf.mxu0  ;;  %p7988_p10 = por %p7987_p9, %p7986_p8 }
0x194f   :  { %v6708_v30 = vadd.f32 %v6632_v27, %v6529_v48 }
0x1950   :  { %v6634_v33 = vpop.f32.mrf.mxu0  ;;  %p7989_p11 = pnand %p7988_p10, %p7982_p7 }
0x1951   :  { %v6722_v17 = vmul.f32 %v6708_v30, %v6708_v30  ;;  %v6709_v20 = vadd.f32 %v6634_v33, %v6530_v22  ;;  %v6712_v32 = vsel %vm295_vm1, %v6708_v30, 0.0 }
0x1952   :  { %v6703_v21 = vpop.f32.mrf.mxu1 }
0x1953   :  { %v6713_v11 = vsel %vm295_vm1, %v6709_v20, 0.0  ;;  %v6723_v12 = vmul.f32 %v6709_v20, %v6709_v20  ;;  %v6710_v39 = vadd.f32 %v6703_v21, %v6531_v9  ;;  %v6726_v51 = vsel %vm295_vm1, %v6722_v17, 0.0 }
0x1954   :  { %v6714_v23 = vadd.f32 %v6713_v11, %v6712_v32  ;;  %v6705_v24 = vpop.f32.mrf.mxu1 }
0x1955   :  { %v6727_v42 = vsel %vm295_vm1, %v6723_v12, 0.0  ;;  %v6715_v38 = vsel %vm295_vm1, %v6710_v39, 0.0  ;;  %v6724_v52 = vmul.f32 %v6710_v39, %v6710_v39  ;;  %v6711_v56 = vadd.f32 %v6705_v24, %v6532_v36 }
0x1956   :  { %v6716_v43 = vadd.f32 %v6715_v38, %v6714_v23  ;;  %v6728_v34 = vadd.f32 %v6727_v42, %v6726_v51 }
0x1957   :  { %v6725_v60 = vmul.f32 %v6711_v56, %v6711_v56  ;;  %v6717_v47 = vsel %vm295_vm1, %v6711_v56, 0.0  ;;  %v6729_v59 = vsel %vm295_vm1, %v6724_v52, 0.0 }
0x1958   :  { %v6718_v1 = vadd.f32 %v6717_v47, %v6716_v43  ;;  %v6730_v15 = vadd.f32 %v6729_v59, %v6728_v34 }
0x1959   :  { %v6731_v31 = vsel %vm295_vm1, %v6725_v60, 0.0 }
0x195a   :  { %6719 = vadd.xlane.f32.xlu0 %v6718_v1  ;;  %v6732_v53 = vadd.f32 %v6731_v31, %v6730_v15 }
0x195c   :  { %6733 = vadd.xlane.f32.xlu1 %v6732_v53 }
0x196d   :  { %6758 = vperm.xlu1 %7732, %v9264_v57  }
0x1970   :  { %6750 = vperm.xlu0 %7731, %v9264_v57  }
0x1971   :  { %7733 = vset.pattern.permute.xlu1 %v9698_v26 }
0x1972   :  { %6773 = vperm.xlu1 %7733, %v6770_v61  }
0x1974   :  { %7734 = vset.pattern.permute.xlu0 %v9698_v26 }
0x19e3   :  { %v6720_v62 = vpop.xlane.xlu0 %6719 }
0x19e4   :  { %v6721_v46 = vmul.f32 0.001953125, %v6720_v62 }
0x19e5   :  { %v6734_v40 = vpop.xlane.xlu1 %6733 }
0x19e6   :  { %v6735_v19 = vmul.f32 0.001953125, %v6734_v40  ;;  %v6736_v18 = vmul.f32 %v6721_v46, %v6721_v46  ;;  %v6739_v45 = vsub.f32 %v6708_v30, %v6721_v46  ;;  %v6740_v57 = vsub.f32 %v6709_v20, %v6721_v46 }
0x19e7   :  { %v6741_v29 = vsub.f32 %v6710_v39, %v6721_v46  ;;  %v6742_v3 = vsub.f32 %v6711_v56, %v6721_v46 }
0x19e8   :  { %v6737_v16 = vsub.f32 %v6735_v19, %v6736_v18 }
0x19e9   :  { %v6759_v10 = vpop.permute.xlu1 %6758 }
0x19ea   :  { %v6738_v55 = vmax.f32 %v6737_v16, 0.0 }
0x19eb   :  { %v6751_v4 = vpop.permute.xlu0 %6750 }
0x19ec   :  { %v6743_v41 = vadd.f32 1e-05, %v6738_v55 }
0x19ed   :  { %v6774_v22 = vpop.permute.xlu1 %6773 }
0x19ee   :  { %7837 = vrsqrt.f32 %v6743_v41 }
0x19fb   :  { %v7838_v37 = vpop.eup %7837 }
0x19fc   :  { %v6745_v63 = vmul.f32 %v7838_v37, %v6739_v45  ;;  %v6746_v49 = vmul.f32 %v7838_v37, %v6740_v57  ;;  %v6747_v8 = vmul.f32 %v7838_v37, %v6741_v29  ;;  %v6748_v6 = vmul.f32 %v7838_v37, %v6742_v3 }
0x19fe   :  { %v6753_v28 = vmul.f32 %v6751_v4, %v6745_v63  ;;  %v6754_v58 = vmul.f32 %v6751_v4, %v6746_v49  ;;  %v6755_v13 = vmul.f32 %v6751_v4, %v6747_v8  ;;  %v6756_v0 = vmul.f32 %v6751_v4, %v6748_v6 }
0x1a00   :  { %v6761_v5 = vadd.f32 %v6759_v10, %v6753_v28  ;;  %v6762_v7 = vadd.f32 %v6759_v10, %v6754_v58  ;;  %v6763_v2 = vadd.f32 %v6759_v10, %v6755_v13  ;;  %v6764_v14 = vadd.f32 %v6759_v10, %v6756_v0 }
0x1a02   :  { %v6765_v50 = vmax.f32 %v6761_v5, 0.0  ;;  %v6766_v48 = vmax.f32 %v6762_v7, 0.0  ;;  %v6767_v54 = vmax.f32 %v6763_v2, 0.0  ;;  %v6768_v27 = vmax.f32 %v6764_v14, 0.0 }
0x1a04   :  { %7228 = vmatprep.subr.msk.mxu0 %vm295_vm1, %v6766_v48  ;;  %7231 = vmatprep.subr.msk.mxu1 %vm295_vm1, %v6768_v27 }
0x1a05   :  { %7229 = vmatpush1.msk.msra.mxu0 %vm295_vm1, %v6765_v50  ;;  %7232 = vmatpush1.msk.msra.mxu1 %vm295_vm1, %v6767_v54 }
0x1a06   :  { %7230 = vmatmul.mubr.msk.f32.vlgmr.msra.gmra.mxu0 %vm437_vm3, %v6769_v25  ;;  %7233 = vmatmul.mubr.msk.f32.vlgmr.msra.gmra.mxu1 %vm437_vm3, %v6769_v25 }
0x1ac6   :  { %v6857_v44 = vpop.f32.mrf.mxu0  ;;  %v6928_v30 = vpop.f32.mrf.mxu1 }
0x1ac7   :  { %v6858_v35 = vadd.f32 %v6857_v44, %v6774_v22  ;;  %v6929_v33 = vadd.f32 %v6928_v30, %v6774_v22 }
0x1ac8   :  { %v6859_v9 = vpop.f32.mrf.mxu0  ;;  %v6930_v17 = vpop.f32.mrf.mxu1 }
0x1ac9   :  { %6933 = vst [vmem:[#allocation14] sm:$0xff] %v6858_v35  ;;  %6936 = vst [vmem:[#allocation14 + $0x10] sm:$0xff] %v6929_v33  ;;  %v6860_v20 = vadd.f32 %v6859_v9, %v6774_v22  ;;  %v6931_v36 = vadd.f32 %v6930_v17, %v6774_v22 }
0x1acb   :  { %6934 = vst [vmem:[#allocation14 + $0x8] sm:$0xff] %v6860_v20  ;;  %6937 = vst [vmem:[#allocation14 + $0x18] sm:$0xff] %v6931_v36 }
0x1acc   :  { %7992 = shalt.err (!%p7989_p11)
}
0x1acd   :  { %6949 = dma.vmem_to_hbm [thread:$0]  %s6944_s26, 512, %s9599_s14, [#allocation4], %s8019_s17, %s8019_s17, %s8020_s18  }
0x1ace   :  { %8009 = dma.done.wait [#allocation4], 512  }
0x1acf   :  { %8010 = vsyncadd [#allocation4], 4294966784 }
0x1ad0   :  { %6953 = vsyncpa [#allocation3], 1 }
0x1ad1   :  { %6954 = vsyncpa [#allocation6], 1 }
0x1ad2   :  { %6955 = vsyncpa [#allocation9], 1 }
0x1ad3   :  { %6956 = vsyncpa [#allocation12], 1 }
0x1ad4   :  { %6957 = vsyncpa [#allocation4], 1 }

</bundles_post_ra>
